<compile_context>
chip_gen: v7x
topology: tpu7x:2x2x1
jax: 0.10.0
libtpu: 0.0.40
codegen_flags: <defaults>
</compile_context>

<pallas_src>
import jax
import jax.numpy as jnp
import numpy as np
from jax import lax
from jax.experimental import pallas as pl
from jax.experimental.pallas import tpu as pltpu


def _elu(x):
    return jnp.where(x > 0, x, jnp.exp(jnp.minimum(x, 0.0)) - 1.0)


# ------------------------------ Pallas kernel -------------------------------
def _make_pcblock_kernel(N, C, H, W, L):
    C2 = 2 * C
    Wp = W + 2
    R = N * H * W                       # number of valid output positions
    inv_r = 1.0 / R
    eps_bn = 1e-5

    def shift(v, d):
        # result[:, q] = v[:, (q + d) mod L]   (wrap lands only in masked slack)
        s = (-d) % L
        if s == 0:
            return v
        return pltpu.roll(v, s, axis=1)

    def kernel(x_ref, mpad_ref, valid_ref, w1_ref, w2_ref, bn1_ref, bn2_ref,
               o_ref, col1_ref, col2_ref):
        # x_ref:     (C,  L)     masked input at padded coords, 0 on halo/slack
        # mpad_ref:  (1,  L)     rounded mask at padded coords, 0 on halo/slack
        # valid_ref: (1,  L)     1.0 at valid corner coords, else 0
        # w1_ref:    (C2, 9*C)   column = tap*C  + ci
        # w2_ref:    (C,  9*C2)  column = tap*C2 + ci
        # bn1_ref:   (C2, 2)     [gamma | beta]
        # bn2_ref:   (C,  2)     [gamma | beta]
        # o_ref:     (C,  L)
        # col1_ref:  (9*C,  L)   VMEM im2col scratch for conv1
        # col2_ref:  (9*C2, L)   VMEM im2col scratch for conv2
        x = x_ref[...]
        mpad = mpad_ref[...]
        valid = valid_ref[...]

        # --- mask-count conv (um) + partial-conv ratio + center mask (XLU rolls)
        um_rows = [shift(mpad, (t // 3) * Wp + (t % 3)) for t in range(9)]
        um = (((um_rows[0] + um_rows[1]) + (um_rows[2] + um_rows[3]))
              + ((um_rows[4] + um_rows[5]) + (um_rows[6] + um_rows[7]))
              + um_rows[8])
        ratio = (9.0 / (um + 1e-8)) * jnp.clip(um, 0.0, 1.0) * valid
        mval = shift(mpad, Wp + 1) * valid    # mask value at the output position

        # --- partial conv 1 (C -> 2C): im2col (9 rolls into scratch rows) + MXU
        for tap in range(9):
            ki, kj = tap // 3, tap % 3
            col1_ref[pl.ds(tap * C, C), :] = shift(x, ki * Wp + kj)
        acc1 = jnp.dot(w1_ref[...], col1_ref[...],
                       preferred_element_type=jnp.float32,
                       precision=lax.Precision.HIGHEST)
        out1 = acc1 * ratio                    # exactly 0 outside valid coords

        # --- BN1 (training-mode batch stats, two-pass) + ELU + re-mask
        mu1 = jnp.sum(out1, axis=1, keepdims=True) * inv_r
        d1 = (out1 - mu1) * valid
        var1 = jnp.sum(d1 * d1, axis=1, keepdims=True) * inv_r
        h1 = d1 * (bn1_ref[:, 0:1] * lax.rsqrt(var1 + eps_bn)) + bn1_ref[:, 1:2]
        h1 = _elu(h1) * mval       # partial-conv mask; also zeroes halo/slack

        # --- partial conv 2 (2C -> C): im2col + MXU
        for tap in range(9):
            ki, kj = tap // 3, tap % 3
            col2_ref[pl.ds(tap * C2, C2), :] = shift(h1, (ki - 1) * Wp + (kj - 1))
        acc2 = jnp.dot(w2_ref[...], col2_ref[...],
                       preferred_element_type=jnp.float32,
                       precision=lax.Precision.HIGHEST)
        out2 = acc2 * ratio

        # --- BN2 (two-pass) + ELU
        mu2 = jnp.sum(out2, axis=1, keepdims=True) * inv_r
        d2 = (out2 - mu2) * valid
        var2 = jnp.sum(d2 * d2, axis=1, keepdims=True) * inv_r
        h2 = d2 * (bn2_ref[:, 0:1] * lax.rsqrt(var2 + eps_bn)) + bn2_ref[:, 1:2]
        o_ref[...] = _elu(h2)

    return kernel


# --------------------------------- wrapper ----------------------------------
def pcblock_pallas(feature, mask_in, w1, w2, g1, b1, g2, b2):
    """feature: (N,C,H,W) f32, mask_in: (N,1,MH,MW) f32, weights torch OIHW."""
    N, C, H, W = feature.shape
    C2 = 2 * C
    MH = mask_in.shape[2]
    s = MH // H

    # ---- mask preprocessing (glue): round(avg_pool2d(mask, 2, stride=MH//H))
    pooled = lax.reduce_window(mask_in, 0.0, lax.add,
                               (1, 1, 2, 2), (1, 1, s, s), 'VALID') / 4.0
    mask = jnp.round(pooled)                                   # (N,1,H,W)

    # ---- lane-dense flattened-padded layout
    Hp, Wp = H + 2, W + 2
    P = Hp * Wp
    NP = N * P
    max_off = 2 * Wp + 2
    L = ((NP + max_off + 127) // 128) * 128
    assert L >= NP + max_off

    # masked input, embedded at padded coords (hp, wp) = (h+1, w+1)
    xm = jnp.transpose(feature * mask, (1, 0, 2, 3))           # (C,N,H,W)
    xpad = jnp.pad(xm, ((0, 0), (0, 0), (1, 1), (1, 1)))       # (C,N,Hp,Wp)
    x_flat = jnp.pad(xpad.reshape(C, NP), ((0, 0), (0, L - NP)))

    # rounded mask, embedded at padded coords (kernel derives um / ratio / mval)
    mpad = jnp.pad(jnp.transpose(mask, (1, 0, 2, 3)),
                   ((0, 0), (0, 0), (1, 1), (1, 1)))           # (1,N,Hp,Wp)
    mpad_flat = jnp.pad(mpad.reshape(1, NP), ((0, 0), (0, L - NP)))

    # validity indicator at "corner" coords (h*Wp + w): 1 on valid outputs only
    v = jnp.pad(jnp.ones((1, N, H, W), jnp.float32),
                ((0, 0), (0, 0), (0, 2), (0, 2)))              # (1,N,Hp,Wp)
    valid_flat = jnp.pad(v.reshape(1, NP), ((0, 0), (0, L - NP)))

    # weights: torch OIHW -> (O, 9*I), column = (3*ki+kj)*I + i
    w1k = jnp.transpose(w1, (0, 2, 3, 1)).reshape(C2, 9 * C).astype(jnp.float32)
    w2k = jnp.transpose(w2, (0, 2, 3, 1)).reshape(C, 9 * C2).astype(jnp.float32)
    bn1 = jnp.stack([g1, b1], axis=1).astype(jnp.float32)      # (C2, 2)
    bn2 = jnp.stack([g2, b2], axis=1).astype(jnp.float32)      # (C, 2)

    kernel = _make_pcblock_kernel(N, C, H, W, L)
    out_flat = pl.pallas_call(
        kernel,
        out_shape=jax.ShapeDtypeStruct((C, L), jnp.float32),
        grid_spec=pltpu.PrefetchScalarGridSpec(
            num_scalar_prefetch=0,
            grid=(1,),
            in_specs=[
                pl.BlockSpec((C, L), lambda i: (0, 0)),
                pl.BlockSpec((1, L), lambda i: (0, 0)),
                pl.BlockSpec((1, L), lambda i: (0, 0)),
                pl.BlockSpec((C2, 9 * C), lambda i: (0, 0)),
                pl.BlockSpec((C, 9 * C2), lambda i: (0, 0)),
                pl.BlockSpec((C2, 2), lambda i: (0, 0)),
                pl.BlockSpec((C, 2), lambda i: (0, 0)),
            ],
            out_specs=pl.BlockSpec((C, L), lambda i: (0, 0)),
            scratch_shapes=[
                pltpu.VMEM((9 * C, L), jnp.float32),    # conv1 im2col
                pltpu.VMEM((9 * C2, L), jnp.float32),   # conv2 im2col
            ],
        ),
        compiler_params=pltpu.CompilerParams(
            dimension_semantics=("arbitrary",)),
    )(x_flat, mpad_flat, valid_flat, w1k, w2k, bn1, bn2)

    # undo the flattened-padded layout (glue)
    out = out_flat[:, :NP].reshape(C, N, Hp, Wp)[:, :, :H, :W]
    return jnp.transpose(out, (1, 0, 2, 3))                    # (N,C,H,W)


# ------------------------- pure-JAX reference (NCHW) -------------------------
def _partial_conv_ref(x, mask, w):
    dn = ('NCHW', 'OIHW', 'NCHW')
    raw = lax.conv_general_dilated(x * mask, w, (1, 1), ((1, 1), (1, 1)),
                                   dimension_numbers=dn,
                                   precision=lax.Precision.HIGHEST)
    ones = jnp.ones((1, 1, 3, 3), x.dtype)
    um = lax.conv_general_dilated(mask, ones, (1, 1), ((1, 1), (1, 1)),
                                  dimension_numbers=dn,
                                  precision=lax.Precision.HIGHEST)
    ratio = (9.0 / (um + 1e-8)) * jnp.clip(um, 0.0, 1.0)
    return raw * ratio


def _bn_train_ref(x, gamma, beta, eps=1e-5):
    mu = jnp.mean(x, axis=(0, 2, 3), keepdims=True)
    var = jnp.mean(jnp.square(x - mu), axis=(0, 2, 3), keepdims=True)
    return (x - mu) * (gamma[None, :, None, None] * lax.rsqrt(var + eps)) \
        + beta[None, :, None, None]


def pcblock_ref(feature, mask_in, w1, w2, g1, b1, g2, b2):
    H = feature.shape[2]
    MH = mask_in.shape[2]
    s = MH // H
    mask = lax.reduce_window(mask_in, 0.0, lax.add,
                             (1, 1, 2, 2), (1, 1, s, s), 'VALID') / 4.0
    mask = jnp.round(mask)
    h = _elu(_bn_train_ref(_partial_conv_ref(feature, mask, w1), g1, b1))
    return _elu(_bn_train_ref(_partial_conv_ref(h, mask, w2), g2, b2))


if __name__ == "__main__":
    key = jax.random.PRNGKey(0)
    kf, km, k1, k2, kg1, kb1, kg2, kb2 = jax.random.split(key, 8)

    N, C, H, W = 2, 4, 16, 16          # channel = 4
    MH = MW = 32                        # mask at 2x spatial (stride = MH//H = 2)

    feature = jax.random.normal(kf, (N, C, H, W), jnp.float32)
    mask_in = (jax.random.uniform(km, (N, 1, MH, MW)) > 0.4).astype(jnp.float32)
    w1 = 0.2 * jax.random.normal(k1, (2 * C, C, 3, 3), jnp.float32)   # rconv1
    w2 = 0.2 * jax.random.normal(k2, (C, 2 * C, 3, 3), jnp.float32)   # rconv2
    g1 = 1.0 + 0.1 * jax.random.normal(kg1, (2 * C,), jnp.float32)    # rbn1
    b1 = 0.1 * jax.random.normal(kb1, (2 * C,), jnp.float32)
    g2 = 1.0 + 0.1 * jax.random.normal(kg2, (C,), jnp.float32)        # rbn2
    b2 = 0.1 * jax.random.normal(kb2, (C,), jnp.float32)

    out = pcblock_pallas(feature, mask_in, w1, w2, g1, b1, g2, b2)
    out = jax.block_until_ready(out)
    assert out.shape == (N, C, H, W)

    ref = pcblock_ref(feature, mask_in, w1, w2, g1, b1, g2, b2)
    np.testing.assert_allclose(np.asarray(out), np.asarray(ref),
                               atol=2e-4, rtol=2e-4)
    print("KERNEL_OK")
</pallas_src>

<mosaic_0001>
module attributes {stable_mosaic.version = 11 : i64} {
  func.func @kernel(%arg0: i32, %arg1: memref<4x768xf32, #tpu.memory_space<vmem>>, %arg2: memref<1x768xf32, #tpu.memory_space<vmem>>, %arg3: memref<1x768xf32, #tpu.memory_space<vmem>>, %arg4: memref<8x36xf32, #tpu.memory_space<vmem>>, %arg5: memref<4x72xf32, #tpu.memory_space<vmem>>, %arg6: memref<8x2xf32, #tpu.memory_space<vmem>>, %arg7: memref<4x2xf32, #tpu.memory_space<vmem>>, %arg8: memref<4x768xf32, #tpu.memory_space<vmem>>, %arg9: memref<36x768xf32, #tpu.memory_space<vmem>>, %arg10: memref<72x768xf32, #tpu.memory_space<vmem>>) attributes {dimension_semantics = [#tpu.dimension_semantics<arbitrary>], iteration_bounds = array<i64: 1>, scalar_prefetch = 0 : i64, scratch_operands = 2 : i64, tpu.core_type = #tpu.core_type<tc>, window_params = [{pipeline_mode = #tpu.pipeline_mode<synchronous>, transform_indices = @transform_0, window_bounds = array<i64: 4, 768>}, {pipeline_mode = #tpu.pipeline_mode<synchronous>, transform_indices = @transform_1, window_bounds = array<i64: 1, 768>}, {pipeline_mode = #tpu.pipeline_mode<synchronous>, transform_indices = @transform_2, window_bounds = array<i64: 1, 768>}, {pipeline_mode = #tpu.pipeline_mode<synchronous>, transform_indices = @transform_3, window_bounds = array<i64: 8, 36>}, {pipeline_mode = #tpu.pipeline_mode<synchronous>, transform_indices = @transform_4, window_bounds = array<i64: 4, 72>}, {pipeline_mode = #tpu.pipeline_mode<synchronous>, transform_indices = @transform_5, window_bounds = array<i64: 8, 2>}, {pipeline_mode = #tpu.pipeline_mode<synchronous>, transform_indices = @transform_6, window_bounds = array<i64: 4, 2>}, {pipeline_mode = #tpu.pipeline_mode<synchronous>, transform_indices = @transform_7, window_bounds = array<i64: 4, 768>}]} {
    %c0 = arith.constant 0 : index
    %c0_0 = arith.constant 0 : index
    %0 = vector.load %arg1[%c0, %c0_0] : memref<4x768xf32, #tpu.memory_space<vmem>>, vector<4x768xf32>
    %c0_1 = arith.constant 0 : index
    %c0_2 = arith.constant 0 : index
    %1 = vector.load %arg2[%c0_1, %c0_2] : memref<1x768xf32, #tpu.memory_space<vmem>>, vector<1x768xf32>
    %c0_3 = arith.constant 0 : index
    %c0_4 = arith.constant 0 : index
    %2 = vector.load %arg3[%c0_3, %c0_4] : memref<1x768xf32, #tpu.memory_space<vmem>>, vector<1x768xf32>
    %c767_i32 = arith.constant 767 : i32
    %3 = tpu.dynamic_rotate %1 by %c767_i32 dim 1 : vector<1x768xf32>, i32 -> vector<1x768xf32>
    %c766_i32 = arith.constant 766 : i32
    %4 = tpu.dynamic_rotate %1 by %c766_i32 dim 1 : vector<1x768xf32>, i32 -> vector<1x768xf32>
    %c750_i32 = arith.constant 750 : i32
    %5 = tpu.dynamic_rotate %1 by %c750_i32 dim 1 : vector<1x768xf32>, i32 -> vector<1x768xf32>
    %c749_i32 = arith.constant 749 : i32
    %6 = tpu.dynamic_rotate %1 by %c749_i32 dim 1 : vector<1x768xf32>, i32 -> vector<1x768xf32>
    %c748_i32 = arith.constant 748 : i32
    %7 = tpu.dynamic_rotate %1 by %c748_i32 dim 1 : vector<1x768xf32>, i32 -> vector<1x768xf32>
    %c732_i32 = arith.constant 732 : i32
    %8 = tpu.dynamic_rotate %1 by %c732_i32 dim 1 : vector<1x768xf32>, i32 -> vector<1x768xf32>
    %c731_i32 = arith.constant 731 : i32
    %9 = tpu.dynamic_rotate %1 by %c731_i32 dim 1 : vector<1x768xf32>, i32 -> vector<1x768xf32>
    %c730_i32 = arith.constant 730 : i32
    %10 = tpu.dynamic_rotate %1 by %c730_i32 dim 1 : vector<1x768xf32>, i32 -> vector<1x768xf32>
    %11 = arith.addf %1, %3 : vector<1x768xf32>
    %12 = arith.addf %4, %5 : vector<1x768xf32>
    %13 = arith.addf %11, %12 : vector<1x768xf32>
    %14 = arith.addf %6, %7 : vector<1x768xf32>
    %15 = arith.addf %8, %9 : vector<1x768xf32>
    %16 = arith.addf %14, %15 : vector<1x768xf32>
    %17 = arith.addf %13, %16 : vector<1x768xf32>
    %18 = arith.addf %17, %10 : vector<1x768xf32>
    %cst = arith.constant 9.99999993E-9 : f32
    %19 = vector.broadcast %cst : f32 to vector<1x768xf32>
    %20 = arith.addf %18, %19 : vector<1x768xf32>
    %cst_5 = arith.constant 9.000000e+00 : f32
    %21 = vector.broadcast %cst_5 : f32 to vector<1x768xf32>
    %22 = arith.divf %21, %20 : vector<1x768xf32>
    %cst_6 = arith.constant 0.000000e+00 : f32
    %cst_7 = arith.constant 1.000000e+00 : f32
    %23 = vector.broadcast %cst_6 : f32 to vector<1x768xf32>
    %24 = arith.maximumf %23, %18 : vector<1x768xf32>
    %25 = vector.broadcast %cst_7 : f32 to vector<1x768xf32>
    %26 = arith.minimumf %25, %24 : vector<1x768xf32>
    %27 = arith.mulf %22, %26 : vector<1x768xf32>
    %28 = arith.mulf %27, %2 : vector<1x768xf32>
    %c749_i32_8 = arith.constant 749 : i32
    %29 = tpu.dynamic_rotate %1 by %c749_i32_8 dim 1 : vector<1x768xf32>, i32 -> vector<1x768xf32>
    %30 = arith.mulf %29, %2 : vector<1x768xf32>
    %c0_9 = arith.constant 0 : index
    %c0_10 = arith.constant 0 : index
    %31 = vector.load %arg9[%c0_9, %c0_10] : memref<36x768xf32, #tpu.memory_space<vmem>>, vector<4x768xf32>
    tpu.vector_store %arg9[%c0_9, %c0_10], %0 {strides = array<i32>} : memref<36x768xf32, #tpu.memory_space<vmem>>, vector<4x768xf32>,
    %c767_i32_11 = arith.constant 767 : i32
    %32 = tpu.dynamic_rotate %0 by %c767_i32_11 dim 1 : vector<4x768xf32>, i32 -> vector<4x768xf32>
    %c4 = arith.constant 4 : index
    %c0_12 = arith.constant 0 : index
    %33 = vector.load %arg9[%c4, %c0_12] : memref<36x768xf32, #tpu.memory_space<vmem>>, vector<4x768xf32>
    tpu.vector_store %arg9[%c4, %c0_12], %32 {strides = array<i32>} : memref<36x768xf32, #tpu.memory_space<vmem>>, vector<4x768xf32>,
    %c766_i32_13 = arith.constant 766 : i32
    %34 = tpu.dynamic_rotate %0 by %c766_i32_13 dim 1 : vector<4x768xf32>, i32 -> vector<4x768xf32>
    %c8 = arith.constant 8 : index
    %c0_14 = arith.constant 0 : index
    %35 = vector.load %arg9[%c8, %c0_14] : memref<36x768xf32, #tpu.memory_space<vmem>>, vector<4x768xf32>
    tpu.vector_store %arg9[%c8, %c0_14], %34 {strides = array<i32>} : memref<36x768xf32, #tpu.memory_space<vmem>>, vector<4x768xf32>,
    %c750_i32_15 = arith.constant 750 : i32
    %36 = tpu.dynamic_rotate %0 by %c750_i32_15 dim 1 : vector<4x768xf32>, i32 -> vector<4x768xf32>
    %c12 = arith.constant 12 : index
    %c0_16 = arith.constant 0 : index
    %37 = vector.load %arg9[%c12, %c0_16] : memref<36x768xf32, #tpu.memory_space<vmem>>, vector<4x768xf32>
    tpu.vector_store %arg9[%c12, %c0_16], %36 {strides = array<i32>} : memref<36x768xf32, #tpu.memory_space<vmem>>, vector<4x768xf32>,
    %c749_i32_17 = arith.constant 749 : i32
    %38 = tpu.dynamic_rotate %0 by %c749_i32_17 dim 1 : vector<4x768xf32>, i32 -> vector<4x768xf32>
    %c16 = arith.constant 16 : index
    %c0_18 = arith.constant 0 : index
    %39 = vector.load %arg9[%c16, %c0_18] : memref<36x768xf32, #tpu.memory_space<vmem>>, vector<4x768xf32>
    tpu.vector_store %arg9[%c16, %c0_18], %38 {strides = array<i32>} : memref<36x768xf32, #tpu.memory_space<vmem>>, vector<4x768xf32>,
    %c748_i32_19 = arith.constant 748 : i32
    %40 = tpu.dynamic_rotate %0 by %c748_i32_19 dim 1 : vector<4x768xf32>, i32 -> vector<4x768xf32>
    %c20 = arith.constant 20 : index
    %c0_20 = arith.constant 0 : index
    %41 = vector.load %arg9[%c20, %c0_20] : memref<36x768xf32, #tpu.memory_space<vmem>>, vector<4x768xf32>
    tpu.vector_store %arg9[%c20, %c0_20], %40 {strides = array<i32>} : memref<36x768xf32, #tpu.memory_space<vmem>>, vector<4x768xf32>,
    %c732_i32_21 = arith.constant 732 : i32
    %42 = tpu.dynamic_rotate %0 by %c732_i32_21 dim 1 : vector<4x768xf32>, i32 -> vector<4x768xf32>
    %c24 = arith.constant 24 : index
    %c0_22 = arith.constant 0 : index
    %43 = vector.load %arg9[%c24, %c0_22] : memref<36x768xf32, #tpu.memory_space<vmem>>, vector<4x768xf32>
    tpu.vector_store %arg9[%c24, %c0_22], %42 {strides = array<i32>} : memref<36x768xf32, #tpu.memory_space<vmem>>, vector<4x768xf32>,
    %c731_i32_23 = arith.constant 731 : i32
    %44 = tpu.dynamic_rotate %0 by %c731_i32_23 dim 1 : vector<4x768xf32>, i32 -> vector<4x768xf32>
    %c28 = arith.constant 28 : index
    %c0_24 = arith.constant 0 : index
    %45 = vector.load %arg9[%c28, %c0_24] : memref<36x768xf32, #tpu.memory_space<vmem>>, vector<4x768xf32>
    tpu.vector_store %arg9[%c28, %c0_24], %44 {strides = array<i32>} : memref<36x768xf32, #tpu.memory_space<vmem>>, vector<4x768xf32>,
    %c730_i32_25 = arith.constant 730 : i32
    %46 = tpu.dynamic_rotate %0 by %c730_i32_25 dim 1 : vector<4x768xf32>, i32 -> vector<4x768xf32>
    %c32 = arith.constant 32 : index
    %c0_26 = arith.constant 0 : index
    %47 = vector.load %arg9[%c32, %c0_26] : memref<36x768xf32, #tpu.memory_space<vmem>>, vector<4x768xf32>
    tpu.vector_store %arg9[%c32, %c0_26], %46 {strides = array<i32>} : memref<36x768xf32, #tpu.memory_space<vmem>>, vector<4x768xf32>,
    %c0_27 = arith.constant 0 : index
    %c0_28 = arith.constant 0 : index
    %48 = vector.load %arg4[%c0_27, %c0_28] : memref<8x36xf32, #tpu.memory_space<vmem>>, vector<8x36xf32>
    %c0_29 = arith.constant 0 : index
    %c0_30 = arith.constant 0 : index
    %49 = vector.load %arg9[%c0_29, %c0_30] : memref<36x768xf32, #tpu.memory_space<vmem>>, vector<36x768xf32>
    %cst_31 = arith.constant dense<0.000000e+00> : vector<8x768xf32>
    %50 = tpu.matmul %48, %49, %cst_31 {dimension_numbers = #tpu.dot_dimension_numbers<[1], [0], [0], [1], [0, 0, 1, 1], [], []>, precision = #tpu.contract_precision<fp32>} : vector<8x36xf32>, vector<36x768xf32>, vector<8x768xf32> -> vector<8x768xf32>
    %51 = vector.broadcast %28 : vector<1x768xf32> to vector<8x768xf32>
    %52 = arith.mulf %50, %51 : vector<8x768xf32>
    %cst_32 = arith.constant dense<0.000000e+00> : vector<8xf32>
    %53 = vector.multi_reduction <add>, %52, %cst_32 [1] : vector<8x768xf32> to vector<8xf32>
    %54 = vector.shape_cast %53 : vector<8xf32> to vector<8x1xf32>
    %cst_33 = arith.constant 0.001953125 : f32
    %55 = vector.broadcast %cst_33 : f32 to vector<8x1xf32>
    %56 = arith.mulf %54, %55 : vector<8x1xf32>
    %57 = vector.broadcast %56 : vector<8x1xf32> to vector<8x768xf32>
    %58 = arith.subf %52, %57 : vector<8x768xf32>
    %59 = vector.broadcast %2 : vector<1x768xf32> to vector<8x768xf32>
    %60 = arith.mulf %58, %59 : vector<8x768xf32>
    %61 = arith.mulf %60, %60 : vector<8x768xf32>
    %cst_34 = arith.constant dense<0.000000e+00> : vector<8xf32>
    %62 = vector.multi_reduction <add>, %61, %cst_34 [1] : vector<8x768xf32> to vector<8xf32>
    %63 = vector.shape_cast %62 : vector<8xf32> to vector<8x1xf32>
    %cst_35 = arith.constant 0.001953125 : f32
    %64 = vector.broadcast %cst_35 : f32 to vector<8x1xf32>
    %65 = arith.mulf %63, %64 : vector<8x1xf32>
    %c0_36 = arith.constant 0 : index
    %c0_37 = arith.constant 0 : index
    %66 = vector.load %arg6[%c0_36, %c0_37] : memref<8x2xf32, #tpu.memory_space<vmem>>, vector<8x1xf32>
    %cst_38 = arith.constant 9.99999974E-6 : f32
    %67 = vector.broadcast %cst_38 : f32 to vector<8x1xf32>
    %68 = arith.addf %65, %67 : vector<8x1xf32>
    %69 = math.rsqrt %68 : vector<8x1xf32>
    %70 = arith.mulf %66, %69 : vector<8x1xf32>
    %71 = vector.broadcast %70 : vector<8x1xf32> to vector<8x768xf32>
    %72 = arith.mulf %60, %71 : vector<8x768xf32>
    %c0_39 = arith.constant 0 : index
    %c1 = arith.constant 1 : index
    %73 = vector.load %arg6[%c0_39, %c1] : memref<8x2xf32, #tpu.memory_space<vmem>>, vector<8x1xf32>
    %74 = vector.broadcast %73 : vector<8x1xf32> to vector<8x768xf32>
    %75 = arith.addf %72, %74 : vector<8x768xf32>
    %cst_40 = arith.constant 0.000000e+00 : f32
    %76 = vector.broadcast %cst_40 : f32 to vector<8x768xf32>
    %77 = arith.cmpf ogt, %75, %76 : vector<8x768xf32>
    %cst_41 = arith.constant 0.000000e+00 : f32
    %78 = vector.broadcast %cst_41 : f32 to vector<8x768xf32>
    %79 = arith.minimumf %75, %78 : vector<8x768xf32>
    %80 = math.exp %79 : vector<8x768xf32>
    %cst_42 = arith.constant 1.000000e+00 : f32
    %81 = vector.broadcast %cst_42 : f32 to vector<8x768xf32>
    %82 = arith.subf %80, %81 : vector<8x768xf32>
    %83 = arith.select %77, %75, %82 : vector<8x768xi1>, vector<8x768xf32>
    %84 = vector.broadcast %30 : vector<1x768xf32> to vector<8x768xf32>
    %85 = arith.mulf %83, %84 : vector<8x768xf32>
    %c19_i32 = arith.constant 19 : i32
    %86 = tpu.dynamic_rotate %85 by %c19_i32 dim 1 : vector<8x768xf32>, i32 -> vector<8x768xf32>
    %c0_43 = arith.constant 0 : index
    %c0_44 = arith.constant 0 : index
    %87 = vector.load %arg10[%c0_43, %c0_44] : memref<72x768xf32, #tpu.memory_space<vmem>>, vector<8x768xf32>
    tpu.vector_store %arg10[%c0_43, %c0_44], %86 {strides = array<i32>} : memref<72x768xf32, #tpu.memory_space<vmem>>, vector<8x768xf32>,
    %c18_i32 = arith.constant 18 : i32
    %88 = tpu.dynamic_rotate %85 by %c18_i32 dim 1 : vector<8x768xf32>, i32 -> vector<8x768xf32>
    %c8_45 = arith.constant 8 : index
    %c0_46 = arith.constant 0 : index
    %89 = vector.load %arg10[%c8_45, %c0_46] : memref<72x768xf32, #tpu.memory_space<vmem>>, vector<8x768xf32>
    tpu.vector_store %arg10[%c8_45, %c0_46], %88 {strides = array<i32>} : memref<72x768xf32, #tpu.memory_space<vmem>>, vector<8x768xf32>,
    %c17_i32 = arith.constant 17 : i32
    %90 = tpu.dynamic_rotate %85 by %c17_i32 dim 1 : vector<8x768xf32>, i32 -> vector<8x768xf32>
    %c16_47 = arith.constant 16 : index
    %c0_48 = arith.constant 0 : index
    %91 = vector.load %arg10[%c16_47, %c0_48] : memref<72x768xf32, #tpu.memory_space<vmem>>, vector<8x768xf32>
    tpu.vector_store %arg10[%c16_47, %c0_48], %90 {strides = array<i32>} : memref<72x768xf32, #tpu.memory_space<vmem>>, vector<8x768xf32>,
    %c1_i32 = arith.constant 1 : i32
    %92 = tpu.dynamic_rotate %85 by %c1_i32 dim 1 : vector<8x768xf32>, i32 -> vector<8x768xf32>
    %c24_49 = arith.constant 24 : index
    %c0_50 = arith.constant 0 : index
    %93 = vector.load %arg10[%c24_49, %c0_50] : memref<72x768xf32, #tpu.memory_space<vmem>>, vector<8x768xf32>
    tpu.vector_store %arg10[%c24_49, %c0_50], %92 {strides = array<i32>} : memref<72x768xf32, #tpu.memory_space<vmem>>, vector<8x768xf32>,
    %c32_51 = arith.constant 32 : index
    %c0_52 = arith.constant 0 : index
    %94 = vector.load %arg10[%c32_51, %c0_52] : memref<72x768xf32, #tpu.memory_space<vmem>>, vector<8x768xf32>
    tpu.vector_store %arg10[%c32_51, %c0_52], %85 {strides = array<i32>} : memref<72x768xf32, #tpu.memory_space<vmem>>, vector<8x768xf32>,
    %c767_i32_53 = arith.constant 767 : i32
    %95 = tpu.dynamic_rotate %85 by %c767_i32_53 dim 1 : vector<8x768xf32>, i32 -> vector<8x768xf32>
    %c40 = arith.constant 40 : index
    %c0_54 = arith.constant 0 : index
    %96 = vector.load %arg10[%c40, %c0_54] : memref<72x768xf32, #tpu.memory_space<vmem>>, vector<8x768xf32>
    tpu.vector_store %arg10[%c40, %c0_54], %95 {strides = array<i32>} : memref<72x768xf32, #tpu.memory_space<vmem>>, vector<8x768xf32>,
    %c751_i32 = arith.constant 751 : i32
    %97 = tpu.dynamic_rotate %85 by %c751_i32 dim 1 : vector<8x768xf32>, i32 -> vector<8x768xf32>
    %c48 = arith.constant 48 : index
    %c0_55 = arith.constant 0 : index
    %98 = vector.load %arg10[%c48, %c0_55] : memref<72x768xf32, #tpu.memory_space<vmem>>, vector<8x768xf32>
    tpu.vector_store %arg10[%c48, %c0_55], %97 {strides = array<i32>} : memref<72x768xf32, #tpu.memory_space<vmem>>, vector<8x768xf32>,
    %c750_i32_56 = arith.constant 750 : i32
    %99 = tpu.dynamic_rotate %85 by %c750_i32_56 dim 1 : vector<8x768xf32>, i32 -> vector<8x768xf32>
    %c56 = arith.constant 56 : index
    %c0_57 = arith.constant 0 : index
    %100 = vector.load %arg10[%c56, %c0_57] : memref<72x768xf32, #tpu.memory_space<vmem>>, vector<8x768xf32>
    tpu.vector_store %arg10[%c56, %c0_57], %99 {strides = array<i32>} : memref<72x768xf32, #tpu.memory_space<vmem>>, vector<8x768xf32>,
    %c749_i32_58 = arith.constant 749 : i32
    %101 = tpu.dynamic_rotate %85 by %c749_i32_58 dim 1 : vector<8x768xf32>, i32 -> vector<8x768xf32>
    %c64 = arith.constant 64 : index
    %c0_59 = arith.constant 0 : index
    %102 = vector.load %arg10[%c64, %c0_59] : memref<72x768xf32, #tpu.memory_space<vmem>>, vector<8x768xf32>
    tpu.vector_store %arg10[%c64, %c0_59], %101 {strides = array<i32>} : memref<72x768xf32, #tpu.memory_space<vmem>>, vector<8x768xf32>,
    %c0_60 = arith.constant 0 : index
    %c0_61 = arith.constant 0 : index
    %103 = vector.load %arg5[%c0_60, %c0_61] : memref<4x72xf32, #tpu.memory_space<vmem>>, vector<4x72xf32>
    %c0_62 = arith.constant 0 : index
    %c0_63 = arith.constant 0 : index
    %104 = vector.load %arg10[%c0_62, %c0_63] : memref<72x768xf32, #tpu.memory_space<vmem>>, vector<72x768xf32>
    %cst_64 = arith.constant dense<0.000000e+00> : vector<4x768xf32>
    %105 = tpu.matmul %103, %104, %cst_64 {dimension_numbers = #tpu.dot_dimension_numbers<[1], [0], [0], [1], [0, 0, 1, 1], [], []>, precision = #tpu.contract_precision<fp32>} : vector<4x72xf32>, vector<72x768xf32>, vector<4x768xf32> -> vector<4x768xf32>
    %106 = vector.broadcast %28 : vector<1x768xf32> to vector<4x768xf32>
    %107 = arith.mulf %105, %106 : vector<4x768xf32>
    %cst_65 = arith.constant dense<0.000000e+00> : vector<4xf32>
    %108 = vector.multi_reduction <add>, %107, %cst_65 [1] : vector<4x768xf32> to vector<4xf32>
    %109 = vector.shape_cast %108 : vector<4xf32> to vector<4x1xf32>
    %cst_66 = arith.constant 0.001953125 : f32
    %110 = vector.broadcast %cst_66 : f32 to vector<4x1xf32>
    %111 = arith.mulf %109, %110 : vector<4x1xf32>
    %112 = vector.broadcast %111 : vector<4x1xf32> to vector<4x768xf32>
    %113 = arith.subf %107, %112 : vector<4x768xf32>
    %114 = vector.broadcast %2 : vector<1x768xf32> to vector<4x768xf32>
    %115 = arith.mulf %113, %114 : vector<4x768xf32>
    %116 = arith.mulf %115, %115 : vector<4x768xf32>
    %cst_67 = arith.constant dense<0.000000e+00> : vector<4xf32>
    %117 = vector.multi_reduction <add>, %116, %cst_67 [1] : vector<4x768xf32> to vector<4xf32>
    %118 = vector.shape_cast %117 : vector<4xf32> to vector<4x1xf32>
    %cst_68 = arith.constant 0.001953125 : f32
    %119 = vector.broadcast %cst_68 : f32 to vector<4x1xf32>
    %120 = arith.mulf %118, %119 : vector<4x1xf32>
    %c0_69 = arith.constant 0 : index
    %c0_70 = arith.constant 0 : index
    %121 = vector.load %arg7[%c0_69, %c0_70] : memref<4x2xf32, #tpu.memory_space<vmem>>, vector<4x1xf32>
    %cst_71 = arith.constant 9.99999974E-6 : f32
    %122 = vector.broadcast %cst_71 : f32 to vector<4x1xf32>
    %123 = arith.addf %120, %122 : vector<4x1xf32>
    %124 = math.rsqrt %123 : vector<4x1xf32>
    %125 = arith.mulf %121, %124 : vector<4x1xf32>
    %126 = vector.broadcast %125 : vector<4x1xf32> to vector<4x768xf32>
    %127 = arith.mulf %115, %126 : vector<4x768xf32>
    %c0_72 = arith.constant 0 : index
    %c1_73 = arith.constant 1 : index
    %128 = vector.load %arg7[%c0_72, %c1_73] : memref<4x2xf32, #tpu.memory_space<vmem>>, vector<4x1xf32>
    %129 = vector.broadcast %128 : vector<4x1xf32> to vector<4x768xf32>
    %130 = arith.addf %127, %129 : vector<4x768xf32>
    %cst_74 = arith.constant 0.000000e+00 : f32
    %131 = vector.broadcast %cst_74 : f32 to vector<4x768xf32>
    %132 = arith.cmpf ogt, %130, %131 : vector<4x768xf32>
    %cst_75 = arith.constant 0.000000e+00 : f32
    %133 = vector.broadcast %cst_75 : f32 to vector<4x768xf32>
    %134 = arith.minimumf %130, %133 : vector<4x768xf32>
    %135 = math.exp %134 : vector<4x768xf32>
    %cst_76 = arith.constant 1.000000e+00 : f32
    %136 = vector.broadcast %cst_76 : f32 to vector<4x768xf32>
    %137 = arith.subf %135, %136 : vector<4x768xf32>
    %138 = arith.select %132, %130, %137 : vector<4x768xi1>, vector<4x768xf32>
    %c0_77 = arith.constant 0 : index
    %c0_78 = arith.constant 0 : index
    %139 = vector.load %arg8[%c0_77, %c0_78] : memref<4x768xf32, #tpu.memory_space<vmem>>, vector<4x768xf32>
    tpu.vector_store %arg8[%c0_77, %c0_78], %138 {strides = array<i32>} : memref<4x768xf32, #tpu.memory_space<vmem>>, vector<4x768xf32>,
    return
  }
  func.func @transform_0(%arg0: i32) -> (i32, i32) {
    %c0_i32 = arith.constant 0 : i32
    %c0_i32_0 = arith.constant 0 : i32
    %c0_i32_1 = arith.constant 0 : i32
    return %c0_i32, %c0_i32_0 : i32, i32
  }
  func.func @transform_1(%arg0: i32) -> (i32, i32) {
    %c0_i32 = arith.constant 0 : i32
    %c0_i32_0 = arith.constant 0 : i32
    %c0_i32_1 = arith.constant 0 : i32
    return %c0_i32, %c0_i32_0 : i32, i32
  }
  func.func @transform_2(%arg0: i32) -> (i32, i32) {
    %c0_i32 = arith.constant 0 : i32
    %c0_i32_0 = arith.constant 0 : i32
    %c0_i32_1 = arith.constant 0 : i32
    return %c0_i32, %c0_i32_0 : i32, i32
  }
  func.func @transform_3(%arg0: i32) -> (i32, i32) {
    %c0_i32 = arith.constant 0 : i32
    %c0_i32_0 = arith.constant 0 : i32
    %c0_i32_1 = arith.constant 0 : i32
    return %c0_i32, %c0_i32_0 : i32, i32
  }
  func.func @transform_4(%arg0: i32) -> (i32, i32) {
    %c0_i32 = arith.constant 0 : i32
    %c0_i32_0 = arith.constant 0 : i32
    %c0_i32_1 = arith.constant 0 : i32
    return %c0_i32, %c0_i32_0 : i32, i32
  }
  func.func @transform_5(%arg0: i32) -> (i32, i32) {
    %c0_i32 = arith.constant 0 : i32
    %c0_i32_0 = arith.constant 0 : i32
    %c0_i32_1 = arith.constant 0 : i32
    return %c0_i32, %c0_i32_0 : i32, i32
  }
  func.func @transform_6(%arg0: i32) -> (i32, i32) {
    %c0_i32 = arith.constant 0 : i32
    %c0_i32_0 = arith.constant 0 : i32
    %c0_i32_1 = arith.constant 0 : i32
    return %c0_i32, %c0_i32_0 : i32, i32
  }
  func.func @transform_7(%arg0: i32) -> (i32, i32) {
    %c0_i32 = arith.constant 0 : i32
    %c0_i32_0 = arith.constant 0 : i32
    %c0_i32_1 = arith.constant 0 : i32
    return %c0_i32, %c0_i32_0 : i32, i32
  }
}

</mosaic_0001>

<bundles_post_ra>
// kernel: tpu_custom_call.1
= control target key start
LH: loop header
LB: loop body
LE: loop exit
PB: predicated region body
PF: predicated region fallthrough
CT: control target
= control target key end

     0   :  { %12 = vsyncpa [#allocation5], 0  ;;  %s8313_s0 = inlined_call_operand.hbm [shape: f32[4,768], index: 0, kind: input, shape index: {}]   ;;  %s8314_s1 = inlined_call_operand.vmem [shape: f32[1,768], index: 1, kind: input, shape index: {}]   ;;  %s8315_s2 = inlined_call_operand.vmem [shape: f32[1,768], index: 2, kind: input, shape index: {}]   ;;  %s8316_s3 = inlined_call_operand.vmem [shape: f32[8,36], index: 3, kind: input, shape index: {}]   ;;  %s8317_s4 = inlined_call_operand.vmem [shape: f32[4,72], index: 4, kind: input, shape index: {}]   ;;  %s8318_s5 = inlined_call_operand.vmem [shape: f32[8,2], index: 5, kind: input, shape index: {}]   ;;  %s8319_s6 = inlined_call_operand.vmem [shape: f32[4,2], index: 6, kind: input, shape index: {}]   ;;  %s8320_s7 = inlined_call_operand.hbm [shape: f32[4,768], index: 7, kind: output, shape index: {}]  }
   0x1   :  { %13 = vsyncpa [#allocation6], 0  ;;  %s5725_s24 = smov [#allocation4]   ;;  %s5677_s28 = scalar_lea.hbm %s8313_s0, 384 }
   0x2   :  { %s20_s25 = sshll.u32 %s5725_s24, 4  ;;  %p5678_p0 = scmp.ne.s32.totalorder %s8313_s0, %s5677_s28  ;;  %s21_s25 = int_to_ptr.vmem [resolvable:$true] %s20_s25 }
   0x3   :  { %p5681_p1 = scmp.lt.u32.totalorder %s5677_s28, %s8313_s0 }
   0x5   :  { %p5683_p2 = pnand %p5681_p1, %p5678_p0 }
   0x7   :  { %5686 = shalt.err (!%p5683_p2)
}
   0x8   :  { %s5687_s10 = scalar_lea.vmem %s21_s25, 384  ;;  %p5692_p4 = scmp.lt.s32.totalorder %s21_s25, %s21_s25 }
   0x9   :  { %p5688_p3 = scmp.ne.s32.totalorder %s21_s25, %s5687_s10  ;;  %p5693_p5 = scmp.lt.s32.totalorder %s5687_s10, %s5687_s10 }
   0xb   :  { %p5694_p6 = por %p5693_p5, %p5692_p4 }
   0xd   :  { %p5695_p7 = pnand %p5694_p6, %p5688_p3 }
   0xf   :  { %5698 = shalt.err (!%p5695_p7)
}
  0x10   :  { %23 = dma.hbm_to_vmem [thread:$0]  %s8313_s0, 384, %s21_s25, [#allocation5]  }
  0x11   :  { %5721 = dma.done.wait [#allocation5], 384  }
  0x12   :  { %5722 = vsyncadd [#allocation5], 4294966912  ;;  %v40_v0 = vld [vmem:[#allocation4 + $0x8] sm:$0xff]  ;;  %v39_v1 = vld [vmem:[#allocation4] sm:$0xff]  ;;  %s5726_s13 = smov 110   ;;  %s5727_s14 = smov 127   ;;  %v45_v7 = vlaneseq }
  0x13   :  { %v41_v2 = vld [vmem:[#allocation4 + $0x10] sm:$0xff]  ;;  %574 = vrot.lane.b32.xlu1 %v40_v0, %s5726_s13  ;;  %500 = vst [vmem:[#allocation2 + $0x10] sm:$0xf] %v40_v0  ;;  %508 = vrot.lane.b32.xlu0 %v40_v0, %s5727_s14  ;;  %498 = vst [vmem:[#allocation2] sm:$0xf] %v39_v1  ;;  %v492_v3 = vcombine.high %v39_v1, %v39_v1  ;;  %v493_v4 = vcombine.high %v40_v0, %v40_v0  ;;  %s5728_s0 = smov 126  }
  0x14   :  { %502 = vst [vmem:[#allocation2 + $0x20] sm:$0xf] %v41_v2  ;;  %v494_v5 = vcombine.high %v41_v2, %v41_v2  ;;  %s5729_s15 = smov 108   ;;  %s5730_s16 = smov 91   ;;  %v8325_v6 = vmov 0.0   ;;  %v5842_v8 = vshrl.u32 %v45_v7, 7 }
  0x15   :  { %499 = vst [vmem:[#allocation2 + $0x8] sm:$0xf] %v492_v3  ;;  %501 = vst [vmem:[#allocation2 + $0x18] sm:$0xf] %v493_v4  ;;  %s5731_s17 = smov 109   ;;  %s5732_s18 = smov 92   ;;  %896 = vmatprep.mubr.f32.mxu0 %v8325_v6  ;;  %1591 = vmatprep.mubr.f32.mxu1 %v8325_v6 }
  0x16   :  { %503 = vst [vmem:[#allocation2 + $0x28] sm:$0xf] %v494_v5  ;;  %s5733_s19 = smov 90   ;;  %v5847_v9 = vsub.s32 0, %v5842_v8  ;;  %v5850_v10 = vsub.s32 1, %v5842_v8  ;;  %v5868_v14 = vsub.s32 2, %v5842_v8 }
  0x17   :  { %570 = vrot.lane.b32.xlu1 %v39_v1, %s5726_s13  ;;  %504 = vrot.lane.b32.xlu0 %v39_v1, %s5727_s14  ;;  %v5855_v11 = vld [vmem:[%s8314_s1] sm:$0x3f]  ;;  %v5871_v15 = vsub.s32 3, %v5842_v8  ;;  %v5886_v18 = vsub.s32 4, %v5842_v8  ;;  %v5912_v22 = vand.u32 127, %v45_v7  ;;  %vm799_vm5 = vcmask 293888  }
  0x18   :  { %8475 = vst [vmem:[#allocation10_spill] sm:$0xff] %v5847_v9  ;;  %8476 = vst [vmem:[#allocation11_spill] sm:$0xff] %v5850_v10  ;;  %v5861_v12 = vrot.slane %v5855_v11, %v5847_v9  ;;  %v5865_v13 = vrot.slane %v5855_v11, %v5850_v10  ;;  %v5879_v16 = vrot.slane %v5855_v11, %v5868_v14  ;;  %v768_v63 = vld [vmem:[%s8316_s3] sm:$0xff]  ;;  %vm803_vm9 = vcmask 1043456   ;;  %s5739_s27 = smov 19   ;;  %s5740_s28 = smov 1  }
  0x19   :  { %8477 = vst [vmem:[#allocation12_spill] sm:$0xff] %v5868_v14  ;;  %8478 = vst [vmem:[#allocation13_spill] sm:$0xff] %v5871_v15  ;;  %v5883_v17 = vrot.slane %v5855_v11, %v5871_v15  ;;  %v5894_v19 = vrot.slane %v5855_v11, %v5886_v18  ;;  %vm127_vm0 = vcmp.lt.s32.totalorder %v5912_v22, 110  ;;  %vm89_vm1 = vcmp.lt.s32.totalorder %v5912_v22, 127  ;;  %s5741_s29 = smov 18   ;;  %s5742_s30 = smov 111  }
  0x1a   :  { %8479 = vst [vmem:[#allocation14_spill] sm:$0xff] %v5886_v18  ;;  %8480 = vst [vmem:[#allocation15_spill] sm:$0xff] %v5912_v22  ;;  %vm108_vm2 = vcmp.lt.s32.totalorder %v5912_v22, 126  ;;  %vm165_vm3 = vcmp.lt.s32.totalorder %v5912_v22, 108  ;;  %vm203_vm4 = vcmp.lt.s32.totalorder %v5912_v22, 91  ;;  %vm146_vm6 = vcmp.lt.s32.totalorder %v5912_v22, 109 }
  0x1b   :  { %572 = vrot.lane.b32.xlu1 %v492_v3, %s5726_s13  ;;  %506 = vrot.lane.b32.xlu0 %v492_v3, %s5727_s14  ;;  %vm184_vm7 = vcmp.lt.s32.totalorder %v5912_v22, 92  ;;  %vm222_vm8 = vcmp.lt.s32.totalorder %v5912_v22, 90 }
  0x1f   :  { %550 = vrot.lane.b32.xlu1 %v40_v0, %s5728_s0  ;;  %548 = vrot.lane.b32.xlu0 %v492_v3, %s5728_s0 }
  0x23   :  { %638 = vrot.lane.b32.xlu1 %v492_v3, %s5729_s15  ;;  %546 = vrot.lane.b32.xlu0 %v39_v1, %s5728_s0 }
  0x27   :  { %704 = vrot.lane.b32.xlu1 %v492_v3, %s5730_s16  ;;  %640 = vrot.lane.b32.xlu0 %v40_v0, %s5729_s15 }
  0x2b   :  { %636 = vrot.lane.b32.xlu1 %v39_v1, %s5729_s15  ;;  %706 = vrot.lane.b32.xlu0 %v40_v0, %s5730_s16 }
  0x2f   :  { %614 = vrot.lane.b32.xlu1 %v492_v3, %s5731_s17  ;;  %702 = vrot.lane.b32.xlu0 %v39_v1, %s5730_s16 }
  0x33   :  { %680 = vrot.lane.b32.xlu1 %v492_v3, %s5732_s18  ;;  %616 = vrot.lane.b32.xlu0 %v40_v0, %s5731_s17 }
  0x37   :  { %612 = vrot.lane.b32.xlu1 %v39_v1, %s5731_s17  ;;  %682 = vrot.lane.b32.xlu0 %v40_v0, %s5732_s18 }
  0x3b   :  { %746 = vrot.lane.b32.xlu1 %v492_v3, %s5733_s19  ;;  %678 = vrot.lane.b32.xlu0 %v39_v1, %s5732_s18 }
  0x3f   :  { %744 = vrot.lane.b32.xlu1 %v39_v1, %s5733_s19  ;;  %748 = vrot.lane.b32.xlu0 %v40_v0, %s5733_s19 }
  0x43   :  { %512 = vrot.lane.b32.xlu1 %v41_v2, %s5727_s14  ;;  %510 = vrot.lane.b32.xlu0 %v493_v4, %s5727_s14 }
  0x47   :  { %578 = vrot.lane.b32.xlu1 %v41_v2, %s5726_s13  ;;  %576 = vrot.lane.b32.xlu0 %v493_v4, %s5726_s13 }
  0x4b   :  { %554 = vrot.lane.b32.xlu1 %v41_v2, %s5728_s0  ;;  %552 = vrot.lane.b32.xlu0 %v493_v4, %s5728_s0 }
  0x4f   :  { %644 = vrot.lane.b32.xlu1 %v41_v2, %s5729_s15  ;;  %642 = vrot.lane.b32.xlu0 %v493_v4, %s5729_s15 }
  0x53   :  { %710 = vrot.lane.b32.xlu1 %v41_v2, %s5730_s16  ;;  %708 = vrot.lane.b32.xlu0 %v493_v4, %s5730_s16 }
  0x57   :  { %620 = vrot.lane.b32.xlu1 %v41_v2, %s5731_s17  ;;  %618 = vrot.lane.b32.xlu0 %v493_v4, %s5731_s17 }
  0x5b   :  { %686 = vrot.lane.b32.xlu1 %v41_v2, %s5732_s18  ;;  %684 = vrot.lane.b32.xlu0 %v493_v4, %s5732_s18 }
  0x5f   :  { %580 = vrot.lane.b32.xlu1 %v494_v5, %s5726_s13  ;;  %514 = vrot.lane.b32.xlu0 %v494_v5, %s5727_s14 }
  0x63   :  { %752 = vrot.lane.b32.xlu1 %v41_v2, %s5733_s19  ;;  %750 = vrot.lane.b32.xlu0 %v493_v4, %s5733_s19  ;;  %v801_v2 = vsel %vm799_vm5, %v768_v63, 0  ;;  %vm2779_vm5 = vcmp.lt.s32.totalorder %v5912_v22, 1 }
  0x64   :  { %v6013_v7 = vand.u32 4294901760, %v801_v2 }
  0x67   :  { %646 = vrot.lane.b32.xlu1 %v494_v5, %s5729_s15  ;;  %556 = vrot.lane.b32.xlu0 %v494_v5, %s5728_s0 }
  0x6b   :  { %622 = vrot.lane.b32.xlu1 %v494_v5, %s5731_s17  ;;  %712 = vrot.lane.b32.xlu0 %v494_v5, %s5730_s16 }
  0x6f   :  { %754 = vrot.lane.b32.xlu1 %v494_v5, %s5733_s19  ;;  %688 = vrot.lane.b32.xlu0 %v494_v5, %s5732_s18 }
  0x73   :  { %75 = vrot.lane.b32.xlu0 %v5861_v12, %s5727_s14  ;;  %77 = vrot.lane.b32.xlu1 %v5865_v13, %s5727_s14 }
  0x77   :  { %79 = vrot.lane.b32.xlu0 %v5879_v16, %s5727_s14  ;;  %81 = vrot.lane.b32.xlu1 %v5883_v17, %s5727_s14 }
  0x7b   :  { %83 = vrot.lane.b32.xlu0 %v5894_v19, %s5727_s14  ;;  %96 = vrot.lane.b32.xlu1 %v5861_v12, %s5728_s0 }
  0x7f   :  { %98 = vrot.lane.b32.xlu0 %v5865_v13, %s5728_s0  ;;  %100 = vrot.lane.b32.xlu1 %v5879_v16, %s5728_s0 }
  0x83   :  { %102 = vrot.lane.b32.xlu0 %v5883_v17, %s5728_s0  ;;  %104 = vrot.lane.b32.xlu1 %v5894_v19, %s5728_s0 }
  0x85   :  { %v5908_v20 = vpop.permute.xlu1 %574  ;;  %v5910_v21 = vpop.permute.xlu0 %508 }
  0x87   :  { %115 = vrot.lane.b32.xlu0 %v5861_v12, %s5726_s13  ;;  %117 = vrot.lane.b32.xlu1 %v5865_v13, %s5726_s13 }
  0x89   :  { %v5918_v23 = vpop.permute.xlu1 %570  ;;  %v5920_v24 = vpop.permute.xlu0 %504 }
  0x8b   :  { %119 = vrot.lane.b32.xlu0 %v5879_v16, %s5726_s13  ;;  %121 = vrot.lane.b32.xlu1 %v5883_v17, %s5726_s13 }
  0x8d   :  { %v573_v25 = vpop.permute.xlu1 %572  ;;  %v507_v26 = vpop.permute.xlu0 %506 }
  0x8e   :  { %v585_v27 = vsel %vm127_vm0, %v573_v25, %v5908_v20  ;;  %v586_v28 = vsel %vm127_vm0, %v5918_v23, %v573_v25  ;;  %v519_v29 = vsel %vm89_vm1, %v507_v26, %v5910_v21  ;;  %v520_v30 = vsel %vm89_vm1, %v5920_v24, %v507_v26 }
  0x8f   :  { %v594_v31 = vrot.slane %v586_v28, 4  ;;  %v595_v32 = vrot.slane %v585_v27, 4  ;;  %v528_v33 = vrot.slane %v520_v30, 4  ;;  %v529_v34 = vrot.slane %v519_v29, 4  ;;  %123 = vrot.lane.b32.xlu0 %v5894_v19, %s5726_s13  ;;  %134 = vrot.lane.b32.xlu1 %v5861_v12, %s5731_s17 }
  0x90   :  { %v6030_v29 = vsub.f32 %v801_v2, %v6013_v7 }
  0x91   :  { %606 = vst [vmem:[#allocation2 + $0x30] sm:$0xf0] %v594_v31  ;;  %607 = vst [vmem:[#allocation2 + $0x38] sm:$0xf0] %v595_v32  ;;  %v5945_v35 = vpop.permute.xlu1 %550  ;;  %v549_v36 = vpop.permute.xlu0 %548 }
  0x92   :  { %540 = vst [vmem:[#allocation2] sm:$0xf0] %v528_v33  ;;  %541 = vst [vmem:[#allocation2 + $0x8] sm:$0xf0] %v529_v34  ;;  %v561_v37 = vsel %vm108_vm2, %v549_v36, %v5945_v35 }
  0x93   :  { %565 = vst [vmem:[#allocation2 + $0x38] sm:$0xf] %v561_v37  ;;  %136 = vrot.lane.b32.xlu0 %v5865_v13, %s5731_s17  ;;  %138 = vrot.lane.b32.xlu1 %v5879_v16, %s5731_s17 }
  0x95   :  { %v639_v38 = vpop.permute.xlu1 %638  ;;  %v5954_v39 = vpop.permute.xlu0 %546 }
  0x96   :  { %v562_v40 = vsel %vm108_vm2, %v5954_v39, %v549_v36 }
  0x97   :  { %564 = vst [vmem:[#allocation2 + $0x30] sm:$0xf] %v562_v40  ;;  %140 = vrot.lane.b32.xlu0 %v5883_v17, %s5731_s17  ;;  %142 = vrot.lane.b32.xlu1 %v5894_v19, %s5731_s17  ;;  %v6049_v40 = vand.u32 4294901760, %v6030_v29 }
  0x99   :  { %v770_v41 = vld [vmem:[#allocation2 + $0x8] sm:$0xff]  ;;  %v705_v42 = vpop.permute.xlu1 %704  ;;  %v5964_v43 = vpop.permute.xlu0 %640  ;;  %v769_v49 = vld [vmem:[#allocation2] sm:$0xff] }
  0x9a   :  { %v651_v44 = vsel %vm165_vm3, %v639_v38, %v5964_v43  ;;  %v776_v45 = vld [vmem:[#allocation2 + $0x38] sm:$0xff]  ;;  %v822_v47 = vand.u32 4294901760, %v770_v41  ;;  %v824_v58 = vand.u32 4294901760, %v769_v49 }
  0x9b   :  { %v661_v46 = vrot.slane %v651_v44, 4  ;;  %v826_v48 = vand.u32 4294901760, %v776_v45  ;;  %153 = vrot.lane.b32.xlu0 %v5861_v12, %s5729_s15  ;;  %155 = vrot.lane.b32.xlu1 %v5865_v13, %s5729_s15 }
  0x9c   :  { %v6034_v30 = vsub.f32 %v770_v41, %v822_v47  ;;  %v6053_v41 = vsub.f32 %v769_v49, %v824_v58 }
  0x9d   :  { %673 = vst [vmem:[#allocation2 + $0x68] sm:$0xf0] %v661_v46  ;;  %v5974_v50 = vpop.permute.xlu1 %636  ;;  %v5976_v51 = vpop.permute.xlu0 %706  ;;  %v5978_v52 = vpack.c.bf16 %v826_v48, %v822_v47  ;;  %v6036_v31 = vsub.f32 %v776_v45, %v826_v48  ;;  %v6060_v45 = vsub.s32 5, %v5842_v8 }
  0x9e   :  { %v652_v53 = vsel %vm165_vm3, %v5974_v50, %v639_v38  ;;  %v717_v54 = vsel %vm203_vm4, %v705_v42, %v5976_v51  ;;  %v775_v55 = vld [vmem:[#allocation2 + $0x30] sm:$0xff] }
  0x9f   :  { %v660_v56 = vrot.slane %v652_v53, 4  ;;  %v727_v57 = vrot.slane %v717_v54, 4  ;;  %5130 = vmatprep.subr.bf16.mxu0 %v5978_v52  ;;  %v828_v59 = vand.u32 4294901760, %v775_v55  ;;  %157 = vrot.lane.b32.xlu0 %v5879_v16, %s5729_s15  ;;  %v8322_v44 = vand.u32 4294901760, %v6036_v31  ;;  %8481 = vst [vmem:[#allocation16_spill] sm:$0xff] %v6060_v45 }
  0xa0   :  { %159 = vrot.lane.b32.xlu1 %v5883_v17, %s5729_s15 }
  0xa1   :  { %672 = vst [vmem:[#allocation2 + $0x60] sm:$0xf0] %v660_v56  ;;  %739 = vst [vmem:[#allocation2 + $0x98] sm:$0xf0] %v727_v57  ;;  %v615_v60 = vpop.permute.xlu1 %614  ;;  %v5991_v61 = vpop.permute.xlu0 %702  ;;  %v5993_v62 = vpack.c.bf16 %v828_v59, %v824_v58  ;;  %v6040_v32 = vsub.f32 %v775_v55, %v828_v59  ;;  %v900_v59 = vsub.f32 %v6030_v29, %v6049_v40 }
  0xa2   :  { %v718_v0 = vsel %vm203_vm4, %v5991_v61, %v705_v42  ;;  %v8323_v42 = vand.u32 4294901760, %v6034_v30  ;;  %v923_v63 = vsub.f32 %v6036_v31, %v8322_v44 }
  0xa3   :  { %v726_v1 = vrot.slane %v718_v0, 4  ;;  %5132 = vmatpush1.bf16.msra.mxu0 %v5993_v62  ;;  %161 = vrot.lane.b32.xlu0 %v5894_v19, %s5729_s15  ;;  %v8321_v48 = vand.u32 4294901760, %v6040_v32  ;;  %v8324_v0 = vand.u32 4294901760, %v6053_v41 }
  0xa4   :  { %172 = vrot.lane.b32.xlu1 %v5861_v12, %s5732_s18 }
  0xa5   :  { %738 = vst [vmem:[#allocation2 + $0x90] sm:$0xf0] %v726_v1  ;;  %v681_v3 = vpop.permute.xlu1 %680  ;;  %v6007_v4 = vpop.permute.xlu0 %616  ;;  %v6090_v1 = vrot.slane %v5855_v11, %v6060_v45 }
  0xa6   :  { %v627_v5 = vsel %vm146_vm6, %v615_v60, %v6007_v4 }
  0xa7   :  { %631 = vst [vmem:[#allocation2 + $0x68] sm:$0xf] %v627_v5  ;;  %174 = vrot.lane.b32.xlu0 %v5865_v13, %s5732_s18 }
  0xa8   :  { %176 = vrot.lane.b32.xlu1 %v5879_v16, %s5732_s18 }
  0xa9   :  { %v6019_v25 = vpop.permute.xlu1 %612  ;;  %v6021_v26 = vpop.permute.xlu0 %682 }
  0xaa   :  { %v628_v27 = vsel %vm146_vm6, %v6019_v25, %v615_v60  ;;  %v693_v28 = vsel %vm184_vm7, %v681_v3, %v6021_v26  ;;  %v911_v60 = vsub.f32 %v6034_v30, %v8323_v42 }
  0xab   :  { %630 = vst [vmem:[#allocation2 + $0x60] sm:$0xf] %v628_v27  ;;  %697 = vst [vmem:[#allocation2 + $0x98] sm:$0xf] %v693_v28  ;;  %178 = vrot.lane.b32.xlu0 %v5883_v17, %s5732_s18 }
  0xac   :  { %180 = vrot.lane.b32.xlu1 %v5894_v19, %s5732_s18 }
  0xad   :  { %v747_v33 = vpop.permute.xlu1 %746  ;;  %v6042_v34 = vpop.permute.xlu0 %678 }
  0xae   :  { %v694_v36 = vsel %vm184_vm7, %v6042_v34, %v681_v3  ;;  %v782_v37 = vld [vmem:[#allocation2 + $0x68] sm:$0xff] }
  0xaf   :  { %696 = vst [vmem:[#allocation2 + $0x90] sm:$0xf] %v694_v36  ;;  %v830_v38 = vand.u32 4294901760, %v782_v37  ;;  %191 = vrot.lane.b32.xlu0 %v5861_v12, %s5730_s16 }
  0xb0   :  { %193 = vrot.lane.b32.xlu1 %v5865_v13, %s5730_s16 }
  0xb1   :  { %v6062_v46 = vpop.permute.xlu1 %744  ;;  %v6064_v47 = vpop.permute.xlu0 %748  ;;  %v6073_v55 = vsub.f32 %v782_v37, %v830_v38 }
  0xb2   :  { %v760_v49 = vsel %vm222_vm8, %v6062_v46, %v747_v33  ;;  %v759_v53 = vsel %vm222_vm8, %v747_v33, %v6064_v47  ;;  %v788_v54 = vld [vmem:[#allocation2 + $0x98] sm:$0xff]  ;;  %v781_v56 = vld [vmem:[#allocation2 + $0x60] sm:$0xff]  ;;  %v929_v33 = vsub.f32 %v6040_v32, %v8321_v48  ;;  %v917_v48 = vsub.f32 %v6053_v41, %v8324_v0 }
  0xb3   :  { %762 = vst [vmem:[#allocation2 + $0xc0] sm:$0xf] %v760_v49  ;;  %763 = vst [vmem:[#allocation2 + $0xc8] sm:$0xf] %v759_v53  ;;  %v834_v57 = vand.u32 4294901760, %v788_v54  ;;  %v832_v58 = vand.u32 4294901760, %v781_v56  ;;  %195 = vrot.lane.b32.xlu0 %v5879_v16, %s5730_s16 }
  0xb4   :  { %197 = vrot.lane.b32.xlu1 %v5883_v17, %s5730_s16  ;;  %v930_v42 = vand.u32 4294901760, %v929_v33 }
  0xb5   :  { %v6092_v2 = vpop.permute.xlu1 %512  ;;  %v511_v3 = vpop.permute.xlu0 %510  ;;  %v6094_v5 = vpack.c.bf16 %v834_v57, %v830_v38  ;;  %v6096_v27 = vsub.f32 %v788_v54, %v834_v57  ;;  %v6098_v28 = vsub.f32 %v781_v56, %v832_v58  ;;  %v8327_v38 = vand.u32 4294901760, %v6073_v55 }
  0xb6   :  { %v517_v36 = vsel %vm89_vm1, %v511_v3, %v6092_v2  ;;  %v518_v11 = vsel %vm89_vm1, %v5910_v21, %v511_v3  ;;  %v787_v37 = vld [vmem:[#allocation2 + $0x90] sm:$0xff]  ;;  %v6111_v56 = vand.u32 4294901760, %v900_v59  ;;  %v912_v57 = vand.u32 4294901760, %v911_v60 }
  0xb7   :  { %v530_v49 = vrot.slane %v518_v11, 4  ;;  %v531_v53 = vrot.slane %v517_v36, 4  ;;  %5134 = vmatprep.subr.bf16.mxu0 %v6094_v5  ;;  %v836_v54 = vand.u32 4294901760, %v787_v37  ;;  %199 = vrot.lane.b32.xlu0 %v5894_v19, %s5730_s16  ;;  %v8330_v21 = vand.u32 4294901760, %v6096_v27 }
  0xb8   :  { %8482 = vst [vmem:[#allocation17_spill] sm:$0xff] %v6111_v56  ;;  %85 = vrot.lane.b32.xlu1 %v6090_v1, %s5727_s14  ;;  %v924_v60 = vand.u32 4294901760, %v923_v63  ;;  %v8483_v45 = vand.u32 4294901760, %v6098_v28 }
  0xb9   :  { %542 = vst [vmem:[#allocation2 + $0x10] sm:$0xf0] %v530_v49  ;;  %543 = vst [vmem:[#allocation2 + $0x18] sm:$0xf0] %v531_v53  ;;  %v6122_v36 = vpop.permute.xlu1 %578  ;;  %v577_v59 = vpop.permute.xlu0 %576  ;;  %v6124_v11 = vpack.c.bf16 %v836_v54, %v832_v58  ;;  %v6126_v44 = vsub.f32 %v787_v37, %v836_v54  ;;  %v935_v53 = vsub.f32 %v6073_v55, %v8327_v38 }
  0xba   :  { %v583_v0 = vsel %vm127_vm0, %v577_v59, %v6122_v36  ;;  %v584_v6 = vsel %vm127_vm0, %v5908_v20, %v577_v59  ;;  %v794_v3 = vld [vmem:[#allocation2 + $0xc8] sm:$0xf]  ;;  %v793_v49 = vld [vmem:[#allocation2 + $0xc0] sm:$0xf]  ;;  %v947_v58 = vsub.f32 %v6096_v27, %v8330_v21  ;;  %v941_v21 = vsub.f32 %v6098_v28, %v8483_v45 }
  0xbb   :  { %v596_v63 = vrot.slane %v584_v6, 4  ;;  %v597_v33 = vrot.slane %v583_v0, 4  ;;  %5136 = vmatpush1.bf16.msra.mxu0 %v6124_v11  ;;  %v808_v37 = vsel %vm803_vm9, %v794_v3, 0  ;;  %v805_v54 = vsel %vm803_vm9, %v793_v49, 0  ;;  %106 = vrot.lane.b32.xlu0 %v6090_v1, %s5728_s0 }
  0xbc   :  { %v6145_v20 = vand.u32 4294901760, %v808_v37  ;;  %v6147_v59 = vand.u32 4294901760, %v805_v54  ;;  %v948_v38 = vand.u32 4294901760, %v947_v58  ;;  %125 = vrot.lane.b32.xlu1 %v6090_v1, %s5726_s13  ;;  %v5137_v3 = vpack.c.bf16 %v924_v60, %v912_v57 }
  0xbd   :  { %608 = vst [vmem:[#allocation2 + $0x40] sm:$0xf0] %v596_v63  ;;  %609 = vst [vmem:[#allocation2 + $0x48] sm:$0xf0] %v597_v33  ;;  %v6154_v6 = vpop.permute.xlu1 %554  ;;  %v553_v0 = vpop.permute.xlu0 %552  ;;  %v918_v49 = vand.u32 4294901760, %v917_v48  ;;  %v8333_v18 = vand.u32 4294901760, %v6126_v44 }
  0xbe   :  { %v559_v58 = vsel %vm108_vm2, %v553_v0, %v6154_v6  ;;  %v560_v45 = vsel %vm108_vm2, %v5945_v35, %v553_v0  ;;  %839 = vmatprep.subr.mxu0 %v6145_v20  ;;  %v6165_v63 = vsub.f32 %v805_v54, %v6147_v59  ;;  %v936_v33 = vand.u32 4294901760, %v935_v53 }
  0xbf   :  { %566 = vst [vmem:[#allocation2 + $0x40] sm:$0xf] %v560_v45  ;;  %567 = vst [vmem:[#allocation2 + $0x48] sm:$0xf] %v559_v58  ;;  %841 = vmatpush1.msra.mxu0 %v6147_v59  ;;  %v5139_v48 = vpack.c.bf16 %v930_v42, %v918_v49  ;;  %v953_v57 = vsub.f32 %v6126_v44, %v8333_v18  ;;  %v6172_v60 = vsub.f32 %v808_v37, %v6145_v20  ;;  %v8484_v18 = vmov 0.0  }
  0xc0   :  { %144 = vrot.lane.b32.xlu0 %v6090_v1, %s5731_s17  ;;  %5138 = vmatprep.subr.bf16.mxu0 %v5137_v3  ;;  %v5141_v35 = vpack.c.bf16 %v948_v38, %v936_v33  ;;  %v942_v53 = vand.u32 4294901760, %v941_v21  ;;  %v8336_v54 = vand.u32 4294901760, %v6165_v63  ;;  %v6178_v0 = vld [vmem:[#allocation2 + $0x18] sm:$0xff]  ;;  %v6180_v42 = vld [vmem:[#allocation2 + $0x10] sm:$0xff] }
  0xc1   :  { %902 = vmatmul.mubr.f32.vlgmr.msra.gmra.mrb[0].mxu0 %v6111_v56  ;;  %v6182_v49 = vpop.permute.xlu1 %644  ;;  %v643_v58 = vpop.permute.xlu0 %642  ;;  %v954_v37 = vand.u32 4294901760, %v953_v57  ;;  %163 = vrot.lane.b32.xlu1 %v6090_v1, %s5729_s15  ;;  %v8485_v38 = vand.u32 4294901760, %v6172_v60 }
  0xc2   :  { %5140 = vmatpush1.bf16.msra.mxu0 %v5139_v48  ;;  %1022 = vmatprep.mubr.f32.mxu0 %v8484_v18  ;;  %v649_v21 = vsel %vm165_vm3, %v643_v58, %v6182_v49  ;;  %v650_v33 = vsel %vm165_vm3, %v5964_v43, %v643_v58  ;;  %v965_v48 = vsub.f32 %v6165_v63, %v8336_v54  ;;  %v8486_v43 = vand.u32 4294901760, %v6178_v0 }
  0xc3   :  { %5142 = vmatprep.subr.bf16.mxu0 %v5141_v35  ;;  %v662_v57 = vrot.slane %v650_v33, 4  ;;  %v663_v3 = vrot.slane %v649_v21, 4  ;;  %v5143_v45 = vpack.c.bf16 %v954_v37, %v942_v53  ;;  %v959_v15 = vsub.f32 %v6172_v60, %v8485_v38 }
  0xc4   :  { %182 = vrot.lane.b32.xlu0 %v6090_v1, %s5732_s18  ;;  %v6207_v35 = vsub.f32 %v6178_v0, %v8486_v43  ;;  %v8487_v58 = vand.u32 4294901760, %v6180_v42  ;;  %v966_v21 = vand.u32 4294901760, %v965_v48 }
  0xc5   :  { %674 = vst [vmem:[#allocation2 + $0x70] sm:$0xf0] %v662_v57  ;;  %675 = vst [vmem:[#allocation2 + $0x78] sm:$0xf0] %v663_v3  ;;  %v6214_v53 = vpop.permute.xlu1 %710  ;;  %v709_v37 = vpop.permute.xlu0 %708  ;;  %v960_v38 = vand.u32 4294901760, %v959_v15  ;;  %201 = vrot.lane.b32.xlu1 %v6090_v1, %s5730_s16 }
  0xc6   :  { %v6212_v54 = vsub.f32 %v6180_v42, %v8487_v58  ;;  %5144 = vmatpush1.bf16.msra.mxu0 %v5143_v45  ;;  %v715_v33 = vsel %vm203_vm4, %v709_v37, %v6214_v53  ;;  %v716_v43 = vsel %vm203_vm4, %v5976_v51, %v709_v37  ;;  %v6222_v14 = vld [vmem:[#allocation2 + $0x48] sm:$0xff]  ;;  %v8341_v58 = vand.u32 4294901760, %v6207_v35  ;;  %v6225_v57 = vld [vmem:[#allocation2 + $0x40] sm:$0xff] }
  0xc7   :  { %8488 = vst [vmem:[#allocation18_spill] sm:$0xff] %v6225_v57  ;;  %v728_v15 = vrot.slane %v716_v43, 4  ;;  %v729_v45 = vrot.slane %v715_v33, 4  ;;  %961 = vmatprep.subr.mxu0 %v960_v38  ;;  %v8343_v48 = vand.u32 4294901760, %v6222_v14  ;;  %v8342_v10 = vand.u32 4294901760, %v6225_v57 }
  0xc8   :  { %210 = vrot.lane.b32.xlu0 %v5861_v12, %s5733_s19  ;;  %v5145_v51 = vpack.c.bf16 %v6036_v31, %v6034_v30  ;;  %v5147_v33 = vpack.c.bf16 %v6040_v32, %v6053_v41  ;;  %v1480_v38 = vsub.f32 %v6207_v35, %v8341_v58 }
  0xc9   :  { %740 = vst [vmem:[#allocation2 + $0xa0] sm:$0xf0] %v728_v15  ;;  %741 = vst [vmem:[#allocation2 + $0xa8] sm:$0xf0] %v729_v45  ;;  %v6236_v37 = vpop.permute.xlu1 %620  ;;  %v619_v3 = vpop.permute.xlu0 %618  ;;  %v6246_v12 = vsub.f32 %v6222_v14, %v8343_v48  ;;  %v6251_v43 = vsub.f32 %v6225_v57, %v8342_v10  ;;  %v5149_v45 = vpack.c.bf16 %v6096_v27, %v6073_v55  ;;  %v8489_v10 = vand.u32 4294901760, %v6212_v54 }
  0xca   :  { %967 = vmatpush1.msra.mxu0 %v966_v21  ;;  %v625_v21 = vsel %vm146_vm6, %v619_v3, %v6236_v37  ;;  %v626_v15 = vsel %vm146_vm6, %v6007_v4, %v619_v3  ;;  %212 = vrot.lane.b32.xlu1 %v5865_v13, %s5733_s19 }
  0xcb   :  { %5146 = vmatprep.subr.bf16.mxu0 %v5145_v51  ;;  %1024 = vmatmul.mubr.f32.vlgmr.msra.gmra.mrb[0].mxu0 %v6013_v7  ;;  %632 = vst [vmem:[#allocation2 + $0x70] sm:$0xf] %v626_v15  ;;  %633 = vst [vmem:[#allocation2 + $0x78] sm:$0xf] %v625_v21  ;;  %v8346_v58 = vand.u32 4294901760, %v6246_v12  ;;  %v1486_v48 = vsub.f32 %v6212_v54, %v8489_v10  ;;  %v8347_v9 = vand.u32 4294901760, %v6251_v43 }
  0xcc   :  { %5148 = vmatpush1.bf16.msra.mxu0 %v5147_v33  ;;  %1114 = vmatprep.mubr.f32.mxu0 %v8484_v18  ;;  %v5151_v51 = vpack.c.bf16 %v6126_v44, %v6098_v28  ;;  %v1481_v33 = vand.u32 4294901760, %v1480_v38 }
  0xcd   :  { %5150 = vmatprep.subr.bf16.mxu0 %v5149_v45  ;;  %v6270_v4 = vpop.permute.xlu1 %686  ;;  %v685_v3 = vpop.permute.xlu0 %684  ;;  %v1492_v21 = vsub.f32 %v6246_v12, %v8346_v58  ;;  %v1498_v10 = vsub.f32 %v6251_v43, %v8347_v9  ;;  %214 = vrot.lane.b32.xlu0 %v5879_v16, %s5733_s19  ;;  %v1487_v45 = vand.u32 4294901760, %v1486_v48 }
  0xce   :  { %v691_v13 = vsel %vm184_vm7, %v685_v3, %v6270_v4  ;;  %v692_v15 = vsel %vm184_vm7, %v6021_v26, %v685_v3  ;;  %216 = vrot.lane.b32.xlu1 %v5883_v17, %s5733_s19 }
  0xcf   :  { %698 = vst [vmem:[#allocation2 + $0xa0] sm:$0xf] %v692_v15  ;;  %699 = vst [vmem:[#allocation2 + $0xa8] sm:$0xf] %v691_v13  ;;  %v1493_v38 = vand.u32 4294901760, %v1492_v21  ;;  %v1499_v58 = vand.u32 4294901760, %v1498_v10 }
  0xd0   :  { %5152 = vmatpush1.bf16.msra.mxu0 %v5151_v51 }
  0xd1   :  { %1056 = vmatprep.subr.mxu0 %v6172_v60  ;;  %v581_v16 = vpop.permute.xlu1 %580  ;;  %v515_v9 = vpop.permute.xlu0 %514  ;;  %v5185_v56 = vpack.c.bf16 %v1493_v38, %v1481_v33  ;;  %v5187_v57 = vpack.c.bf16 %v1499_v58, %v1487_v45  ;;  %218 = vrot.lane.b32.xlu0 %v5894_v19, %s5733_s19 }
  0xd2   :  { %v582_v26 = vsel %vm127_vm0, %v6122_v36, %v581_v16  ;;  %v587_v48 = vsel %vm127_vm0, %v581_v16, %v5918_v23  ;;  %v516_v3 = vsel %vm89_vm1, %v6092_v2, %v515_v9  ;;  %v521_v17 = vsel %vm89_vm1, %v515_v9, %v5920_v24  ;;  %v6305_v58 = vld [vmem:[#allocation2 + $0x78] sm:$0xff]  ;;  %v6307_v51 = vld [vmem:[#allocation2 + $0x70] sm:$0xff]  ;;  %220 = vrot.lane.b32.xlu1 %v6090_v1, %s5733_s19 }
  0xd3   :  { %v598_v19 = vrot.slane %v582_v26, 4  ;;  %v599_v33 = vrot.slane %v587_v48, 4  ;;  %v532_v21 = vrot.slane %v516_v3, 4  ;;  %v533_v36 = vrot.slane %v521_v17, 4  ;;  %5186 = vmatprep.subr.bf16.mxu1 %v5185_v56 }
  0xd4   :  { %1059 = vmatpush1.msra.mxu0 %v6165_v63  ;;  %5188 = vmatpush1.bf16.msra.mxu1 %v5187_v57  ;;  %v1399_v23 = vand.u32 4294901760, %v6305_v58  ;;  %v8353_v2 = vand.u32 4294901760, %v6307_v51 }
  0xd5   :  { %5154 = vmatprep.subr.bf16.mxu0 %v5978_v52  ;;  %610 = vst [vmem:[#allocation2 + $0x50] sm:$0xf0] %v598_v19  ;;  %611 = vst [vmem:[#allocation2 + $0x58] sm:$0xf0] %v599_v33  ;;  %v6313_v9 = vpop.permute.xlu1 %752  ;;  %v751_v24 = vpop.permute.xlu0 %750  ;;  %1117 = vmatmul.mubr.f32.vlgmr.msra.gmra.mrb[0].mxu0 %v6030_v29 }
  0xd6   :  { %544 = vst [vmem:[#allocation2 + $0x20] sm:$0xf0] %v532_v21  ;;  %545 = vst [vmem:[#allocation2 + $0x28] sm:$0xf0] %v533_v36  ;;  %v757_v56 = vsel %vm222_vm8, %v751_v24, %v6313_v9  ;;  %v758_v57 = vsel %vm222_vm8, %v6064_v47, %v751_v24  ;;  %5156 = vmatpush1.bf16.msra.mxu0 %v5993_v62  ;;  %1197 = vmatprep.mubr.f32.mxu0 %v8484_v18  ;;  %v6326_v10 = vld [vmem:[#allocation2 + $0xa8] sm:$0xff]  ;;  %v6333_v1 = vld [vmem:[#allocation2 + $0xa0] sm:$0xff] }
  0xd7   :  { %v6331_v13 = vsub.f32 %v6305_v58, %v1399_v23  ;;  %764 = vst [vmem:[#allocation2 + $0xd0] sm:$0xf] %v758_v57  ;;  %765 = vst [vmem:[#allocation2 + $0xd8] sm:$0xf] %v757_v56  ;;  %5158 = vmatprep.subr.bf16.mxu0 %v6094_v5  ;;  %v1403_v15 = vand.u32 4294901760, %v6326_v10  ;;  %v8352_v47 = vand.u32 4294901760, %v6333_v1  ;;  %v6341_v38 = vsub.f32 %v6307_v51, %v8353_v2 }
  0xd8   :  { %v8491_v57 = vand.u32 4294901760, %v6036_v31 }
  0xd9   :  { %v8351_v45 = vand.u32 4294901760, %v6331_v13  ;;  %v647_v16 = vpop.permute.xlu1 %646  ;;  %v557_v26 = vpop.permute.xlu0 %556  ;;  %v6347_v48 = vsub.f32 %v6326_v10, %v1403_v15  ;;  %v8360_v3 = vand.u32 4294901760, %v6341_v38  ;;  %v6353_v17 = vsub.f32 %v6333_v1, %v8352_v47 }
  0xda   :  { %v648_v19 = vsel %vm165_vm3, %v6182_v49, %v647_v16  ;;  %v653_v33 = vsel %vm165_vm3, %v647_v16, %v5974_v50  ;;  %v558_v21 = vsel %vm108_vm2, %v6154_v6, %v557_v26  ;;  %v563_v36 = vsel %vm108_vm2, %v557_v26, %v5954_v39  ;;  %5160 = vmatpush1.bf16.msra.mxu0 %v6124_v11 }
  0xdb   :  { %v664_v24 = vrot.slane %v648_v19, 4  ;;  %v665_v56 = vrot.slane %v653_v33, 4  ;;  %568 = vst [vmem:[#allocation2 + $0x50] sm:$0xf] %v558_v21  ;;  %569 = vst [vmem:[#allocation2 + $0x58] sm:$0xf] %v563_v36  ;;  %1140 = vmatprep.subr.mxu0 %v6145_v20  ;;  %v1504_v50 = vsub.f32 %v6331_v13, %v8351_v45 }
  0xdc   :  { %v1515_v49 = vand.u32 4294901760, %v6347_v48  ;;  %v8490_v6 = vand.u32 4294901760, %v6034_v30  ;;  %v8359_v39 = vand.u32 4294901760, %v6353_v17  ;;  %v8492_v33 = vand.u32 4294901760, %v6053_v41 }
  0xdd   :  { %676 = vst [vmem:[#allocation2 + $0x80] sm:$0xf0] %v664_v24  ;;  %677 = vst [vmem:[#allocation2 + $0x88] sm:$0xf0] %v665_v56  ;;  %v623_v26 = vpop.permute.xlu1 %622  ;;  %v713_v19 = vpop.permute.xlu0 %712  ;;  %v8493_v21 = vand.u32 4294901760, %v6040_v32  ;;  %v8494_v45 = vand.u32 4294901760, %v6073_v55 }
  0xde   :  { %v5161_v16 = vpack.c.bf16 %v8491_v57, %v8490_v6  ;;  %v8495_v47 = vand.u32 4294901760, %v6096_v27  ;;  %v1505_v30 = vand.u32 4294901760, %v1504_v50  ;;  %v1516_v31 = vsub.f32 %v6347_v48, %v1515_v49  ;;  %1142 = vmatpush1.msra.mxu0 %v6147_v59  ;;  %v796_v27 = vld [vmem:[#allocation2 + $0xd8] sm:$0xf] }
  0xdf   :  { %v5163_v36 = vpack.c.bf16 %v8493_v21, %v8492_v33  ;;  %v624_v24 = vsel %vm146_vm6, %v6236_v37, %v623_v26  ;;  %v629_v41 = vsel %vm146_vm6, %v623_v26, %v6019_v25  ;;  %v714_v32 = vsel %vm203_vm4, %v6214_v53, %v713_v19  ;;  %1201 = vmatmul.mubr.f32.vlgmr.msra.gmra.mrb[0].mxu0 %v6049_v40 }
  0xe0   :  { %v5165_v2 = vpack.c.bf16 %v8495_v47, %v8494_v45  ;;  %v719_v55 = vsel %vm203_vm4, %v713_v19, %v5991_v61  ;;  %v795_v47 = vld [vmem:[#allocation2 + $0xd0] sm:$0xf]  ;;  %634 = vst [vmem:[#allocation2 + $0x80] sm:$0xf] %v624_v24  ;;  %635 = vst [vmem:[#allocation2 + $0x88] sm:$0xf] %v629_v41  ;;  %5162 = vmatprep.subr.bf16.mxu0 %v5161_v16  ;;  %v1510_v53 = vsub.f32 %v6341_v38, %v8360_v3 }
  0xe1   :  { %v730_v45 = vrot.slane %v714_v32, 4  ;;  %v731_v37 = vrot.slane %v719_v55, 4  ;;  %v1517_v25 = vand.u32 4294901760, %v1516_v31  ;;  %5164 = vmatpush1.bf16.msra.mxu0 %v5163_v36  ;;  %v1522_v61 = vsub.f32 %v6353_v17, %v8359_v39  ;;  %1301 = vmatprep.mubr.f32.mxu0 %v8484_v18  ;;  %v755_v6 = vpop.permute.xlu1 %754  ;;  %v689_v57 = vpop.permute.xlu0 %688 }
  0xe2   :  { %v814_v56 = vsel %vm803_vm9, %v796_v27, 0  ;;  %v811_v50 = vsel %vm803_vm9, %v795_v47, 0  ;;  %5166 = vmatprep.subr.bf16.mxu0 %v5165_v2  ;;  %v8496_v16 = vand.u32 4294901760, %v6098_v28  ;;  %v8497_v26 = vand.u32 4294901760, %v6126_v44 }
  0xe3   :  { %742 = vst [vmem:[#allocation2 + $0xb0] sm:$0xf0] %v730_v45  ;;  %743 = vst [vmem:[#allocation2 + $0xb8] sm:$0xf0] %v731_v37  ;;  %v5189_v33 = vpack.c.bf16 %v1517_v25, %v1505_v30  ;;  %v6416_v21 = vand.u32 4294901760, %v814_v56  ;;  %v6418_v36 = vand.u32 4294901760, %v811_v50  ;;  %v756_v31 = vsel %vm222_vm8, %v6313_v9, %v755_v6 }
  0xe4   :  { %v5167_v19 = vpack.c.bf16 %v8497_v26, %v8496_v16  ;;  %v761_v2 = vsel %vm222_vm8, %v755_v6, %v6062_v46  ;;  %v690_v28 = vsel %vm184_vm7, %v6270_v4, %v689_v57  ;;  %v695_v44 = vsel %vm184_vm7, %v689_v57, %v6042_v34  ;;  %766 = vst [vmem:[#allocation2 + $0xe0] sm:$0xf] %v756_v31  ;;  %v774_v6 = vld [vmem:[#allocation2 + $0x28] sm:$0xff]  ;;  %v773_v26 = vld [vmem:[#allocation2 + $0x20] sm:$0xff]  ;;  %v779_v31 = vld [vmem:[#allocation2 + $0x50] sm:$0xff] }
  0xe5   :  { %767 = vst [vmem:[#allocation2 + $0xe8] sm:$0xf] %v761_v2  ;;  %700 = vst [vmem:[#allocation2 + $0xb0] sm:$0xf] %v690_v28  ;;  %5190 = vmatprep.subr.bf16.mxu1 %v5189_v33  ;;  %v1511_v30 = vand.u32 4294901760, %v1510_v53  ;;  %v1523_v24 = vand.u32 4294901760, %v1522_v61  ;;  %v6433_v9 = vsub.f32 %v814_v56, %v6416_v21  ;;  %v6436_v46 = vsub.f32 %v811_v50, %v6418_v36  ;;  %v6442_v55 = vpop.permute.xlu0 %75  ;;  %v6444_v27 = vpop.permute.xlu1 %77 }
  0xe6   :  { %701 = vst [vmem:[#allocation2 + $0xb8] sm:$0xf] %v695_v44  ;;  %5168 = vmatpush1.bf16.msra.mxu0 %v5167_v19  ;;  %v8498_v4 = vand.u32 4294901760, %v6172_v60  ;;  %v8499_v60 = vand.u32 4294901760, %v6165_v63  ;;  %v5735_v56 = vmov 1966171168   ;;  %v5195_v63 = vpack.c.bf16 %v6251_v43, %v6212_v54 }
  0xe7   :  { %v5191_v41 = vpack.c.bf16 %v1523_v24, %v1511_v30  ;;  %v8358_v34 = vand.u32 4294901760, %v6433_v9  ;;  %v8355_v32 = vand.u32 4294901760, %v6436_v46  ;;  %v239_v50 = vunpack.c.l.s4 %v5735_v56 }
  0xe8   :  { %1242 = vmatprep.subr.mxu0 %v8498_v4  ;;  %v5197_v57 = vpack.c.bf16 %v6347_v48, %v6331_v13  ;;  %v1960_v16 = vand.u32 4294901760, %v774_v6  ;;  %v5199_v2 = vpack.c.bf16 %v6353_v17, %v6341_v38  ;;  %v1962_v44 = vand.u32 4294901760, %v773_v26 }
  0xe9   :  { %5192 = vmatpush1.bf16.msra.mxu1 %v5191_v41  ;;  %v1528_v47 = vsub.f32 %v6433_v9, %v8358_v34  ;;  %v1534_v45 = vsub.f32 %v6436_v46, %v8355_v32  ;;  %v6456_v53 = vpop.permute.xlu0 %79  ;;  %v6458_v61 = vpop.permute.xlu1 %81  ;;  %v240_v33 = vunpack.c.0.s8 %v239_v50  ;;  %v8500_v30 = vand.u32 4294901760, %v6178_v0 }
  0xea   :  { %1246 = vmatpush1.msra.mxu0 %v8499_v60  ;;  %v8501_v24 = vand.u32 4294901760, %v6222_v14  ;;  %v6485_v41 = vsub.f32 %v774_v6, %v1960_v16  ;;  %v8502_v0 = vand.u32 4294901760, %v6180_v42  ;;  %v8503_v14 = vld [vmem:[#allocation18_spill] sm:$0xff]  ;;  %v8505_v56 = vand.u32 4294901760, %v6207_v35 }
  0xeb   :  { %5170 = vmatprep.subr.bf16.mxu0 %v5978_v52  ;;  %1303 = vmatmul.mubr.f32.vlgmr.msra.gmra.mrb[0].mxu0 %v6013_v7  ;;  %v1529_v37 = vand.u32 4294901760, %v1528_v47  ;;  %v1535_v25 = vand.u32 4294901760, %v1534_v45  ;;  %v5193_v52 = vpack.c.bf16 %v6246_v12, %v6207_v35  ;;  %v6494_v60 = vsub.s32 %v240_v33, %v5842_v8  ;;  %v6523_v35 = vld [vmem:[#allocation2 + $0x88] sm:$0xff]  ;;  %v6531_v33 = vld [vmem:[#allocation2 + $0x80] sm:$0xff] }
  0xec   :  { %5172 = vmatpush1.bf16.msra.mxu0 %v5993_v62  ;;  %1383 = vmatprep.mubr.f32.mxu0 %v8484_v18  ;;  %v780_v62 = vld [vmem:[#allocation2 + $0x58] sm:$0xff]  ;;  %v6483_v4 = vpack.c.bf16 %v8501_v24, %v8500_v30  ;;  %v8506_v50 = vand.u32 4294901760, %v6246_v12  ;;  %v6515_v8 = vpack.c.bf16 %v1403_v15, %v1399_v23  ;;  %v8508_v42 = vand.u32 4294901760, %v6333_v1  ;;  %v6540_v10 = vld [vmem:[#allocation2 + $0xb0] sm:$0xff] }
  0xed   :  { %5174 = vmatprep.subr.bf16.mxu0 %v6094_v5  ;;  %1530 = vmatprep.subr.mxu1 %v1529_v37  ;;  %v6470_v19 = vpop.permute.xlu0 %83  ;;  %v6472_v5 = vpop.permute.xlu1 %96  ;;  %v1964_v28 = vand.u32 4294901760, %v780_v62  ;;  %v6487_v47 = vld [vmem:[#allocation2 + $0xb8] sm:$0xff]  ;;  %v8504_v37 = vand.u32 4294901760, %v8503_v14  ;;  %v8509_v12 = vand.u32 4294901760, %v6212_v54  ;;  %v8511_v54 = vand.u32 4294901760, %v6331_v13 }
  0xee   :  { %1536 = vmatpush1.msra.mxu1 %v1535_v25  ;;  %v6507_v6 = vpack.c.bf16 %v8506_v50, %v8505_v56  ;;  %v1972_v23 = vand.u32 4294901760, %v6487_v47  ;;  %v1968_v48 = vand.u32 4294901760, %v6523_v35  ;;  %v92_v24 = vsel %vm89_vm1, %v6456_v53, %v6458_v61 }
  0xef   :  { %5194 = vmatprep.subr.bf16.mxu1 %v5193_v52  ;;  %1593 = vmatmul.mubr.f32.vlgmr.msra.gmra.mrb[0].mxu1 %v6013_v7  ;;  %v6501_v25 = vpack.c.bf16 %v8504_v37, %v8502_v0  ;;  %v6535_v58 = vpack.c.bf16 %v1964_v28, %v1960_v16  ;;  %v6550_v1 = vsub.f32 %v780_v62, %v1964_v28  ;;  %v1974_v28 = vand.u32 4294901760, %v6540_v10 }
  0xf0   :  { %5176 = vmatpush1.bf16.msra.mxu0 %v6124_v11  ;;  %5196 = vmatpush1.bf16.msra.mxu1 %v5195_v63  ;;  %v1966_v11 = vand.u32 4294901760, %v779_v31  ;;  %v8510_v63 = vand.u32 4294901760, %v6251_v43  ;;  %v6546_v43 = vpack.c.bf16 %v1515_v49, %v8511_v54  ;;  %v1970_v49 = vand.u32 4294901760, %v6531_v33 }
  0xf1   :  { %1326 = vmatprep.subr.mxu0 %v6145_v20  ;;  %5198 = vmatprep.subr.bf16.mxu1 %v5197_v57  ;;  %v6489_v20 = vpop.permute.xlu0 %98  ;;  %v6491_v45 = vpop.permute.xlu1 %100  ;;  %v94_v62 = vsel %vm89_vm1, %v6442_v55, %v6444_v27 }
  0xf2   :  { %1683 = vmatprep.mubr.f32.mxu1 %v8484_v18  ;;  %v6529_v57 = vpack.c.bf16 %v8510_v63, %v8509_v12  ;;  %v6552_v15 = vpack.c.bf16 %v1966_v11, %v1962_v44  ;;  %v6554_v16 = vsub.f32 %v779_v31, %v1966_v11  ;;  %v93_v31 = vsel %vm89_vm1, %v6444_v27, %v6456_v53 }
  0xf3   :  { %v91_v11 = vsel %vm89_vm1, %v6458_v61, %v6470_v19  ;;  %v6586_v27 = vsub.f32 %v6487_v47, %v1972_v23  ;;  %v113_v53 = vsel %vm108_vm2, %v6472_v5, %v6489_v20  ;;  %v797_v61 = vld [vmem:[#allocation2 + $0xe0] sm:$0xf]  ;;  %v8356_v47 = vand.u32 4294901760, %v6550_v1 }
  0xf4   :  { %1328 = vmatpush1.msra.mxu0 %v6147_v59  ;;  %5200 = vmatpush1.bf16.msra.mxu1 %v5199_v2  ;;  %v8507_v59 = vand.u32 4294901760, %v6307_v51  ;;  %v6537_v51 = vsub.f32 %v773_v26, %v1962_v44  ;;  %v798_v26 = vld [vmem:[#allocation2 + $0xe8] sm:$0xf]  ;;  %v8354_v2 = vand.u32 4294901760, %v6485_v41  ;;  %v235_v44 = vcombine.low %v94_v62, %v93_v31 }
  0xf5   :  { %1385 = vmatmul.mubr.f32.vlgmr.msra.gmra.mrb[0].mxu0 %v6013_v7  ;;  %5178 = vmatprep.subr.bf16.mxu0 %v6483_v4  ;;  %v6557_v30 = vpop.permute.xlu0 %102  ;;  %v6559_v13 = vpop.permute.xlu1 %104  ;;  %v820_v0 = vsel %vm803_vm9, %v798_v26, 0  ;;  %v236_v14 = vcombine.low %v92_v24, %v91_v11  ;;  %v6608_v12 = vsub.f32 %v6523_v35, %v1968_v48  ;;  %v8361_v63 = vand.u32 4294901760, %v6554_v16 }
  0xf6   :  { %v6521_v52 = vpack.c.bf16 %v8508_v42, %v8507_v59  ;;  %5180 = vmatpush1.bf16.msra.mxu0 %v6501_v25  ;;  %1625 = vmatprep.subr.mxu1 %v6433_v9  ;;  %v6598_v37 = vsub.f32 %v6485_v41, %v8354_v2  ;;  %v8357_v56 = vand.u32 4294901760, %v6537_v51  ;;  %v6603_v50 = vrot.slane %v235_v44, %v6494_v60  ;;  %v8512_v2 = vld [vmem:[#allocation17_spill] sm:$0xff] }
  0xf7   :  { %5182 = vmatprep.subr.bf16.mxu0 %v6515_v8  ;;  %1465 = vmatprep.mubr.f32.mxu0 %v8484_v18  ;;  %v6613_v54 = vrot.slane %v236_v14, %v6494_v60  ;;  %v6621_v62 = vsub.f32 %v6531_v33, %v1970_v49  ;;  %v6624_v31 = vsub.f32 %v6540_v10, %v1974_v28  ;;  %v6626_v35 = vand.u32 4294901760, %v820_v0 }
  0xf8   :  { %1628 = vmatpush1.msra.mxu1 %v6436_v46  ;;  %v817_v24 = vsel %vm803_vm9, %v797_v61, 0  ;;  %v8362_v11 = vand.u32 4294901760, %v6586_v27  ;;  %v112_v10 = vsel %vm108_vm2, %v6489_v20, %v6491_v45  ;;  %v2061_v61 = vsub.f32 %v6550_v1, %v8356_v47 }
  0xf9   :  { %5202 = vmatprep.subr.bf16.mxu1 %v6483_v4  ;;  %1686 = vmatmul.mubr.f32.vlgmr.msra.gmra.mrb[0].mxu1 %v6030_v29  ;;  %v6605_v59 = vpop.permute.xlu0 %115  ;;  %v118_v42 = vpop.permute.xlu1 %117  ;;  %v2067_v34 = vsub.f32 %v6554_v16, %v8361_v63 }
  0xfa   :  { %5184 = vmatpush1.bf16.msra.mxu0 %v6521_v52  ;;  %5204 = vmatpush1.bf16.msra.mxu1 %v6501_v25  ;;  %v132_v26 = vsel %vm127_vm0, %v6605_v59, %v118_v42  ;;  %v2062_v20 = vand.u32 4294901760, %v2061_v61  ;;  %v8516_v61 = vand.u32 4294901760, %v6353_v17 }
  0xfb   :  { %1408 = vmatprep.subr.mxu0 %v6416_v21  ;;  %5206 = vmatprep.subr.bf16.mxu1 %v6515_v8  ;;  %v277_v44 = vadd.f32 %v132_v26, %v113_v53  ;;  %v6640_v53 = vpack.c.bf16 %v1972_v23, %v1968_v48  ;;  %v2055_v26 = vsub.f32 %v6537_v51, %v8357_v56  ;;  %v6660_v56 = vand.u32 4294901760, %v817_v24 }
  0xfc   :  { %1766 = vmatprep.mubr.f32.mxu1 %v8484_v18  ;;  %v111_v23 = vsel %vm108_vm2, %v6491_v45, %v6557_v30  ;;  %v2085_v45 = vsub.f32 %v6586_v27, %v8362_v11 }
  0xfd   :  { %v120_v14 = vpop.permute.xlu0 %119  ;;  %v122_v32 = vpop.permute.xlu1 %121 }
  0xfe   :  { %1410 = vmatpush1.msra.mxu0 %v6418_v36  ;;  %5208 = vmatpush1.bf16.msra.mxu1 %v6521_v52  ;;  %v131_v48 = vsel %vm127_vm0, %v118_v42, %v120_v14  ;;  %v130_v47 = vsel %vm127_vm0, %v120_v14, %v122_v32  ;;  %v6672_v42 = vsub.f32 %v820_v0, %v6626_v35 }
  0xff   :  { %1471 = vmatmul.mubr.f32.vlgmr.msra.gmra.mrb[2].mxu0 %v8512_v2  ;;  %1709 = vmatprep.subr.mxu1 %v6416_v21  ;;  %v278_v3 = vadd.f32 %v131_v48, %v112_v10  ;;  %v110_v14 = vsel %vm108_vm2, %v6557_v30, %v6559_v13  ;;  %v6682_v10 = vpack.c.bf16 %v1974_v28, %v1970_v49  ;;  %v2078_v48 = vand.u32 4294901760, %v6621_v62 }
 0x100   :  { %5226 = vmatprep.subr.bf16.mxu0 %v6535_v58  ;;  %2034 = vmatprep.mubr.f32.mxu0 %v8484_v18  ;;  %v279_v11 = vadd.f32 %v130_v47, %v111_v23  ;;  %v8513_v30 = vand.u32 4294901760, %v6608_v12  ;;  %v2068_v49 = vand.u32 4294901760, %v2067_v34  ;;  %v2050_v23 = vand.u32 4294901760, %v6598_v37 }
 0x101   :  { %5228 = vmatpush1.bf16.msra.mxu0 %v6552_v15  ;;  %v289_v63 = vcombine.low %v277_v44, %v278_v3  ;;  %v6685_v39 = vpop.permute.xlu0 %123  ;;  %v6687_v0 = vpop.permute.xlu1 %134  ;;  %v6700_v3 = vsub.f32 %v817_v24, %v6660_v56  ;;  %v8515_v44 = vand.u32 4294901760, %v6341_v38  ;;  %v2056_v24 = vand.u32 4294901760, %v2055_v26 }
 0x102   :  { %5230 = vmatprep.subr.bf16.mxu0 %v6640_v53  ;;  %1711 = vmatpush1.msra.mxu1 %v6418_v36  ;;  %v129_v33 = vsel %vm127_vm0, %v122_v32, %v6685_v39  ;;  %v2079_v34 = vsub.f32 %v6621_v62, %v2078_v48  ;;  %v5233_v17 = vpack.c.bf16 %v2062_v20, %v2050_v23  ;;  %v8517_v37 = vand.u32 4294901760, %v6433_v9 }
 0x103   :  { %5210 = vmatprep.subr.bf16.mxu1 %v6507_v6  ;;  %1770 = vmatmul.mubr.f32.vlgmr.msra.gmra.mrb[0].mxu1 %v6049_v40  ;;  %v2073_v6 = vsub.f32 %v6608_v12, %v8513_v30  ;;  %v280_v47 = vadd.f32 %v129_v33, %v110_v14  ;;  %v5215_v32 = vpack.c.bf16 %v8516_v61, %v8515_v44  ;;  %v2086_v30 = vand.u32 4294901760, %v2085_v45 }
 0x104   :  { %5212 = vmatpush1.bf16.msra.mxu1 %v6529_v57  ;;  %1870 = vmatprep.mubr.f32.mxu1 %v8484_v18  ;;  %v8514_v57 = vand.u32 4294901760, %v6624_v31  ;;  %v5235_v26 = vpack.c.bf16 %v2068_v49, %v2056_v24  ;;  %v2102_v61 = vand.u32 4294901760, %v6700_v3  ;;  %v5241_v24 = vpack.c.bf16 %v6550_v1, %v6485_v41 }
 0x105   :  { %5232 = vmatpush1.bf16.msra.mxu0 %v6682_v10  ;;  %5214 = vmatprep.subr.bf16.mxu1 %v6546_v43  ;;  %v2096_v43 = vand.u32 4294901760, %v6672_v42  ;;  %v290_v14 = vcombine.low %v279_v11, %v280_v47  ;;  %v6718_v33 = vpop.permute.xlu0 %136  ;;  %v6720_v38 = vpop.permute.xlu1 %138  ;;  %v2074_v44 = vand.u32 4294901760, %v2073_v6  ;;  %v2080_v6 = vand.u32 4294901760, %v2079_v34 }
 0x106   :  { %v2091_v28 = vsub.f32 %v6624_v31, %v8514_v57  ;;  %1977 = vmatprep.subr.mxu0 %v6626_v35  ;;  %v6716_v57 = vrot.slane %v289_v63, %v6494_v60  ;;  %v8518_v47 = vand.u32 4294901760, %v6436_v46 }
 0x107   :  { %v6727_v63 = vrot.slane %v290_v14, %v6494_v60  ;;  %v5237_v11 = vpack.c.bf16 %v2086_v30, %v2074_v44  ;;  %v2097_v20 = vsub.f32 %v6672_v42, %v2096_v43 }
 0x108   :  { %5216 = vmatpush1.bf16.msra.mxu1 %v5215_v32  ;;  %v2092_v45 = vand.u32 4294901760, %v2091_v28  ;;  %v2103_v32 = vsub.f32 %v6700_v3, %v2102_v61 }
 0x109   :  { %1979 = vmatpush1.msra.mxu0 %v6660_v56  ;;  %1811 = vmatprep.subr.mxu1 %v8517_v37  ;;  %v313_v9 = vcombine.low %v6716_v57, %v6727_v63  ;;  %v6736_v49 = vpop.permute.xlu0 %140  ;;  %v6738_v28 = vpop.permute.xlu1 %142  ;;  %v2098_v23 = vand.u32 4294901760, %v2097_v20  ;;  %v8520_v20 = vand.u32 4294901760, %v6550_v1 }
 0x10a   :  { %5234 = vmatprep.subr.bf16.mxu0 %v5233_v17  ;;  %2040 = vmatmul.mubr.f32.vlgmr.msra.gmra.mrb[4].mxu0 %v8512_v2  ;;  %v5239_v2 = vpack.c.bf16 %v2092_v45, %v2080_v6 }
 0x10b   :  { %5236 = vmatpush1.bf16.msra.mxu0 %v5235_v26  ;;  %2160 = vmatprep.mubr.f32.mxu0 %v8484_v18 }
 0x10c   :  { %5238 = vmatprep.subr.bf16.mxu0 %v5237_v11  ;;  %1815 = vmatpush1.msra.mxu1 %v8518_v47  ;;  %v8521_v47 = vand.u32 4294901760, %v6537_v51 }
 0x10d   :  { %5218 = vmatprep.subr.bf16.mxu1 %v6483_v4  ;;  %1872 = vmatmul.mubr.f32.vlgmr.msra.gmra.mrb[0].mxu1 %v6013_v7  ;;  %v6750_v30 = vpop.permute.xlu0 %153  ;;  %v6752_v46 = vpop.permute.xlu1 %155  ;;  %v2104_v4 = vand.u32 4294901760, %v2103_v32 }
 0x10e   :  { %5220 = vmatpush1.bf16.msra.mxu1 %v6501_v25  ;;  %1952 = vmatprep.mubr.f32.mxu1 %v8484_v18  ;;  %v5243_v25 = vpack.c.bf16 %v6554_v16, %v6537_v51  ;;  %v8525_v51 = vand.u32 4294901760, %v6624_v31 }
 0x10f   :  { %5240 = vmatpush1.bf16.msra.mxu0 %v5239_v2  ;;  %5222 = vmatprep.subr.bf16.mxu1 %v6515_v8  ;;  %v5245_v8 = vpack.c.bf16 %v6586_v27, %v6608_v12  ;;  %v8522_v2 = vand.u32 4294901760, %v6554_v16 }
 0x110   :  { %2099 = vmatprep.subr.mxu0 %v2098_v23  ;;  %v5263_v1 = vpack.c.bf16 %v8525_v51, %v2078_v48 }
 0x111   :  { %v6760_v34 = vpop.permute.xlu0 %157  ;;  %v5259_v32 = vpack.c.bf16 %v8522_v2, %v8521_v47  ;;  %v170_v47 = vsel %vm165_vm3, %v6750_v30, %v6752_v46 }
 0x112   :  { %5224 = vmatpush1.bf16.msra.mxu1 %v6521_v52  ;;  %v6765_v14 = vpop.permute.xlu1 %159 }
 0x113   :  { %2105 = vmatpush1.msra.mxu0 %v2104_v4  ;;  %1895 = vmatprep.subr.mxu1 %v6416_v21  ;;  %v5247_v21 = vpack.c.bf16 %v6624_v31, %v6621_v62  ;;  %v8523_v4 = vand.u32 4294901760, %v6608_v12  ;;  %v8526_v31 = vcombine.low %v6603_v50, %v6613_v54 }
 0x114   :  { %5242 = vmatprep.subr.bf16.mxu0 %v5241_v24  ;;  %2162 = vmatmul.mubr.f32.vlgmr.msra.gmra.mrb[4].mxu0 %v6013_v7  ;;  %v8524_v24 = vand.u32 4294901760, %v6586_v27 }
 0x115   :  { %5244 = vmatpush1.bf16.msra.mxu0 %v5243_v25  ;;  %2252 = vmatprep.mubr.f32.mxu0 %v8484_v18  ;;  %v6772_v52 = vpop.permute.xlu0 %161  ;;  %v266_v48 = vrot.slane %v8526_v31, %v6494_v60 }
 0x116   :  { %5246 = vmatprep.subr.bf16.mxu0 %v5245_v8  ;;  %1897 = vmatpush1.msra.mxu1 %v6418_v36  ;;  %v6774_v17 = vpop.permute.xlu1 %172 }
 0x117   :  { %1954 = vmatmul.mubr.f32.vlgmr.msra.gmra.mrb[0].mxu1 %v6013_v7 }
 0x118   :  { %3202 = vmatprep.mubr.f32.mxu1 %v8484_v18 }
 0x119   :  { %5248 = vmatpush1.bf16.msra.mxu0 %v5247_v21  ;;  %v6778_v44 = vpop.permute.xlu0 %174 }
 0x11a   :  { %2194 = vmatprep.subr.mxu0 %v6672_v42  ;;  %v6780_v37 = vpop.permute.xlu1 %176 }
 0x11d   :  { %2197 = vmatpush1.msra.mxu0 %v6700_v3  ;;  %v6787_v36 = vpop.permute.xlu0 %178 }
 0x11e   :  { %5250 = vmatprep.subr.bf16.mxu0 %v6535_v58  ;;  %2255 = vmatmul.mubr.f32.vlgmr.msra.gmra.mrb[4].mxu0 %v6030_v29  ;;  %v6790_v26 = vpop.permute.xlu1 %180  ;;  %v8519_v29 = vand.u32 4294901760, %v6485_v41  ;;  %v5261_v41 = vpack.c.bf16 %v8524_v24, %v8523_v4 }
 0x11f   :  { %5252 = vmatpush1.bf16.msra.mxu0 %v6552_v15  ;;  %2335 = vmatprep.mubr.f32.mxu0 %v8484_v18 }
 0x120   :  { %5254 = vmatprep.subr.bf16.mxu0 %v6640_v53  ;;  %v5257_v6 = vpack.c.bf16 %v8520_v20, %v8519_v29  ;;  %v6876_v20 = vsel %vm146_vm6, %v6687_v0, %v6718_v33 }
 0x121   :  { %v6793_v45 = vpop.permute.xlu0 %191  ;;  %v331_v24 = vadd.f32 %v170_v47, %v6876_v20 }
 0x122   :  { %v6796_v11 = vpop.permute.xlu1 %193 }
 0x123   :  { %5256 = vmatpush1.bf16.msra.mxu0 %v6682_v10  ;;  %v208_v4 = vsel %vm203_vm4, %v6793_v45, %v6796_v11 }
 0x124   :  { %2278 = vmatprep.subr.mxu0 %v6626_v35 }
 0x125   :  { %v6807_v23 = vpop.permute.xlu0 %195 }
 0x126   :  { %v6814_v25 = vpop.permute.xlu1 %197 }
 0x127   :  { %2280 = vmatpush1.msra.mxu0 %v6660_v56 }
 0x128   :  { %5258 = vmatprep.subr.bf16.mxu0 %v5257_v6  ;;  %2339 = vmatmul.mubr.f32.vlgmr.msra.gmra.mrb[4].mxu0 %v6049_v40  ;;  %v6894_v6 = vsel %vm146_vm6, %v6736_v49, %v6738_v28 }
 0x129   :  { %5260 = vmatpush1.bf16.msra.mxu0 %v5259_v32  ;;  %2439 = vmatprep.mubr.f32.mxu0 %v8484_v18  ;;  %v6821_v16 = vpop.permute.xlu0 %199  ;;  %v189_v32 = vsel %vm184_vm7, %v6774_v17, %v6778_v44 }
 0x12a   :  { %5262 = vmatprep.subr.bf16.mxu0 %v5261_v41  ;;  %v86_v8 = vpop.permute.xlu1 %85 }
 0x12b   :  { %v90_v40 = vsel %vm89_vm1, %v6470_v19, %v86_v8  ;;  %v95_v27 = vsel %vm89_vm1, %v86_v8, %v6442_v55 }
 0x12c   :  { %v237_v12 = vcombine.low %v90_v40, %v95_v27 }
 0x12d   :  { %5264 = vmatpush1.bf16.msra.mxu0 %v5263_v1  ;;  %v107_v62 = vpop.permute.xlu0 %106 }
 0x12e   :  { %2380 = vmatprep.subr.mxu0 %v2096_v43  ;;  %v258_v21 = vrot.slane %v237_v12, %v6494_v60  ;;  %v109_v19 = vsel %vm108_vm2, %v6559_v13, %v107_v62  ;;  %v114_v55 = vsel %vm108_vm2, %v107_v62, %v6472_v5  ;;  %v126_v29 = vpop.permute.xlu1 %125  ;;  %vm2704_vm2 = vcmp.lt.s32.totalorder %v5912_v22, 19 }
 0x12f   :  { %v128_v42 = vsel %vm127_vm0, %v6685_v39, %v126_v29  ;;  %v133_v50 = vsel %vm127_vm0, %v126_v29, %v6605_v59  ;;  %v320_v59 = vrot.slane %v313_v9, %v6494_v60 }
 0x130   :  { %v273_v13 = vrot.slane %v258_v21, %v6494_v60  ;;  %v281_v54 = vadd.f32 %v128_v42, %v109_v19  ;;  %v282_v5 = vadd.f32 %v133_v50, %v114_v55 }
 0x131   :  { %2384 = vmatpush1.msra.mxu0 %v2102_v61 }
 0x132   :  { %5266 = vmatprep.subr.bf16.mxu0 %v6535_v58  ;;  %2441 = vmatmul.mubr.f32.vlgmr.msra.gmra.mrb[4].mxu0 %v6013_v7  ;;  %v274_v3 = vcombine.low %v266_v48, %v273_v13  ;;  %v291_v39 = vcombine.low %v281_v54, %v282_v5  ;;  %v145_v63 = vpop.permute.xlu0 %144 }
 0x133   :  { %5268 = vmatpush1.bf16.msra.mxu0 %v6552_v15  ;;  %2521 = vmatprep.mubr.f32.mxu0 %v8484_v18  ;;  %v5676_v15 = vld [vmem:[%s8314_s1] sm:$0x3f] }
 0x134   :  { %5270 = vmatprep.subr.bf16.mxu0 %v6640_v53  ;;  %v312_v58 = vrot.slane %v291_v39, %v6494_v60  ;;  %v276_v43 = vadd.f32 %v5676_v15, %v274_v3 }
 0x136   :  { %v327_v53 = vrot.slane %v312_v58, %v6494_v60  ;;  %v183_v9 = vpop.permute.xlu0 %182 }
 0x137   :  { %5272 = vmatpush1.bf16.msra.mxu0 %v6682_v10  ;;  %v164_v10 = vpop.permute.xlu1 %163  ;;  %v185_v21 = vsel %vm184_vm7, %v6790_v26, %v183_v9 }
 0x138   :  { %2464 = vmatprep.subr.mxu0 %v6626_v35  ;;  %v328_v61 = vcombine.low %v320_v59, %v327_v53  ;;  %v166_v62 = vsel %vm165_vm3, %v6772_v52, %v164_v10  ;;  %v171_v31 = vsel %vm165_vm3, %v164_v10, %v6750_v30 }
 0x13a   :  { %v6869_v57 = vadd.f32 %v328_v61, %v276_v43  ;;  %v211_v2 = vpop.permute.xlu0 %210 }
 0x13b   :  { %2466 = vmatpush1.msra.mxu0 %v6660_v56  ;;  %v202_v35 = vpop.permute.xlu1 %201  ;;  %v6882_v56 = vsel %vm146_vm6, %v6718_v33, %v6720_v38  ;;  %v169_v33 = vsel %vm165_vm3, %v6752_v46, %v6760_v34  ;;  %v188_v46 = vsel %vm184_vm7, %v6778_v44, %v6780_v37  ;;  %v207_v44 = vsel %vm203_vm4, %v6796_v11, %v6807_v23 }
 0x13c   :  { %2523 = vmatmul.mubr.f32.vlgmr.msra.gmra.mrb[4].mxu0 %v6013_v7  ;;  %v6888_v7 = vsel %vm146_vm6, %v6720_v38, %v6736_v49  ;;  %v168_v38 = vsel %vm165_vm3, %v6760_v34, %v6765_v14  ;;  %v167_v49 = vsel %vm165_vm3, %v6765_v14, %v6772_v52  ;;  %v187_v34 = vsel %vm184_vm7, %v6780_v37, %v6787_v36 }
 0x13d   :  { %3036 = vmatprep.mubr.f32.mxu0 %v8484_v18  ;;  %v186_v14 = vsel %vm184_vm7, %v6787_v36, %v6790_v26  ;;  %v206_v37 = vsel %vm203_vm4, %v6807_v23, %v6814_v25  ;;  %v205_v36 = vsel %vm203_vm4, %v6814_v25, %v6821_v16  ;;  %v332_v41 = vadd.f32 %v169_v33, %v6882_v56 }
 0x13e   :  { %v333_v51 = vadd.f32 %v168_v38, %v6888_v7  ;;  %v334_v1 = vadd.f32 %v167_v49, %v6894_v6  ;;  %v337_v11 = vadd.f32 %v208_v4, %v189_v32  ;;  %v338_v40 = vadd.f32 %v207_v44, %v188_v46 }
 0x13f   :  { %v213_v8 = vpop.permute.xlu1 %212  ;;  %v339_v27 = vadd.f32 %v206_v37, %v187_v34  ;;  %v340_v12 = vadd.f32 %v205_v36, %v186_v14  ;;  %v6951_v23 = vsel %vm146_vm6, %v6738_v28, %v145_v63  ;;  %v6956_v25 = vsel %vm146_vm6, %v145_v63, %v6687_v0  ;;  %v215_v48 = vpop.permute.xlu0 %214 }
 0x140   :  { %v190_v28 = vsel %vm184_vm7, %v183_v9, %v6774_v17  ;;  %v204_v0 = vsel %vm203_vm4, %v6821_v16, %v202_v35  ;;  %v209_v52 = vsel %vm203_vm4, %v202_v35, %v6793_v45  ;;  %v343_v19 = vadd.f32 %v337_v11, %v331_v24 }
 0x141   :  { %v344_v55 = vadd.f32 %v338_v40, %v332_v41  ;;  %v345_v30 = vadd.f32 %v339_v27, %v333_v51  ;;  %v346_v29 = vadd.f32 %v340_v12, %v334_v1  ;;  %v335_v42 = vadd.f32 %v166_v62, %v6951_v23 }
 0x142   :  { %v336_v26 = vadd.f32 %v171_v31, %v6956_v25  ;;  %v341_v50 = vadd.f32 %v204_v0, %v185_v21  ;;  %v342_v13 = vadd.f32 %v209_v52, %v190_v28  ;;  %v227_v45 = vsel %vm222_vm8, %v211_v2, %v213_v8 }
 0x143   :  { %v217_v54 = vpop.permute.xlu1 %216  ;;  %v219_v5 = vpop.permute.xlu0 %218  ;;  %v355_v39 = vcombine.low %v343_v19, %v344_v55  ;;  %v356_v16 = vcombine.low %v345_v30, %v346_v29  ;;  %v226_v15 = vsel %vm222_vm8, %v213_v8, %v215_v48  ;;  %v43_v55 = vld [vmem:[%s8315_s2] sm:$0x3f]  ;;  %v8529_v29 = vld [vmem:[#allocation11_spill] sm:$0xff]  ;;  %vm2729_vm3 = vcmp.lt.s32.totalorder %v5912_v22, 18 }
 0x144   :  { %v347_v59 = vadd.f32 %v341_v50, %v335_v42  ;;  %v348_v58 = vadd.f32 %v342_v13, %v336_v26  ;;  %v225_v43 = vsel %vm222_vm8, %v215_v48, %v217_v54  ;;  %v224_v53 = vsel %vm222_vm8, %v217_v54, %v219_v5  ;;  %v8527_v30 = vld [vmem:[#allocation10_spill] sm:$0xff]  ;;  %v8531_v13 = vld [vmem:[#allocation12_spill] sm:$0xff] }
 0x145   :  { %v364_v63 = vrot.slane %v355_v39, %v6494_v60  ;;  %v371_v10 = vrot.slane %v356_v16, %v6494_v60  ;;  %v403_v35 = vcombine.low %v227_v45, %v226_v15  ;;  %v404_v47 = vcombine.low %v225_v43, %v224_v53  ;;  %v8533_v16 = vld [vmem:[#allocation13_spill] sm:$0xff]  ;;  %v8535_v15 = vld [vmem:[#allocation14_spill] sm:$0xff] }
 0x146   :  { %v357_v9 = vcombine.low %v347_v59, %v348_v58  ;;  %vm2754_vm4 = vcmp.lt.s32.totalorder %v5912_v22, 17  ;;  %vm2950_vm7 = vcmask 588800  }
 0x147   :  { %v221_v61 = vpop.permute.xlu1 %220  ;;  %v379_v49 = vcombine.low %v364_v63, %v371_v10  ;;  %v412_v34 = vrot.slane %v403_v35, %v6494_v60  ;;  %v419_v14 = vrot.slane %v404_v47, %v6494_v60 }
 0x148   :  { %v223_v33 = vsel %vm222_vm8, %v219_v5, %v221_v61  ;;  %v228_v38 = vsel %vm222_vm8, %v221_v61, %v211_v2  ;;  %v378_v46 = vrot.slane %v357_v9, %v6494_v60  ;;  %v8537_v61 = vld [vmem:[#allocation16_spill] sm:$0xff]  ;;  %vm2834_vm8 = vcmp.lt.s32.totalorder %v5912_v22, 111 }
 0x149   :  { %v405_v4 = vcombine.low %v223_v33, %v228_v38  ;;  %v386_v37 = vrot.slane %v379_v49, %v6494_v60  ;;  %v427_v24 = vcombine.low %v412_v34, %v419_v14  ;;  %v7029_v49 = vrot.slane %v43_v55, %v8527_v30 }
 0x14a   :  { %v393_v36 = vrot.slane %v378_v46, %v6494_v60  ;;  %v7035_v46 = vrot.slane %v43_v55, %v8531_v13 }
 0x14b   :  { %v426_v41 = vrot.slane %v405_v4, %v6494_v60  ;;  %v434_v2 = vrot.slane %v427_v24, %v6494_v60  ;;  %8539 = vst [vmem:[#allocation14_spill] sm:$0xff] %v7029_v49 }
 0x14c   :  { %v394_v51 = vcombine.low %v386_v37, %v393_v36  ;;  %8541 = vst [vmem:[#allocation19_spill] sm:$0xff] %v7035_v46  ;;  %v7038_v37 = vrot.slane %v43_v55, %v8533_v16 }
 0x14d   :  { %v441_v1 = vrot.slane %v426_v41, %v6494_v60 }
 0x14e   :  { %v396_v8 = vadd.f32 %v394_v51, %v6869_v57  ;;  %8542 = vst [vmem:[#allocation20_spill] sm:$0xff] %v7038_v37 }
 0x14f   :  { %v442_v11 = vcombine.low %v434_v2, %v441_v1  ;;  %v7044_v2 = vrot.slane %v43_v55, %v8535_v15 }
 0x151   :  { %v444_v40 = vadd.f32 %v442_v11, %v396_v8  ;;  %8543 = vst [vmem:[#allocation21_spill] sm:$0xff] %v7044_v2 }
 0x153   :  { %v445_v27 = vadd.f32 1e-08, %v444_v40  ;;  %v448_v21 = vmax.f32 %v444_v40, 0.0 }
 0x155   :  { %5646 = vrcp.f32 %v445_v27  ;;  %v449_v52 = vmin.f32 %v448_v21, 1.0  ;;  %v7050_v27 = vrot.slane %v43_v55, %v8537_v61 }
 0x157   :  { %8544 = vst [vmem:[#allocation22_spill] sm:$0xff] %v7050_v27 }
 0x15f   :  { %v5647_v28 = vpop.eup %5646 }
 0x160   :  { %v447_v0 = vmul.f32 9.0, %v5647_v28 }
 0x162   :  { %v450_v19 = vmul.f32 %v449_v52, %v447_v0 }
 0x164   :  { %v451_v60 = vmul.f32 %v450_v19, %v43_v55 }
 0x166   :  { %v7005_v57 = vrot.slane %v451_v60, %v8527_v30  ;;  %v7008_v42 = vrot.slane %v451_v60, %v8529_v29  ;;  %v7013_v54 = vrot.slane %v451_v60, %v8531_v13  ;;  %v7017_v59 = vrot.slane %v451_v60, %v8533_v16 }
 0x167   :  { %v7021_v43 = vrot.slane %v451_v60, %v8535_v15 }
 0x168   :  { %8528 = vst [vmem:[#allocation18_spill] sm:$0xff] %v7005_v57  ;;  %8530 = vst [vmem:[#allocation17_spill] sm:$0xff] %v7008_v42 }
 0x169   :  { %8532 = vst [vmem:[#allocation10_spill] sm:$0xff] %v7013_v54  ;;  %8534 = vst [vmem:[#allocation11_spill] sm:$0xff] %v7017_v59 }
 0x16a   :  { %8536 = vst [vmem:[#allocation12_spill] sm:$0xff] %v7021_v43 }
 0x1c8   :  { %v1386_v17 = vpop.f32.mrb[0].mxu0 }
 0x1c9   :  { %v1388_v3 = vpop.f32.mrb[1].mxu0  ;;  %v2560_v26 = vmul.f32 %v7005_v57, %v1386_v17  ;;  %v7024_v17 = vrot.slane %v451_v60, %v8537_v61 }
 0x1ca   :  { %v2561_v50 = vmul.f32 %v7008_v42, %v1388_v3 }
 0x1cb   :  { %8538 = vst [vmem:[#allocation13_spill] sm:$0xff] %v7024_v17 }
 0x1cc   :  { %v2566_v39 = vadd.f32 %v2561_v50, %v2560_v26 }
 0x1d2   :  { %v1472_v32 = vpop.f32.mrb[2].mxu0 }
 0x1d3   :  { %v1474_v44 = vpop.f32.mrb[3].mxu0 }
 0x1ea   :  { %v1955_v12 = vpop.f32.mrb[0].mxu1 }
 0x1eb   :  { %v5561_v62 = vadd.f32 %v1955_v12, %v1472_v32  ;;  %v1957_v31 = vpop.f32.mrb[1].mxu1  ;;  %v7032_v32 = vrot.slane %v43_v55, %v8529_v29  ;;  %v5736_v55 = vmov 0  }
 0x1ec   :  { %v5562_v48 = vadd.f32 %v1957_v31, %v1474_v44  ;;  %5640 = vset.pattern.permute.xlu0 %v5736_v55 }
 0x1ed   :  { %v2562_v5 = vmul.f32 %v5561_v62, %v7013_v54  ;;  %8540 = vst [vmem:[#allocation16_spill] sm:$0xff] %v7032_v32 }
 0x1ee   :  { %v2563_v45 = vmul.f32 %v5562_v48, %v7017_v59 }
 0x1ef   :  { %v2567_v58 = vadd.f32 %v2566_v39, %v2562_v5 }
 0x1f1   :  { %v2568_v63 = vadd.f32 %v2567_v58, %v2563_v45 }
 0x20f   :  { %v2524_v53 = vpop.f32.mrb[4].mxu0 }
 0x210   :  { %v2564_v3 = vmul.f32 %v7021_v43, %v2524_v53  ;;  %v2526_v10 = vpop.f32.mrb[5].mxu0 }
 0x211   :  { %v2565_v9 = vmul.f32 %v7024_v17, %v2526_v10 }
 0x212   :  { %v2569_v35 = vadd.f32 %v2568_v63, %v2564_v3 }
 0x214   :  { %v2570_v47 = vadd.f32 %v2569_v35, %v2565_v9 }
 0x216   :  { %2571 = vadd.xlane.f32.xlu0 %v2570_v47 }
 0x2a3   :  { %v2572_v33 = vpop.xlane.xlu0 %2571 }
 0x2a4   :  { %v2573_v38 = vmul.f32 0.001953125, %v2572_v33 }
 0x2a6   :  { %v2574_v34 = vsub.f32 %v2560_v26, %v2573_v38  ;;  %v2575_v14 = vsub.f32 %v2561_v50, %v2573_v38  ;;  %v2576_v4 = vsub.f32 %v2562_v5, %v2573_v38  ;;  %v2577_v44 = vsub.f32 %v2563_v45, %v2573_v38  ;;  %v2600_v26 = vld [vmem:[%s8318_s5] sm:$0xff]  ;;  %s5738_s5 = smov 17  }
 0x2a7   :  { %v2578_v36 = vsub.f32 %v2564_v3, %v2573_v38  ;;  %v2579_v1 = vsub.f32 %v2565_v9, %v2573_v38  ;;  %v8363_v50 = vmov 1  }
 0x2a8   :  { %v2580_v24 = vmul.f32 %v2574_v34, %v7029_v49  ;;  %v2581_v41 = vmul.f32 %v2575_v14, %v7032_v32  ;;  %v2582_v51 = vmul.f32 %v2576_v4, %v7035_v46  ;;  %v7047_v8 = vmul.f32 %v2577_v44, %v7038_v37  ;;  %5641 = vset.pattern.permute.xlu1 %v8363_v50 }
 0x2a9   :  { %v7053_v12 = vmul.f32 %v2578_v36, %v7044_v2  ;;  %v2585_v48 = vmul.f32 %v2579_v1, %v7050_v27 }
 0x2aa   :  { %v2586_v11 = vmul.f32 %v2580_v24, %v2580_v24  ;;  %v2587_v40 = vmul.f32 %v2581_v41, %v2581_v41  ;;  %v2588_v62 = vmul.f32 %v2582_v51, %v2582_v51  ;;  %v2589_v21 = vmul.f32 %v7047_v8, %v7047_v8 }
 0x2ab   :  { %v2590_v0 = vmul.f32 %v7053_v12, %v7053_v12  ;;  %v2591_v19 = vmul.f32 %v2585_v48, %v2585_v48 }
 0x2ac   :  { %v2592_v31 = vadd.f32 %v2587_v40, %v2586_v11 }
 0x2ae   :  { %v2593_v28 = vadd.f32 %v2592_v31, %v2588_v62 }
 0x2b0   :  { %v2594_v52 = vadd.f32 %v2593_v28, %v2589_v21 }
 0x2b2   :  { %v2595_v60 = vadd.f32 %v2594_v52, %v2590_v0  ;;  %v488_v52 = vmul.f32 %v7050_v27, %v6956_v25  ;;  %v2895_v27 = vld [vmem:[%s8317_s4] sm:$0xf] }
 0x2b4   :  { %v2596_v29 = vadd.f32 %v2595_v60, %v2591_v19 }
 0x2b6   :  { %2597 = vadd.xlane.f32.xlu1 %v2596_v29  ;;  %v2685_v29 = vrot.slane %v488_v52, %v8527_v30 }
 0x2c7   :  { %2617 = vperm.xlu1 %5641, %v2600_v26  }
 0x343   :  { %v2598_v13 = vpop.xlane.xlu1 %2597 }
 0x344   :  { %v2599_v5 = vmul.f32 0.001953125, %v2598_v13 }
 0x346   :  { %v2601_v39 = vadd.f32 1e-05, %v2599_v5 }
 0x347   :  { %v7066_v15 = vpop.permute.xlu1 %2617 }
 0x348   :  { %5648 = vrsqrt.f32 %v2601_v39  ;;  %v485_v39 = vmul.f32 %v7035_v46, %v6888_v7 }
 0x352   :  { %v5649_v16 = vpop.eup %5648 }
 0x353   :  { %v2603_v58 = vmul.f32 %v5649_v16, %v2600_v26 }
 0x355   :  { %2606 = vperm.xlu0 %5640, %v2603_v58   ;;  %v2673_v58 = vrot.slane %v485_v39, %v8527_v30 }
 0x3d4   :  { %v7064_v45 = vpop.permute.xlu0 %2606 }
 0x3d5   :  { %v2609_v53 = vmul.f32 %v7064_v45, %v2580_v24  ;;  %v2610_v61 = vmul.f32 %v7064_v45, %v2581_v41  ;;  %v2614_v3 = vmul.f32 %v7064_v45, %v2585_v48  ;;  %v2611_v38 = vmul.f32 %v7064_v45, %v2582_v51 }
 0x3d6   :  { %v483_v24 = vmul.f32 %v7029_v49, %v6876_v20  ;;  %v484_v51 = vmul.f32 %v7032_v32, %v6882_v56  ;;  %v2613_v25 = vmul.f32 %v7064_v45, %v7053_v12  ;;  %v2612_v7 = vmul.f32 %v7064_v45, %v7047_v8 }
 0x3d7   :  { %v2620_v63 = vadd.f32 %v7066_v15, %v2609_v53  ;;  %v2621_v10 = vadd.f32 %v7066_v15, %v2610_v61  ;;  %v2625_v9 = vadd.f32 %v7066_v15, %v2614_v3  ;;  %v2622_v44 = vadd.f32 %v7066_v15, %v2611_v38 }
 0x3d8   :  { %v2665_v62 = vrot.slane %v483_v24, %v8527_v30  ;;  %v2669_v20 = vrot.slane %v484_v51, %v8527_v30  ;;  %v2624_v13 = vadd.f32 %v7066_v15, %v2613_v25  ;;  %v2623_v3 = vadd.f32 %v7066_v15, %v2612_v7 }
 0x3d9   :  { %v2632_v35 = vmin.f32 %v2620_v63, 0.0  ;;  %v2633_v47 = vmin.f32 %v2621_v10, 0.0  ;;  %v2637_v33 = vmin.f32 %v2625_v9, 0.0  ;;  %v2634_v36 = vmin.f32 %v2622_v44, 0.0 }
 0x3da   :  { %vm2626_vm10 = vcmp.gt.f32.partialorder %v2620_v63, 0.0  ;;  %vm2627_vm11 = vcmp.gt.f32.partialorder %v2621_v10, 0.0  ;;  %vm2631_vm12 = vcmp.gt.f32.partialorder %v2625_v9, 0.0  ;;  %vm2628_vm13 = vcmp.gt.f32.partialorder %v2622_v44, 0.0 }
 0x3db   :  { %v2638_v34 = vmul.f32 1.442695, %v2632_v35  ;;  %v2640_v14 = vmul.f32 1.442695, %v2633_v47  ;;  %v2648_v4 = vmul.f32 1.442695, %v2637_v33  ;;  %v486_v38 = vmul.f32 %v7038_v37, %v6894_v6 }
 0x3dc   :  { %v2642_v1 = vmul.f32 1.442695, %v2634_v36  ;;  %v2636_v12 = vmin.f32 %v2624_v13, 0.0  ;;  %vm2630_vm14 = vcmp.gt.f32.partialorder %v2624_v13, 0.0  ;;  %vm2629_vm15 = vcmp.gt.f32.partialorder %v2623_v3, 0.0 }
 0x3dd   :  { %5650 = vpow2.f32 %v2638_v34 }
 0x3de   :  { %5652 = vpow2.f32 %v2640_v14  ;;  %v2646_v53 = vmul.f32 1.442695, %v2636_v12  ;;  %v2677_v14 = vrot.slane %v486_v38, %v8527_v30 }
 0x3df   :  { %5654 = vpow2.f32 %v2648_v4 }
 0x3e0   :  { %5656 = vpow2.f32 %v2642_v1 }
 0x3e1   :  { %5658 = vpow2.f32 %v2646_v53 }
 0x3e7   :  { %v5651_v41 = vpop.eup %5650 }
 0x3e8   :  { %v5653_v11 = vpop.eup %5652  ;;  %v5117_v40 = vadd.f32 -1.0, %v5651_v41 }
 0x3e9   :  { %v5118_v31 = vadd.f32 -1.0, %v5653_v11  ;;  %v5655_v28 = vpop.eup %5654 }
 0x3ea   :  { %v2656_v48 = vsel %vm2626_vm10, %v2620_v63, %v5117_v40  ;;  %v5122_v19 = vadd.f32 -1.0, %v5655_v28  ;;  %v5657_v26 = vpop.eup %5656  ;;  %v2635_v63 = vmin.f32 %v2623_v3, 0.0 }
 0x3eb   :  { %v7081_v21 = vmul.f32 %v2665_v62, %v2656_v48  ;;  %v2657_v0 = vsel %vm2627_vm11, %v2621_v10, %v5118_v31  ;;  %v5119_v5 = vadd.f32 -1.0, %v5657_v26  ;;  %v5659_v10 = vpop.eup %5658 }
 0x3ec   :  { %v7090_v56 = vmul.f32 %v2669_v20, %v2657_v0  ;;  %v2661_v60 = vsel %vm2631_vm12, %v2625_v9, %v5122_v19  ;;  %v2644_v8 = vmul.f32 1.442695, %v2635_v63  ;;  %v5121_v45 = vadd.f32 -1.0, %v5659_v10 }
 0x3ed   :  { %2742 = vrot.lane.b32.xlu0 %v7081_v21, %s5738_s5  ;;  %2692 = vrot.lane.b32.xlu1 %v7081_v21, %s5739_s27  ;;  %v7099_v55 = vmul.f32 %v2685_v29, %v2661_v60  ;;  %v2658_v16 = vsel %vm2628_vm13, %v2622_v44, %v5119_v5  ;;  %v487_v9 = vmul.f32 %v7044_v2, %v6951_v23  ;;  %v8367_v0 = vand.u32 4294901760, %v7081_v21 }
 0x3ee   :  { %v7117_v61 = vmul.f32 %v2673_v58, %v2658_v16  ;;  %5660 = vpow2.f32 %v2644_v8  ;;  %v2660_v15 = vsel %vm2630_vm14, %v2624_v13, %v5121_v45  ;;  %v8556_v43 = vand.u32 4294901760, %v7081_v21 }
 0x3ef   :  { %8545 = vst [vmem:[#allocation23_spill] sm:$0xff] %v7099_v55  ;;  %v2681_v35 = vrot.slane %v487_v9, %v8527_v30  ;;  %v7253_v39 = vsub.f32 %v7081_v21, %v8367_v0 }
 0x3f1   :  { %2767 = vrot.lane.b32.xlu0 %v7081_v21, %s5740_s28  ;;  %2694 = vrot.lane.b32.xlu1 %v7090_v56, %s5739_s27  ;;  %v7149_v47 = vmul.f32 %v2681_v35, %v2660_v15 }
 0x3f3   :  { %8546 = vst [vmem:[#allocation24_spill] sm:$0xff] %v7149_v47 }
 0x3f5   :  { %2752 = vrot.lane.b32.xlu0 %v7099_v55, %s5738_s5  ;;  %2717 = vrot.lane.b32.xlu1 %v7081_v21, %s5741_s29 }
 0x3f8   :  { %v5661_v23 = vpop.eup %5660 }
 0x3f9   :  { %2800 = vrot.lane.b32.xlu0 %v7090_v56, %s5727_s14  ;;  %2719 = vrot.lane.b32.xlu1 %v7090_v56, %s5741_s29  ;;  %v5120_v33 = vadd.f32 -1.0, %v5661_v23 }
 0x3fb   :  { %v2659_v34 = vsel %vm2629_vm15, %v2623_v3, %v5120_v33  ;;  %v8364_v33 = vand.u32 4294901760, %v7253_v39 }
 0x3fc   :  { %v7170_v4 = vmul.f32 %v2677_v14, %v2659_v34 }
 0x3fd   :  { %2798 = vrot.lane.b32.xlu0 %v7081_v21, %s5727_s14  ;;  %2702 = vrot.lane.b32.xlu1 %v7099_v55, %s5739_s27 }
 0x401   :  { %2826 = vrot.lane.b32.xlu0 %v7117_v61, %s5742_s30  ;;  %2727 = vrot.lane.b32.xlu1 %v7099_v55, %s5741_s29 }
 0x405   :  { %2851 = vrot.lane.b32.xlu0 %v7117_v61, %s5726_s13  ;;  %2744 = vrot.lane.b32.xlu1 %v7090_v56, %s5738_s5 }
 0x409   :  { %2847 = vrot.lane.b32.xlu0 %v7081_v21, %s5726_s13  ;;  %2769 = vrot.lane.b32.xlu1 %v7090_v56, %s5740_s28 }
 0x40d   :  { %2875 = vrot.lane.b32.xlu0 %v7117_v61, %s5731_s17  ;;  %2777 = vrot.lane.b32.xlu1 %v7099_v55, %s5740_s28 }
 0x411   :  { %2696 = vrot.lane.b32.xlu0 %v7117_v61, %s5739_s27  ;;  %2802 = vrot.lane.b32.xlu1 %v7117_v61, %s5727_s14 }
 0x415   :  { %2721 = vrot.lane.b32.xlu0 %v7117_v61, %s5741_s29  ;;  %2824 = vrot.lane.b32.xlu1 %v7090_v56, %s5742_s30 }
 0x419   :  { %2700 = vrot.lane.b32.xlu0 %v7149_v47, %s5739_s27  ;;  %2849 = vrot.lane.b32.xlu1 %v7090_v56, %s5726_s13 }
 0x41d   :  { %2746 = vrot.lane.b32.xlu0 %v7117_v61, %s5738_s5  ;;  %2822 = vrot.lane.b32.xlu1 %v7081_v21, %s5742_s30 }
 0x421   :  { %2771 = vrot.lane.b32.xlu0 %v7117_v61, %s5740_s28  ;;  %2873 = vrot.lane.b32.xlu1 %v7090_v56, %s5731_s17 }
 0x425   :  { %2750 = vrot.lane.b32.xlu0 %v7149_v47, %s5738_s5  ;;  %2871 = vrot.lane.b32.xlu1 %v7081_v21, %s5731_s17 }
 0x429   :  { %2804 = vrot.lane.b32.xlu0 %v7170_v4, %s5727_s14  ;;  %2698 = vrot.lane.b32.xlu1 %v7170_v4, %s5739_s27 }
 0x42d   :  { %2808 = vrot.lane.b32.xlu0 %v7099_v55, %s5727_s14  ;;  %2723 = vrot.lane.b32.xlu1 %v7170_v4, %s5741_s29 }
 0x431   :  { %2830 = vrot.lane.b32.xlu0 %v7149_v47, %s5742_s30  ;;  %2725 = vrot.lane.b32.xlu1 %v7149_v47, %s5741_s29 }
 0x435   :  { %2855 = vrot.lane.b32.xlu0 %v7149_v47, %s5726_s13  ;;  %2748 = vrot.lane.b32.xlu1 %v7170_v4, %s5738_s5 }
 0x439   :  { %2857 = vrot.lane.b32.xlu0 %v7099_v55, %s5726_s13  ;;  %2773 = vrot.lane.b32.xlu1 %v7170_v4, %s5740_s28 }
 0x43d   :  { %2879 = vrot.lane.b32.xlu0 %v7149_v47, %s5731_s17  ;;  %2775 = vrot.lane.b32.xlu1 %v7149_v47, %s5740_s28 }
 0x441   :  { %2806 = vrot.lane.b32.xlu1 %v7149_v47, %s5727_s14 }
 0x445   :  { %2828 = vrot.lane.b32.xlu1 %v7170_v4, %s5742_s30 }
 0x449   :  { %2853 = vrot.lane.b32.xlu1 %v7170_v4, %s5726_s13 }
 0x44d   :  { %2832 = vrot.lane.b32.xlu1 %v7099_v55, %s5742_s30 }
 0x451   :  { %2877 = vrot.lane.b32.xlu1 %v7170_v4, %s5731_s17 }
 0x455   :  { %2881 = vrot.lane.b32.xlu1 %v7099_v55, %s5731_s17 }
 0x45f   :  { %v2743_v6 = vpop.permute.xlu0 %2742  ;;  %v2693_v30 = vpop.permute.xlu1 %2692 }
 0x463   :  { %v7209_v44 = vpop.permute.xlu0 %2767  ;;  %v7211_v36 = vpop.permute.xlu1 %2694 }
 0x464   :  { %v2709_v24 = vsel %vm2704_vm2, %v2693_v30, %v7211_v36 }
 0x465   :  { %v2954_v41 = vand.u32 4294901760, %v2709_v24 }
 0x467   :  { %v7216_v1 = vpop.permute.xlu0 %2752  ;;  %v2718_v11 = vpop.permute.xlu1 %2717  ;;  %v7219_v40 = vsub.f32 %v2709_v24, %v2954_v41 }
 0x468   :  { %v2760_v15 = vsel %vm2754_vm4, %v7216_v1, %v2743_v6 }
 0x469   :  { %v3050_v28 = vand.u32 4294901760, %v7219_v40 }
 0x46b   :  { %v7221_v62 = vpop.permute.xlu0 %2800  ;;  %v7223_v51 = vpop.permute.xlu1 %2719  ;;  %v3051_v12 = vsub.f32 %v7219_v40, %v3050_v28 }
 0x46c   :  { %v2734_v31 = vsel %vm2729_vm3, %v2718_v11, %v7223_v51 }
 0x46d   :  { %v2958_v48 = vand.u32 4294901760, %v2734_v31  ;;  %v3052_v35 = vand.u32 4294901760, %v3051_v12 }
 0x46f   :  { %v7230_v20 = vsub.f32 %v2734_v31, %v2958_v48  ;;  %v7232_v52 = vpop.permute.xlu0 %2798  ;;  %v7234_v19 = vpop.permute.xlu1 %2702  ;;  %v7236_v60 = vpack.c.bf16 %v2958_v48, %v2954_v41  ;;  %v2964_v31 = vand.u32 4294901760, %v2760_v15 }
 0x470   :  { %8547 = vst [vmem:[#allocation25_spill] sm:$0xff] %v7232_v52  ;;  %v7242_v29 = vsel %vm89_vm1, %v7232_v52, %v7221_v62  ;;  %v2710_v25 = vsel %vm2704_vm2, %v7234_v19, %v2693_v30 }
 0x471   :  { %v3062_v26 = vand.u32 4294901760, %v7230_v20  ;;  %v8366_v13 = vand.u32 4294901760, %v7242_v29  ;;  %v2956_v5 = vand.u32 4294901760, %v2710_v25  ;;  %5274 = vmatprep.subr.bf16.mxu0 %v7236_v60  ;;  %v8557_v59 = vand.u32 4294901760, %v7242_v29 }
 0x473   :  { %v7260_v16 = vsub.f32 %v7242_v29, %v8366_v13  ;;  %v7262_v58 = vsub.f32 %v2710_v25, %v2956_v5  ;;  %v7264_v53 = vpop.permute.xlu0 %2826  ;;  %v7266_v7 = vpop.permute.xlu1 %2727  ;;  %v3063_v3 = vsub.f32 %v7230_v20, %v3062_v26  ;;  %v7272_v10 = vpack.c.bf16 %v3062_v26, %v3050_v28 }
 0x474   :  { %v2735_v63 = vsel %vm2729_vm3, %v7266_v7, %v2718_v11  ;;  %v7371_v54 = vpack.c.bf16 %v8557_v59, %v8556_v43 }
 0x475   :  { %8548 = vst [vmem:[#allocation26_spill] sm:$0xff] %v7272_v10  ;;  %v8365_v8 = vand.u32 4294901760, %v7260_v16  ;;  %v3056_v45 = vand.u32 4294901760, %v7262_v58  ;;  %v2960_v9 = vand.u32 4294901760, %v2735_v63  ;;  %v3064_v23 = vand.u32 4294901760, %v3063_v3 }
 0x476   :  { %8558 = vst [vmem:[#allocation34_spill] sm:$0xff] %v7371_v54 }
 0x477   :  { %v7280_v38 = vpack.c.bf16 %v2960_v9, %v2956_v5  ;;  %v7282_v34 = vsub.f32 %v2735_v63, %v2960_v9  ;;  %v7284_v14 = vpop.permute.xlu0 %2851  ;;  %v7286_v30 = vpop.permute.xlu1 %2744  ;;  %v5289_v41 = vpack.c.bf16 %v3064_v23, %v3052_v35  ;;  %v7295_v11 = vpack.c.bf16 %v8365_v8, %v8364_v33 }
 0x478   :  { %v2759_v24 = vsel %vm2754_vm4, %v2743_v6, %v7286_v30  ;;  %v3057_v48 = vsub.f32 %v7262_v58, %v3056_v45  ;;  %v7314_v9 = vsub.f32 %v2760_v15, %v2964_v31 }
 0x479   :  { %8549 = vst [vmem:[#allocation27_spill] sm:$0xff] %v7295_v11  ;;  %v3068_v28 = vand.u32 4294901760, %v7282_v34  ;;  %5276 = vmatpush1.bf16.msra.mxu0 %v7280_v38  ;;  %v2962_v25 = vand.u32 4294901760, %v2759_v24  ;;  %5290 = vmatprep.subr.bf16.mxu1 %v5289_v41 }
 0x47a   :  { %v3058_v35 = vand.u32 4294901760, %v3057_v48  ;;  %v2970_v48 = vand.u32 4294901760, %v7090_v56 }
 0x47b   :  { %v3069_v6 = vsub.f32 %v7282_v34, %v3068_v28  ;;  %v7302_v26 = vpop.permute.xlu0 %2847  ;;  %v7304_v5 = vpop.permute.xlu1 %2769  ;;  %v7306_v12 = vpack.c.bf16 %v3068_v28, %v3056_v45  ;;  %v7308_v3 = vsub.f32 %v2759_v24, %v2962_v25 }
 0x47c   :  { %v2784_v63 = vsel %vm2779_vm5, %v7209_v44, %v7304_v5 }
 0x47d   :  { %8550 = vst [vmem:[#allocation28_spill] sm:$0xff] %v7306_v12  ;;  %v3070_v23 = vand.u32 4294901760, %v3069_v6  ;;  %v2966_v41 = vand.u32 4294901760, %v2784_v63  ;;  %v3074_v50 = vand.u32 4294901760, %v7308_v3  ;;  %v3080_v6 = vand.u32 4294901760, %v7314_v9 }
 0x47f   :  { %v7317_v33 = vsub.f32 %v2784_v63, %v2966_v41  ;;  %v7319_v8 = vpop.permute.xlu0 %2875  ;;  %v7321_v45 = vpop.permute.xlu1 %2777  ;;  %v7323_v24 = vpack.c.bf16 %v2966_v41, %v2962_v25  ;;  %v5291_v28 = vpack.c.bf16 %v3070_v23, %v3058_v35  ;;  %v3075_v0 = vsub.f32 %v7308_v3, %v3074_v50 }
 0x480   :  { %8551 = vst [vmem:[#allocation29_spill] sm:$0xff] %v7319_v8  ;;  %v2785_v15 = vsel %vm2779_vm5, %v7321_v45, %v7209_v44 }
 0x481   :  { %8552 = vst [vmem:[#allocation30_spill] sm:$0xff] %v7323_v24  ;;  %v3086_v13 = vand.u32 4294901760, %v7317_v33  ;;  %v2968_v63 = vand.u32 4294901760, %v2785_v15  ;;  %5278 = vmatprep.subr.bf16.mxu0 %v7323_v24  ;;  %5292 = vmatpush1.bf16.msra.mxu1 %v5291_v28  ;;  %v7353_v28 = vsub.f32 %v7090_v56, %v2970_v48  ;;  %v3076_v46 = vand.u32 4294901760, %v3075_v0 }
 0x483   :  { %v7334_v25 = vpack.c.bf16 %v2968_v63, %v2964_v31  ;;  %v7336_v35 = vsub.f32 %v2785_v15, %v2968_v63  ;;  %v7338_v23 = vpop.permute.xlu0 %2696  ;;  %v7340_v44 = vpop.permute.xlu1 %2802  ;;  %v3087_v41 = vsub.f32 %v7317_v33, %v3086_v13  ;;  %v7346_v2 = vpack.c.bf16 %v3086_v13, %v3074_v50 }
 0x484   :  { %v2813_v31 = vsel %vm89_vm1, %v7221_v62, %v7340_v44  ;;  %v3081_v15 = vsub.f32 %v7314_v9, %v3080_v6  ;;  %v2952_v13 = vsel %vm2950_vm7, %v2895_v27, 0 }
 0x485   :  { %8553 = vst [vmem:[#allocation31_spill] sm:$0xff] %v7334_v25  ;;  %8554 = vst [vmem:[#allocation32_spill] sm:$0xff] %v7346_v2  ;;  %v3092_v63 = vand.u32 4294901760, %v7336_v35  ;;  %v2974_v37 = vand.u32 4294901760, %v2813_v31  ;;  %5280 = vmatpush1.bf16.msra.mxu0 %v7334_v25  ;;  %v3088_v50 = vand.u32 4294901760, %v3087_v41 }
 0x487   :  { %v3093_v32 = vsub.f32 %v7336_v35, %v3092_v63  ;;  %v7361_v49 = vsub.f32 %v2813_v31, %v2974_v37  ;;  %v7363_v62 = vpop.permute.xlu0 %2721  ;;  %v2825_v56 = vpop.permute.xlu1 %2824  ;;  %v7365_v17 = vpack.c.bf16 %v2974_v37, %v2970_v48  ;;  %v5293_v27 = vpack.c.bf16 %v3088_v50, %v3076_v46 }
 0x488   :  { %v2838_v0 = vsel %vm2834_vm8, %v2825_v56, %v7264_v53  ;;  %v7376_v41 = vpack.c.bf16 %v3092_v63, %v3080_v6  ;;  %v3082_v31 = vand.u32 4294901760, %v3081_v15  ;;  %v8384_v37 = vand.u32 4294901760, %v7353_v28 }
 0x489   :  { %8555 = vst [vmem:[#allocation33_spill] sm:$0xff] %v7365_v17  ;;  %v3094_v42 = vand.u32 4294901760, %v3093_v32  ;;  %5282 = vmatprep.subr.bf16.mxu0 %v7365_v17  ;;  %v7380_v48 = vand.u32 4294901760, %v2952_v13  ;;  %v8386_v21 = vand.u32 4294901760, %v7361_v49  ;;  %v2978_v29 = vand.u32 4294901760, %v2838_v0  ;;  %5294 = vmatprep.subr.bf16.mxu1 %v5293_v27 }
 0x48a   :  { %8559 = vst [vmem:[#allocation35_spill] sm:$0xff] %v7376_v41  ;;  %5284 = vmatpush1.bf16.msra.mxu0 %v7371_v54  ;;  %v8560_v50 = vand.u32 4294901760, %v7260_v16 }
 0x48b   :  { %v7384_v59 = vpop.permute.xlu0 %2700  ;;  %v2850_v43 = vpop.permute.xlu1 %2849  ;;  %v5295_v46 = vpack.c.bf16 %v3094_v42, %v3082_v31  ;;  %v7386_v6 = vsub.f32 %v2838_v0, %v2978_v29  ;;  %v3099_v0 = vsub.f32 %v7353_v28, %v8384_v37  ;;  %v3111_v57 = vsub.f32 %v7361_v49, %v8386_v21 }
 0x48c   :  { %v7392_v32 = vsel %vm2704_vm2, %v7384_v59, %v7234_v19  ;;  %v2862_v15 = vsel %vm127_vm0, %v2850_v43, %v7284_v14  ;;  %v2863_v63 = vsel %vm127_vm0, %v7302_v26, %v2850_v43  ;;  %v3117_v42 = vsub.f32 %v7260_v16, %v8560_v50 }
 0x48d   :  { %5296 = vmatpush1.bf16.msra.mxu1 %v5295_v46  ;;  %v7407_v19 = vsub.f32 %v2952_v13, %v7380_v48  ;;  %v2982_v27 = vand.u32 4294901760, %v2862_v15  ;;  %v2984_v31 = vand.u32 4294901760, %v2863_v63  ;;  %v8563_v46 = vand.u32 4294901760, %v7253_v39 }
 0x48e   :  { %v3118_v11 = vand.u32 4294901760, %v3117_v42  ;;  %v3100_v41 = vand.u32 4294901760, %v3099_v0  ;;  %v8567_v42 = vand.u32 4294901760, %v7386_v6 }
 0x48f   :  { %8561 = vst [vmem:[#allocation36_spill] sm:$0xff] %v7407_v19  ;;  %v7413_v47 = vpop.permute.xlu0 %2746  ;;  %v7415_v55 = vpop.permute.xlu1 %2822  ;;  %v3105_v50 = vsub.f32 %v7253_v39, %v8563_v46  ;;  %v7420_v37 = vsub.f32 %v2862_v15, %v2982_v27  ;;  %v7422_v13 = vsub.f32 %v2863_v63, %v2984_v31  ;;  %v7428_v43 = vand.u32 4294901760, %v7407_v19 }
 0x490   :  { %8562 = vst [vmem:[#allocation37_spill] sm:$0xff] %v7415_v55  ;;  %v2839_v52 = vsel %vm2834_vm8, %v7415_v55, %v2825_v56  ;;  %v7432_v10 = vpack.c.bf16 %v2982_v27, %v2978_v29  ;;  %v3112_v15 = vand.u32 4294901760, %v3111_v57  ;;  %v3123_v0 = vsub.f32 %v7386_v6, %v8567_v42 }
 0x491   :  { %v2980_v21 = vand.u32 4294901760, %v2839_v52  ;;  %8564 = vst [vmem:[#allocation38_spill] sm:$0xff] %v7428_v43  ;;  %v8391_v12 = vand.u32 4294901760, %v7422_v13  ;;  %v3106_v54 = vand.u32 4294901760, %v3105_v50  ;;  %v3040_v50 = vsub.f32 %v7407_v19, %v7428_v43 }
 0x492   :  { %8565 = vst [vmem:[#allocation39_spill] sm:$0xff] %v7432_v10  ;;  %5286 = vmatprep.subr.bf16.mxu0 %v7432_v10  ;;  %v5297_v2 = vpack.c.bf16 %v3112_v15, %v3100_v41 }
 0x493   :  { %v7434_v46 = vpack.c.bf16 %v2984_v31, %v2980_v21  ;;  %v7436_v63 = vsub.f32 %v2839_v52, %v2980_v21  ;;  %v7438_v17 = vpop.permute.xlu0 %2771  ;;  %v2874_v56 = vpop.permute.xlu1 %2873  ;;  %v3141_v57 = vsub.f32 %v7422_v13, %v8391_v12  ;;  %v5299_v21 = vpack.c.bf16 %v3118_v11, %v3106_v54 }
 0x494   :  { %v2886_v29 = vsel %vm146_vm6, %v2874_v56, %v7319_v8  ;;  %5298 = vmatprep.subr.bf16.mxu1 %v5297_v2  ;;  %v8569_v31 = vand.u32 4294901760, %v7420_v37  ;;  %v3124_v11 = vand.u32 4294901760, %v3123_v0  ;;  %v7482_v8 = vand.u32 4294901760, %v3040_v50 }
 0x495   :  { %8566 = vst [vmem:[#allocation40_spill] sm:$0xff] %v7434_v46  ;;  %v8392_v52 = vand.u32 4294901760, %v7436_v63  ;;  %5288 = vmatpush1.bf16.msra.mxu0 %v7434_v46  ;;  %v7452_v27 = vand.u32 4294901760, %v2886_v29  ;;  %5300 = vmatpush1.bf16.msra.mxu1 %v5299_v21 }
 0x496   :  { %v3135_v41 = vsub.f32 %v7420_v37, %v8569_v31  ;;  %8572 = vst [vmem:[#allocation44_spill] sm:$0xff] %v7482_v8 }
 0x497   :  { %8568 = vst [vmem:[#allocation41_spill] sm:$0xff] %v7452_v27  ;;  %v3129_v15 = vsub.f32 %v7436_v63, %v8392_v52  ;;  %v7462_v42 = vpop.permute.xlu0 %2750  ;;  %v7464_v54 = vpop.permute.xlu1 %2871  ;;  %v7467_v2 = vsub.f32 %v2886_v29, %v7452_v27  ;;  %2987 = vmatprep.subr.mxu0 %v7452_v27  ;;  %v3142_v52 = vand.u32 4294901760, %v3141_v57 }
 0x498   :  { %8570 = vst [vmem:[#allocation42_spill] sm:$0xff] %v7464_v54  ;;  %v7473_v31 = vsel %vm2754_vm4, %v7462_v42, %v7216_v1  ;;  %v2887_v12 = vsel %vm146_vm6, %v7464_v54, %v2874_v56  ;;  %v3136_v21 = vand.u32 4294901760, %v3135_v41  ;;  %v2733_v1 = vsel %vm2729_vm3, %v7223_v51, %v7363_v62 }
 0x499   :  { %v3130_v43 = vand.u32 4294901760, %v3129_v15  ;;  %v7479_v46 = vand.u32 4294901760, %v2887_v12  ;;  %v8401_v29 = vand.u32 4294901760, %v7467_v2  ;;  %v8408_v41 = vand.u32 4294901760, %v7117_v61 }
 0x49a   :  { %v5301_v0 = vpack.c.bf16 %v3136_v21, %v3124_v11 }
 0x49b   :  { %8571 = vst [vmem:[#allocation43_spill] sm:$0xff] %v7479_v46  ;;  %v2699_v10 = vpop.permute.xlu1 %2698  ;;  %v5303_v55 = vpack.c.bf16 %v3142_v52, %v3130_v43  ;;  %v7489_v56 = vsub.f32 %v2887_v12, %v7479_v46  ;;  %2989 = vmatpush1.msra.mxu0 %v7479_v46  ;;  %v2708_v43 = vsel %vm2704_vm2, %v7211_v36, %v7338_v23  ;;  %v3633_v12 = vand.u32 4294901760, %v2733_v1 }
 0x49c   :  { %5302 = vmatprep.subr.bf16.mxu1 %v5301_v0  ;;  %v2706_v57 = vsel %vm2704_vm2, %v2699_v10, %v7384_v59  ;;  %v3147_v51 = vsub.f32 %v7467_v2, %v8401_v29  ;;  %3042 = vmatmul.mubr.f32.vlgmr.msra.gmra.mrb[6].mxu0 %v7482_v8  ;;  %v3629_v11 = vand.u32 4294901760, %v2708_v43 }
 0x49d   :  { %5304 = vmatpush1.bf16.msra.mxu1 %v5303_v55  ;;  %v8402_v52 = vand.u32 4294901760, %v7489_v56  ;;  %v7508_v55 = vsel %vm2704_vm2, %v7338_v23, %v2699_v10  ;;  %3709 = vmatprep.mubr.f32.mxu0 %v8484_v18  ;;  %v7524_v10 = vsel %vm2754_vm4, %v7286_v30, %v7413_v47  ;;  %v7528_v50 = vsub.f32 %v2733_v1, %v3633_v12 }
 0x49e   :  { %v3627_v23 = vand.u32 4294901760, %v7508_v55  ;;  %v3148_v0 = vand.u32 4294901760, %v3147_v51  ;;  %v4302_v54 = vand.u32 4294901760, %v2706_v57  ;;  %v8574_v30 = vand.u32 4294901760, %v7170_v4  ;;  %v8626_v22 = vld [vmem:[#allocation41_spill] sm:$0xff] }
 0x49f   :  { %v2724_v59 = vpop.permute.xlu1 %2723  ;;  %v3153_v36 = vsub.f32 %v7489_v56, %v8402_v52  ;;  %v7535_v52 = vpop.permute.xlu0 %2804  ;;  %v7562_v27 = vpack.c.bf16 %v3633_v12, %v3629_v11 }
 0x4a0   :  { %v7518_v15 = vsel %vm2729_vm3, %v7363_v62, %v2724_v59  ;;  %v7533_v62 = vsub.f32 %v7117_v61, %v8408_v41  ;;  %v7540_v46 = vsub.f32 %v7170_v4, %v8574_v30  ;;  %3149 = vmatprep.subr.mxu1 %v3148_v0  ;;  %v5307_v0 = vpack.c.bf16 %v7282_v34, %v7262_v58 }
 0x4a1   :  { %v8411_v21 = vand.u32 4294901760, %v7518_v15  ;;  %v3154_v29 = vand.u32 4294901760, %v3153_v36  ;;  %v5305_v36 = vpack.c.bf16 %v7230_v20, %v7219_v40  ;;  %v7559_v30 = vsub.f32 %v2708_v43, %v3629_v11  ;;  %8577 = vst [vmem:[#allocation48_spill] sm:$0xff] %v7562_v27 }
 0x4a2   :  { %8573 = vst [vmem:[#allocation45_spill] sm:$0xff] %v7533_v62  ;;  %8575 = vst [vmem:[#allocation46_spill] sm:$0xff] %v7540_v46  ;;  %v5309_v40 = vpack.c.bf16 %v7317_v33, %v7308_v3  ;;  %v8412_v20 = vand.u32 4294901760, %v7528_v50  ;;  %v8414_v34 = vand.u32 4294901760, %v7540_v46  ;;  %v4300_v43 = vand.u32 4294901760, %v7392_v32 }
 0x4a3   :  { %v2726_v8 = vpop.permute.xlu1 %2725  ;;  %v7555_v41 = vpack.c.bf16 %v8411_v21, %v3627_v23  ;;  %3155 = vmatpush1.msra.mxu1 %v3154_v29  ;;  %v7569_v21 = vsub.f32 %v2706_v57, %v4302_v54  ;;  %v8413_v29 = vand.u32 4294901760, %v7533_v62  ;;  %v5311_v3 = vpack.c.bf16 %v7336_v35, %v7314_v9 }
 0x4a4   :  { %v7545_v1 = vsel %vm2729_vm3, %v2726_v8, %v7266_v7  ;;  %v2731_v51 = vsel %vm2729_vm3, %v2724_v59, %v2726_v8  ;;  %v3637_v7 = vand.u32 4294901760, %v7524_v10  ;;  %5306 = vmatprep.subr.bf16.mxu1 %v5305_v36  ;;  %3204 = vmatmul.mubr.f32.vlgmr.msra.gmra.mrb[2].mxu1 %v7380_v48  ;;  %v8415_v57 = vand.u32 4294901760, %v7559_v30 }
 0x4a5   :  { %8576 = vst [vmem:[#allocation47_spill] sm:$0xff] %v7555_v41  ;;  %v8416_v8 = vand.u32 4294901760, %v7545_v1  ;;  %v4306_v59 = vand.u32 4294901760, %v2731_v51  ;;  %5308 = vmatpush1.bf16.msra.mxu1 %v5307_v0  ;;  %5370 = vmatprep.subr.bf16.mxu0 %v7555_v41  ;;  %v5313_v9 = vpack.c.bf16 %v7361_v49, %v7353_v28 }
 0x4a6   :  { %5310 = vmatprep.subr.bf16.mxu1 %v5309_v40  ;;  %5372 = vmatpush1.bf16.msra.mxu0 %v7562_v27  ;;  %v7587_v36 = vsub.f32 %v7524_v10, %v3637_v7  ;;  %v7607_v10 = vsub.f32 %v7528_v50, %v8412_v20  ;;  %v7624_v20 = vsub.f32 %v7533_v62, %v8413_v29 }
 0x4a7   :  { %v2749_v58 = vpop.permute.xlu1 %2748  ;;  %v7575_v12 = vpack.c.bf16 %v4306_v59, %v4302_v54  ;;  %v7577_v11 = vsub.f32 %v2731_v51, %v4306_v59  ;;  %v2783_v54 = vsel %vm2779_vm5, %v7304_v5, %v7438_v17  ;;  %v7593_v51 = vpop.permute.xlu0 %2808  ;;  %3310 = vmatprep.mubr.f32.mxu1 %v8484_v18  ;;  %v7602_v35 = vpack.c.bf16 %v8416_v8, %v4300_v43 }
 0x4a8   :  { %v2756_v33 = vsel %vm2754_vm4, %v2749_v58, %v7462_v42  ;;  %8579 = vst [vmem:[#allocation50_spill] sm:$0xff] %v7587_v36  ;;  %8580 = vst [vmem:[#allocation51_spill] sm:$0xff] %v7593_v51  ;;  %v7612_v5 = vsel %vm2754_vm4, %v7413_v47, %v2749_v58  ;;  %v5315_v59 = vpack.c.bf16 %v7260_v16, %v7253_v39  ;;  %v3641_v40 = vand.u32 4294901760, %v2783_v54 }
 0x4a9   :  { %8578 = vst [vmem:[#allocation49_spill] sm:$0xff] %v7575_v12  ;;  %8581 = vst [vmem:[#allocation52_spill] sm:$0xff] %v7602_v35  ;;  %5312 = vmatpush1.bf16.msra.mxu1 %v5311_v3  ;;  %v7619_v42 = vsub.f32 %v7540_v46, %v8414_v34  ;;  %v7629_v47 = vsub.f32 %v7559_v30, %v8415_v57  ;;  %v7632_v58 = vsub.f32 %v7392_v32, %v4300_v43 }
 0x4aa   :  { %5314 = vmatprep.subr.bf16.mxu1 %v5313_v9  ;;  %v2812_v3 = vsel %vm89_vm1, %v7340_v44, %v7535_v52  ;;  %v8422_v9 = vand.u32 4294901760, %v7612_v5  ;;  %v5317_v32 = vpack.c.bf16 %v7420_v37, %v7386_v6  ;;  %v3743_v43 = vand.u32 4294901760, %v7607_v10 }
 0x4ab   :  { %v2774_v0 = vpop.permute.xlu1 %2773  ;;  %v5319_v34 = vpack.c.bf16 %v7422_v13, %v7436_v63  ;;  %v7656_v57 = vpop.permute.xlu0 %2830  ;;  %v4310_v44 = vand.u32 4294901760, %v2756_v33  ;;  %v7658_v39 = vpack.c.bf16 %v3641_v40, %v3637_v7  ;;  %v7673_v27 = vsub.f32 %v2783_v54, %v3641_v40 }
 0x4ac   :  { %v7638_v16 = vsel %vm2779_vm5, %v7438_v17, %v2774_v0  ;;  %v7654_v17 = vsub.f32 %v7508_v55, %v3627_v23  ;;  %v4308_v7 = vand.u32 4294901760, %v7473_v31  ;;  %v8586_v12 = vand.u32 4294901760, %v7587_v36 }
 0x4ad   :  { %5316 = vmatpush1.bf16.msra.mxu1 %v5315_v59  ;;  %8582 = vst [vmem:[#allocation53_spill] sm:$0xff] %v7658_v39  ;;  %v8583_v55 = vand.u32 4294901760, %v7638_v16  ;;  %8585 = vst [vmem:[#allocation55_spill] sm:$0xff] %v7673_v27  ;;  %v3649_v59 = vand.u32 4294901760, %v2812_v3  ;;  %v8587_v40 = vand.u32 4294901760, %v7518_v15  ;;  %v8592_v54 = vand.u32 4294901760, %v7569_v21 }
 0x4ae   :  { %5318 = vmatprep.subr.bf16.mxu1 %v5317_v32 }
 0x4af   :  { %v2776_v8 = vpop.permute.xlu1 %2775  ;;  %v7671_v23 = vpack.c.bf16 %v8583_v55, %v8422_v9  ;;  %v7689_v55 = vsub.f32 %v7518_v15, %v8587_v40  ;;  %v7691_v9 = vsub.f32 %v2756_v33, %v4310_v44  ;;  %v7713_v40 = vsub.f32 %v7473_v31, %v4308_v7 }
 0x4b0   :  { %v7663_v10 = vsel %vm2779_vm5, %v2776_v8, %v7321_v45  ;;  %v2781_v29 = vsel %vm2779_vm5, %v2774_v0, %v2776_v8  ;;  %v7680_v45 = vsub.f32 %v7587_v36, %v8586_v12  ;;  %v8595_v33 = vand.u32 4294901760, %v7170_v4 }
 0x4b1   :  { %8584 = vst [vmem:[#allocation54_spill] sm:$0xff] %v7671_v23  ;;  %v8425_v32 = vand.u32 4294901760, %v7663_v10  ;;  %v4314_v41 = vand.u32 4294901760, %v2781_v29  ;;  %5374 = vmatprep.subr.bf16.mxu0 %v7671_v23  ;;  %5320 = vmatpush1.bf16.msra.mxu1 %v5319_v34 }
 0x4b2   :  { %5376 = vmatpush1.bf16.msra.mxu0 %v7658_v39  ;;  %3260 = vmatprep.subr.mxu1 %v7467_v2  ;;  %v4403_v39 = vsub.f32 %v7569_v21, %v8592_v54 }
 0x4b3   :  { %v2807_v12 = vpop.permute.xlu1 %2806  ;;  %v7696_v8 = vpack.c.bf16 %v8425_v32, %v4308_v7  ;;  %v7698_v0 = vpack.c.bf16 %v4314_v41, %v4310_v44  ;;  %v7700_v23 = vsub.f32 %v2781_v29, %v4314_v41  ;;  %v7715_v44 = vsub.f32 %v2812_v3, %v3649_v59  ;;  %v7717_v41 = vpop.permute.xlu0 %2855 }
 0x4b4   :  { %v7706_v15 = vsel %vm89_vm1, %v2807_v12, %v7593_v51  ;;  %v2811_v34 = vsel %vm89_vm1, %v7535_v52, %v2807_v12  ;;  %8591 = vst [vmem:[#allocation59_spill] sm:$0xff] %v7717_v41  ;;  %v3731_v32 = vand.u32 4294901760, %v7629_v47  ;;  %v8594_v3 = vand.u32 4294901760, %v7545_v1 }
 0x4b5   :  { %8588 = vst [vmem:[#allocation56_spill] sm:$0xff] %v7696_v8  ;;  %8589 = vst [vmem:[#allocation57_spill] sm:$0xff] %v7698_v0  ;;  %v3647_v29 = vand.u32 4294901760, %v2811_v34  ;;  %v8593_v0 = vand.u32 4294901760, %v7577_v11  ;;  %3263 = vmatpush1.msra.mxu1 %v7489_v56  ;;  %v8598_v8 = vand.u32 4294901760, %v7117_v61 }
 0x4b6   :  { %8590 = vst [vmem:[#allocation58_spill] sm:$0xff] %v7706_v15  ;;  %v7732_v7 = vsub.f32 %v7545_v1, %v8594_v3  ;;  %v8597_v15 = vand.u32 4294901760, %v7654_v17  ;;  %5322 = vmatprep.subr.bf16.mxu1 %v7236_v60  ;;  %3313 = vmatmul.mubr.f32.vlgmr.msra.gmra.mrb[2].mxu1 %v7407_v19  ;;  %v7762_v61 = vpack.c.bf16 %v3743_v43, %v3731_v32  ;;  %v4404_v43 = vand.u32 4294901760, %v4403_v39 }
 0x4b7   :  { %v4415_v52 = vsub.f32 %v7577_v11, %v8593_v0  ;;  %v2829_v47 = vpop.permute.xlu1 %2828  ;;  %v7737_v54 = vpack.c.bf16 %v3647_v29, %v8595_v33  ;;  %v7748_v1 = vpack.c.bf16 %v3649_v59, %v8598_v8  ;;  %v8600_v33 = vand.u32 4294901760, %v7673_v27  ;;  %5324 = vmatpush1.bf16.msra.mxu1 %v7280_v38  ;;  %3401 = vmatprep.mubr.f32.mxu1 %v8484_v18 }
 0x4b8   :  { %v7742_v0 = vsub.f32 %v7654_v17, %v8597_v15  ;;  %v8601_v8 = vand.u32 4294901760, %v7638_v16  ;;  %v7775_v31 = vsel %vm2834_vm8, %v7264_v53, %v2829_v47  ;;  %5326 = vmatprep.subr.bf16.mxu1 %v7323_v24  ;;  %v8604_v15 = vand.u32 4294901760, %v7689_v55 }
 0x4b9   :  { %8596 = vst [vmem:[#allocation60_spill] sm:$0xff] %v7737_v54  ;;  %8599 = vst [vmem:[#allocation61_spill] sm:$0xff] %v7748_v1  ;;  %v7756_v3 = vsub.f32 %v7673_v27, %v8600_v33  ;;  %5378 = vmatprep.subr.bf16.mxu0 %v7737_v54  ;;  %v4416_v59 = vand.u32 4294901760, %v4415_v52  ;;  %v2836_v33 = vsel %vm2834_vm8, %v2829_v47, %v7656_v57  ;;  %v7780_v52 = vpop.permute.xlu0 %2857  ;;  %v8605_v53 = vand.u32 4294901760, %v7612_v5 }
 0x4ba   :  { %v7767_v4 = vsub.f32 %v7638_v16, %v8601_v8  ;;  %5380 = vmatpush1.bf16.msra.mxu0 %v7748_v1  ;;  %8603 = vst [vmem:[#allocation63_spill] sm:$0xff] %v7780_v52  ;;  %v3725_v8 = vand.u32 4294901760, %v7742_v0  ;;  %v3736_v12 = vsub.f32 %v7689_v55, %v8604_v15  ;;  %v8606_v1 = vand.u32 4294901760, %v7632_v58 }
 0x4bb   :  { %v2854_v16 = vpop.permute.xlu1 %2853  ;;  %v7790_v47 = vsub.f32 %v7612_v5, %v8605_v53  ;;  %v3651_v54 = vand.u32 4294901760, %v2836_v33  ;;  %v3653_v15 = vand.u32 4294901760, %v7775_v31  ;;  %5328 = vmatpush1.bf16.msra.mxu1 %v7334_v25  ;;  %v2864_v53 = vsel %vm127_vm0, %v7780_v52, %v7302_v26  ;;  %v8614_v52 = vld [vmem:[#allocation34_spill] sm:$0xff] }
 0x4bc   :  { %8602 = vst [vmem:[#allocation62_spill] sm:$0xff] %v7767_v4  ;;  %v2860_v39 = vsel %vm127_vm0, %v2854_v16, %v7717_v41  ;;  %v2861_v32 = vsel %vm127_vm0, %v7284_v14, %v2854_v16  ;;  %v4397_v0 = vsub.f32 %v7632_v58, %v8606_v1  ;;  %v8607_v16 = vld [vmem:[#allocation33_spill] sm:$0xff]  ;;  %v7810_v41 = vpack.c.bf16 %v4416_v59, %v4404_v43 }
 0x4bd   :  { %v3655_v19 = vand.u32 4294901760, %v2860_v39  ;;  %v3657_v35 = vand.u32 4294901760, %v2861_v32  ;;  %5330 = vmatprep.subr.bf16.mxu1 %v8607_v16  ;;  %v7812_v1 = vsub.f32 %v2811_v34, %v3647_v29  ;;  %v8611_v5 = vand.u32 4294901760, %v7732_v7  ;;  %v8613_v34 = vld [vmem:[#allocation37_spill] sm:$0xff]  ;;  %v8617_v16 = vld [vmem:[#allocation39_spill] sm:$0xff] }
 0x4be   :  { %8608 = vst [vmem:[#allocation64_spill] sm:$0xff] %v7810_v41  ;;  %v4328_v43 = vand.u32 4294901760, %v2864_v53  ;;  %v8615_v27 = vand.u32 4294901760, %v7691_v9 }
 0x4bf   :  { %v7814_v51 = vpack.c.bf16 %v3657_v35, %v3653_v15  ;;  %v2833_v62 = vpop.permute.xlu1 %2832  ;;  %v7816_v46 = vpack.c.bf16 %v3655_v19, %v3651_v54  ;;  %v4409_v25 = vsub.f32 %v7732_v7, %v8611_v5  ;;  %v7831_v14 = vsub.f32 %v2860_v39, %v3655_v19  ;;  %5332 = vmatpush1.bf16.msra.mxu1 %v8614_v52 }
 0x4c0   :  { %v7826_v59 = vsel %vm2834_vm8, %v7656_v57, %v2833_v62  ;;  %v2840_v29 = vsel %vm2834_vm8, %v2833_v62, %v8613_v34  ;;  %v3737_v5 = vand.u32 4294901760, %v3736_v12  ;;  %v4427_v26 = vsub.f32 %v7691_v9, %v8615_v27  ;;  %5334 = vmatprep.subr.bf16.mxu1 %v8617_v16  ;;  %v7848_v34 = vpop.permute.xlu0 %2879 }
 0x4c1   :  { %8609 = vst [vmem:[#allocation65_spill] sm:$0xff] %v7814_v51  ;;  %8610 = vst [vmem:[#allocation66_spill] sm:$0xff] %v7816_v46  ;;  %v4324_v41 = vand.u32 4294901760, %v2840_v29  ;;  %5382 = vmatprep.subr.bf16.mxu0 %v7816_v46  ;;  %v8616_v57 = vand.u32 4294901760, %v7663_v10  ;;  %v8618_v19 = vand.u32 4294901760, %v7767_v4  ;;  %v4398_v39 = vand.u32 4294901760, %v4397_v0 }
 0x4c2   :  { %8612 = vst [vmem:[#allocation67_spill] sm:$0xff] %v7826_v59  ;;  %5384 = vmatpush1.bf16.msra.mxu0 %v7814_v51  ;;  %8619 = vst [vmem:[#allocation37_spill] sm:$0xff] %v7848_v34  ;;  %v7851_v46 = vsub.f32 %v2836_v33, %v3651_v54  ;;  %v8623_v12 = vand.u32 4294901760, %v7790_v47  ;;  %v7875_v24 = vsub.f32 %v2864_v53, %v4328_v43  ;;  %v3767_v53 = vand.u32 4294901760, %v7756_v3 }
 0x4c3   :  { %v7841_v59 = vsub.f32 %v7663_v10, %v8616_v57  ;;  %v3760_v62 = vsub.f32 %v7767_v4, %v8618_v19  ;;  %v2878_v27 = vpop.permute.xlu1 %2877  ;;  %v7853_v52 = vpack.c.bf16 %v4328_v43, %v4324_v41  ;;  %v4410_v10 = vand.u32 4294901760, %v4409_v25  ;;  %v8622_v19 = vld [vmem:[#allocation29_spill] sm:$0xff] }
 0x4c4   :  { %v8621_v57 = vand.u32 4294901760, %v7700_v23  ;;  %v2884_v51 = vsel %vm146_vm6, %v2878_v27, %v7848_v34  ;;  %v2885_v0 = vsel %vm146_vm6, %v8622_v19, %v2878_v27  ;;  %v3748_v54 = vsub.f32 %v7790_v47, %v8623_v12  ;;  %v8630_v12 = vld [vmem:[#allocation43_spill] sm:$0xff] }
 0x4c5   :  { %8620 = vst [vmem:[#allocation68_spill] sm:$0xff] %v7853_v52  ;;  %v7868_v52 = vsub.f32 %v2861_v32, %v3657_v35  ;;  %v7870_v25 = vand.u32 4294901760, %v2884_v51  ;;  %v7872_v36 = vand.u32 4294901760, %v2885_v0  ;;  %v5385_v27 = vpack.c.bf16 %v3737_v5, %v3725_v8 }
 0x4c6   :  { %v4439_v16 = vsub.f32 %v7700_v23, %v8621_v57  ;;  %v8625_v57 = vld [vmem:[#allocation40_spill] sm:$0xff]  ;;  %v3761_v19 = vand.u32 4294901760, %v3760_v62  ;;  %v7880_v4 = vsub.f32 %v2840_v29, %v4324_v41  ;;  %v8627_v35 = vand.u32 4294901760, %v7812_v1 }
 0x4c7   :  { %8624 = vst [vmem:[#allocation29_spill] sm:$0xff] %v7870_v25  ;;  %5336 = vmatpush1.bf16.msra.mxu1 %v8625_v57  ;;  %3660 = vmatprep.subr.mxu0 %v7870_v25  ;;  %v7886_v33 = vpack.c.bf16 %v4410_v10, %v4398_v39  ;;  %v7890_v34 = vsub.f32 %v7775_v31, %v3653_v15  ;;  %v3749_v8 = vand.u32 4294901760, %v3748_v54  ;;  %v8629_v41 = vand.u32 4294901760, %v7715_v44  ;;  %v8632_v15 = vld [vmem:[#allocation26_spill] sm:$0xff] }
 0x4c8   :  { %3352 = vmatprep.subr.mxu1 %v8626_v22  ;;  %v3784_v32 = vsub.f32 %v7812_v1, %v8627_v35  ;;  %v4440_v43 = vand.u32 4294901760, %v4439_v16  ;;  %3662 = vmatpush1.msra.mxu0 %v7872_v36  ;;  %v4428_v5 = vand.u32 4294901760, %v4427_v26  ;;  %v8631_v39 = vand.u32 4294901760, %v7831_v14  ;;  %v8633_v16 = vld [vmem:[#allocation38_spill] sm:$0xff] }
 0x4c9   :  { %8628 = vst [vmem:[#allocation40_spill] sm:$0xff] %v7886_v33  ;;  %v3790_v29 = vsub.f32 %v7715_v44, %v8629_v41  ;;  %5386 = vmatprep.subr.bf16.mxu0 %v5385_v27  ;;  %v4480_v31 = vand.u32 4294901760, %v7875_v24  ;;  %v5389_v10 = vpack.c.bf16 %v3761_v19, %v3749_v8  ;;  %v8634_v54 = vand.u32 4294901760, %v7713_v40  ;;  %v8637_v33 = vld [vmem:[#allocation44_spill] sm:$0xff] }
 0x4ca   :  { %v3808_v3 = vsub.f32 %v7831_v14, %v8631_v39  ;;  %v8635_v35 = vand.u32 4294901760, %v7841_v59  ;;  %v4468_v27 = vand.u32 4294901760, %v7880_v4  ;;  %v7912_v62 = vsub.f32 %v2884_v51, %v7870_v25  ;;  %v8636_v39 = vld [vmem:[#allocation28_spill] sm:$0xff]  ;;  %3715 = vmatmul.mubr.f32.vlgmr.msra.gmra.mrb[8].mxu0 %v8637_v33 }
 0x4cb   :  { %3354 = vmatpush1.msra.mxu1 %v8630_v12  ;;  %v4421_v26 = vsub.f32 %v7713_v40, %v8634_v54  ;;  %v8638_v19 = vand.u32 4294901760, %v7851_v46  ;;  %v8466_v54 = vand.u32 4294901760, %v7890_v34  ;;  %5388 = vmatpush1.bf16.msra.mxu0 %v7762_v61  ;;  %v7922_v22 = vpack.c.bf16 %v4440_v43, %v4428_v5 }
 0x4cc   :  { %5338 = vmatprep.subr.bf16.mxu1 %v8632_v15  ;;  %3405 = vmatmul.mubr.f32.vlgmr.msra.gmra.mrb[2].mxu1 %v8633_v16  ;;  %v4433_v41 = vsub.f32 %v7841_v59, %v8635_v35  ;;  %v3785_v15 = vand.u32 4294901760, %v3784_v32  ;;  %v8639_v16 = vld [vmem:[#allocation32_spill] sm:$0xff]  ;;  %v3791_v51 = vand.u32 4294901760, %v3790_v29  ;;  %v3773_v32 = vand.u32 4294901760, %v7619_v42 }
 0x4cd   :  { %5340 = vmatpush1.bf16.msra.mxu1 %v8636_v39  ;;  %v3796_v8 = vsub.f32 %v7851_v46, %v8638_v19  ;;  %v4422_v35 = vand.u32 4294901760, %v4421_v26  ;;  %v8640_v39 = vand.u32 4294901760, %v7868_v52  ;;  %5390 = vmatprep.subr.bf16.mxu0 %v5389_v10  ;;  %v3809_v25 = vand.u32 4294901760, %v3808_v3  ;;  %v8644_v10 = vld [vmem:[#allocation35_spill] sm:$0xff] }
 0x4ce   :  { %5342 = vmatprep.subr.bf16.mxu1 %v8639_v16  ;;  %v4434_v12 = vand.u32 4294901760, %v4433_v41  ;;  %3529 = vmatprep.mubr.f32.mxu1 %v8484_v18  ;;  %v7930_v19 = vsub.f32 %v2885_v0, %v7872_v36  ;;  %v8641_v61 = vand.u32 4294901760, %v7353_v28  ;;  %v8642_v16 = vand.u32 4294901760, %v7361_v49 }
 0x4cf   :  { %v3814_v33 = vsub.f32 %v7868_v52, %v8640_v39  ;;  %v8643_v29 = vand.u32 4294901760, %v7680_v45  ;;  %3875 = vmatprep.mubr.f32.mxu0 %v8484_v18  ;;  %v5393_v42 = vpack.c.bf16 %v3785_v15, %v3773_v32  ;;  %v3797_v3 = vand.u32 4294901760, %v3796_v8 }
 0x4d0   :  { %v5345_v43 = vpack.c.bf16 %v8642_v16, %v8641_v61  ;;  %v7939_v26 = vpack.c.bf16 %v4434_v12, %v4422_v35  ;;  %v8465_v41 = vand.u32 4294901760, %v7912_v62  ;;  %v4469_v0 = vsub.f32 %v7880_v4, %v4468_v27 }
 0x4d1   :  { %v5391_v5 = vpack.c.bf16 %v3767_v53, %v8643_v29  ;;  %5344 = vmatpush1.bf16.msra.mxu1 %v8644_v10  ;;  %v3802_v49 = vsub.f32 %v7890_v34, %v8466_v54  ;;  %v8645_v28 = vand.u32 4294901760, %v7386_v6  ;;  %v8646_v45 = vand.u32 4294901760, %v7420_v37  ;;  %v8648_v37 = vld [vmem:[#allocation27_spill] sm:$0xff] }
 0x4d2   :  { %5346 = vmatprep.subr.bf16.mxu1 %v5345_v43  ;;  %v4481_v53 = vsub.f32 %v7875_v24, %v4480_v31  ;;  %v3815_v35 = vand.u32 4294901760, %v3814_v33  ;;  %v8647_v15 = vand.u32 4294901760, %v7624_v20  ;;  %v5397_v39 = vpack.c.bf16 %v3809_v25, %v3797_v3  ;;  %v8694_v20 = vld [vmem:[#allocation59_spill] sm:$0xff]  ;;  %v2882_v43 = vpop.permute.xlu1 %2881 }
 0x4d3   :  { %5392 = vmatpush1.bf16.msra.mxu0 %v5391_v5  ;;  %v5349_v12 = vpack.c.bf16 %v8646_v45, %v8645_v28  ;;  %v4470_v32 = vand.u32 4294901760, %v4469_v0  ;;  %v8464_v61 = vand.u32 4294901760, %v7930_v19  ;;  %v3820_v33 = vsub.f32 %v7912_v62, %v8465_v41 }
 0x4d4   :  { %5394 = vmatprep.subr.bf16.mxu0 %v5393_v42  ;;  %v5395_v8 = vpack.c.bf16 %v3791_v51, %v8647_v15  ;;  %v4482_v16 = vand.u32 4294901760, %v4481_v53  ;;  %v8649_v25 = vand.u32 4294901760, %v7632_v58  ;;  %v8650_v51 = vand.u32 4294901760, %v7732_v7 }
 0x4d5   :  { %5348 = vmatpush1.bf16.msra.mxu1 %v8648_v37  ;;  %v8652_v5 = vand.u32 4294901760, %v7569_v21  ;;  %v8653_v10 = vand.u32 4294901760, %v7577_v11  ;;  %v3803_v3 = vand.u32 4294901760, %v3802_v49  ;;  %v8655_v28 = vand.u32 4294901760, %v7713_v40 }
 0x4d6   :  { %v7969_v29 = vpack.c.bf16 %v8650_v51, %v8649_v25  ;;  %5350 = vmatprep.subr.bf16.mxu1 %v5349_v12  ;;  %v7977_v0 = vpack.c.bf16 %v4482_v16, %v4470_v32  ;;  %v8656_v45 = vand.u32 4294901760, %v7841_v59  ;;  %v8658_v15 = vand.u32 4294901760, %v7691_v9 }
 0x4d7   :  { %v7975_v42 = vpack.c.bf16 %v8653_v10, %v8652_v5  ;;  %5396 = vmatpush1.bf16.msra.mxu0 %v5395_v8  ;;  %v8659_v37 = vand.u32 4294901760, %v7700_v23  ;;  %v8661_v51 = vand.u32 4294901760, %v7436_v63  ;;  %v8662_v49 = vand.u32 4294901760, %v7422_v13 }
 0x4d8   :  { %8651 = vst [vmem:[#allocation26_spill] sm:$0xff] %v7969_v29  ;;  %v7983_v53 = vpack.c.bf16 %v8656_v45, %v8655_v28  ;;  %5398 = vmatprep.subr.bf16.mxu0 %v5397_v39  ;;  %v7995_v8 = vpack.c.bf16 %v4480_v31, %v4468_v27  ;;  %v3826_v32 = vsub.f32 %v7930_v19, %v8464_v61  ;;  %v3821_v5 = vand.u32 4294901760, %v3820_v33  ;;  %v8667_v27 = vld [vmem:[#allocation30_spill] sm:$0xff]  ;;  %v8672_v45 = vld [vmem:[#allocation33_spill] sm:$0xff] }
 0x4d9   :  { %8654 = vst [vmem:[#allocation28_spill] sm:$0xff] %v7975_v42  ;;  %v7989_v25 = vpack.c.bf16 %v8659_v37, %v8658_v15  ;;  %v5351_v12 = vpack.c.bf16 %v8662_v49, %v8661_v51  ;;  %v5399_v16 = vpack.c.bf16 %v3815_v35, %v3803_v3  ;;  %v8664_v10 = vand.u32 4294901760, %v7467_v2  ;;  %v8666_v2 = vld [vmem:[#allocation62_spill] sm:$0xff]  ;;  %v8669_v35 = vld [vmem:[#allocation55_spill] sm:$0xff]  ;;  %v8673_v15 = vld [vmem:[#allocation45_spill] sm:$0xff] }
 0x4da   :  { %8657 = vst [vmem:[#allocation32_spill] sm:$0xff] %v7983_v53  ;;  %8663 = vst [vmem:[#allocation27_spill] sm:$0xff] %v7995_v8  ;;  %v3827_v39 = vand.u32 4294901760, %v3826_v32  ;;  %v8665_v63 = vand.u32 4294901760, %v7489_v56  ;;  %v5401_v13 = vpack.c.bf16 %v7689_v55, %v7654_v17  ;;  %v5403_v31 = vpack.c.bf16 %v7528_v50, %v7559_v30  ;;  %v8670_v3 = vld [vmem:[#allocation31_spill] sm:$0xff]  ;;  %v8671_v28 = vld [vmem:[#allocation46_spill] sm:$0xff] }
 0x4db   :  { %8660 = vst [vmem:[#allocation35_spill] sm:$0xff] %v7989_v25  ;;  %5352 = vmatpush1.bf16.msra.mxu1 %v5351_v12  ;;  %5400 = vmatpush1.bf16.msra.mxu0 %v5399_v16  ;;  %v5405_v56 = vpack.c.bf16 %v8666_v2, %v7790_v47  ;;  %v5411_v37 = vpack.c.bf16 %v7715_v44, %v8673_v15  ;;  %v8674_v51 = vld [vmem:[#allocation34_spill] sm:$0xff]  ;;  %v8675_v12 = vld [vmem:[#allocation39_spill] sm:$0xff]  ;;  %v8676_v16 = vld [vmem:[#allocation41_spill] sm:$0xff] }
 0x4dc   :  { %3478 = vmatprep.subr.mxu1 %v8664_v10  ;;  %3822 = vmatprep.subr.mxu0 %v3821_v5  ;;  %v5413_v49 = vpack.c.bf16 %v7831_v14, %v7851_v46  ;;  %v5415_v32 = vpack.c.bf16 %v7868_v52, %v7890_v34  ;;  %v8677_v5 = vld [vmem:[#allocation25_spill] sm:$0xff]  ;;  %v8678_v10 = vld [vmem:[#allocation51_spill] sm:$0xff]  ;;  %v8698_v53 = vld [vmem:[#allocation60_spill] sm:$0xff] }
 0x4dd   :  { %v8695_v61 = vld [vmem:[#allocation53_spill] sm:$0xff]  ;;  %v8697_v8 = vld [vmem:[#allocation67_spill] sm:$0xff]  ;;  %v8699_v29 = vld [vmem:[#allocation42_spill] sm:$0xff] }
 0x4de   :  { %v4326_v25 = vand.u32 4294901760, %v8697_v8 }
 0x4df   :  { %3482 = vmatpush1.msra.mxu1 %v8665_v63  ;;  %3828 = vmatpush1.msra.mxu0 %v3827_v39  ;;  %v2815_v63 = vsel %vm89_vm1, %v8678_v10, %v8677_v5  ;;  %v8692_v10 = vld [vmem:[#allocation57_spill] sm:$0xff] }
 0x4e0   :  { %5354 = vmatprep.subr.bf16.mxu1 %v7236_v60  ;;  %3531 = vmatmul.mubr.f32.vlgmr.msra.gmra.mrb[2].mxu1 %v7380_v48  ;;  %v8668_v60 = vld [vmem:[#allocation50_spill] sm:$0xff] }
 0x4e1   :  { %5402 = vmatprep.subr.bf16.mxu0 %v5401_v13  ;;  %5356 = vmatpush1.bf16.msra.mxu1 %v7280_v38  ;;  %v5407_v33 = vpack.c.bf16 %v8669_v35, %v8668_v60  ;;  %v5409_v38 = vpack.c.bf16 %v7812_v1, %v8671_v28  ;;  %v8680_v13 = vld [vmem:[#allocation43_spill] sm:$0xff] }
 0x4e2   :  { %3877 = vmatmul.mubr.f32.vlgmr.msra.gmra.mrb[8].mxu0 %v7380_v48  ;;  %5358 = vmatprep.subr.bf16.mxu1 %v8667_v27  ;;  %v8683_v27 = vld [vmem:[#allocation49_spill] sm:$0xff] }
 0x4e3   :  { %5404 = vmatpush1.bf16.msra.mxu0 %v5403_v31  ;;  %3619 = vmatprep.mubr.f32.mxu1 %v8484_v18  ;;  %v4320_v31 = vand.u32 4294901760, %v2815_v63 }
 0x4e4   :  { %5406 = vmatprep.subr.bf16.mxu0 %v5405_v56  ;;  %3983 = vmatprep.mubr.f32.mxu0 %v8484_v18  ;;  %v8681_v56 = vld [vmem:[#allocation52_spill] sm:$0xff] }
 0x4e5   :  { %5360 = vmatpush1.bf16.msra.mxu1 %v8670_v3  ;;  %v8685_v3 = vld [vmem:[#allocation48_spill] sm:$0xff]  ;;  %v8062_v41 = vsub.f32 %v2815_v63, %v4320_v31  ;;  %v8700_v63 = vld [vmem:[#allocation61_spill] sm:$0xff] }
 0x4e6   :  { %5362 = vmatprep.subr.bf16.mxu1 %v8672_v45  ;;  %v8687_v45 = vld [vmem:[#allocation23_spill] sm:$0xff] }
 0x4e7   :  { %5408 = vmatpush1.bf16.msra.mxu0 %v5407_v33  ;;  %v8684_v33 = vld [vmem:[#allocation36_spill] sm:$0xff] }
 0x4e8   :  { %5410 = vmatprep.subr.bf16.mxu0 %v5409_v38  ;;  %v8686_v38 = vld [vmem:[#allocation56_spill] sm:$0xff] }
 0x4e9   :  { %5364 = vmatpush1.bf16.msra.mxu1 %v8674_v51  ;;  %v8688_v51 = vld [vmem:[#allocation58_spill] sm:$0xff] }
 0x4ea   :  { %5366 = vmatprep.subr.bf16.mxu1 %v8675_v12  ;;  %v8689_v12 = vld [vmem:[#allocation54_spill] sm:$0xff] }
 0x4eb   :  { %5412 = vmatpush1.bf16.msra.mxu0 %v5411_v37  ;;  %v4316_v37 = vand.u32 4294901760, %v8687_v45 }
 0x4ec   :  { %5414 = vmatprep.subr.bf16.mxu0 %v5413_v49  ;;  %v4322_v49 = vand.u32 4294901760, %v8688_v51 }
 0x4ed   :  { %5368 = vmatpush1.bf16.msra.mxu1 %v8625_v57  ;;  %v8682_v57 = vld [vmem:[#allocation47_spill] sm:$0xff] }
 0x4ee   :  { %3570 = vmatprep.subr.mxu1 %v8676_v16  ;;  %v8691_v16 = vld [vmem:[#allocation24_spill] sm:$0xff] }
 0x4ef   :  { %5416 = vmatpush1.bf16.msra.mxu0 %v5415_v32  ;;  %v8051_v32 = vpack.c.bf16 %v4320_v31, %v4316_v37  ;;  %v4318_v5 = vand.u32 4294901760, %v8691_v16  ;;  %v8701_v31 = vld [vmem:[#allocation68_spill] sm:$0xff] }
 0x4f0   :  { %3933 = vmatprep.subr.mxu0 %v7912_v62 }
 0x4f1   :  { %3572 = vmatpush1.msra.mxu1 %v8680_v13  ;;  %8690 = vst [vmem:[#allocation62_spill] sm:$0xff] %v8051_v32  ;;  %v8693_v13 = vld [vmem:[#allocation63_spill] sm:$0xff]  ;;  %v8064_v54 = vpack.c.bf16 %v4322_v49, %v4318_v5 }
 0x4f2   :  { %3621 = vmatmul.mubr.f32.vlgmr.msra.gmra.mrb[2].mxu1 %v7380_v48  ;;  %5466 = vmatprep.subr.bf16.mxu1 %v8681_v56  ;;  %v2859_v6 = vsel %vm127_vm0, %v8694_v20, %v8693_v13  ;;  %v8072_v20 = vsub.f32 %v8687_v45, %v4316_v37  ;;  %v8076_v13 = vsub.f32 %v8688_v51, %v4322_v49  ;;  %v8704_v45 = vld [vmem:[#allocation37_spill] sm:$0xff]  ;;  %v8717_v51 = vld [vmem:[#allocation64_spill] sm:$0xff] }
 0x4f3   :  { %3936 = vmatpush1.msra.mxu0 %v7930_v19  ;;  %5468 = vmatpush1.bf16.msra.mxu1 %v8683_v27  ;;  %8696 = vst [vmem:[#allocation30_spill] sm:$0xff] %v8064_v54  ;;  %v4330_v42 = vand.u32 4294901760, %v2859_v6  ;;  %v8703_v27 = vld [vmem:[#allocation66_spill] sm:$0xff]  ;;  %v2883_v37 = vsel %vm146_vm6, %v8704_v45, %v2882_v43 }
 0x4f4   :  { %5418 = vmatprep.subr.bf16.mxu0 %v8682_v57  ;;  %3986 = vmatmul.mubr.f32.vlgmr.msra.gmra.mrb[8].mxu0 %v8684_v33  ;;  %v8712_v56 = vand.u32 4294901760, %v8076_v13 }
 0x4f5   :  { %5420 = vmatpush1.bf16.msra.mxu0 %v8685_v3  ;;  %5470 = vmatprep.subr.bf16.mxu1 %v8686_v38  ;;  %v8081_v38 = vpack.c.bf16 %v4330_v42, %v4326_v25  ;;  %v8106_v45 = vsub.f32 %v2859_v6, %v4330_v42  ;;  %v8713_v42 = vld [vmem:[#allocation40_spill] sm:$0xff]  ;;  %v8718_v6 = vld [vmem:[#allocation38_spill] sm:$0xff] }
 0x4f6   :  { %5422 = vmatprep.subr.bf16.mxu0 %v8689_v12  ;;  %4382 = vmatprep.mubr.f32.mxu1 %v8484_v18 }
 0x4f7   :  { %4074 = vmatprep.mubr.f32.mxu0 %v8484_v18  ;;  %5472 = vmatpush1.bf16.msra.mxu1 %v8692_v10  ;;  %v2888_v10 = vsel %vm146_vm6, %v2882_v43, %v8699_v29  ;;  %8702 = vst [vmem:[#allocation50_spill] sm:$0xff] %v8081_v38  ;;  %v8085_v29 = vsub.f32 %v8691_v16, %v4318_v5  ;;  %v8100_v16 = vand.u32 4294901760, %v2883_v37  ;;  %v8707_v5 = vld [vmem:[#allocation29_spill] sm:$0xff]  ;;  %v8708_v43 = vand.u32 4294901760, %v8062_v41 }
 0x4f8   :  { %5474 = vmatprep.subr.bf16.mxu1 %v8051_v32  ;;  %v8096_v32 = vsub.f32 %v8697_v8, %v4326_v25  ;;  %v8709_v25 = vand.u32 4294901760, %v7654_v17  ;;  %v8710_v8 = vand.u32 4294901760, %v7689_v55  ;;  %v8714_v17 = vld [vmem:[#allocation44_spill] sm:$0xff]  ;;  %v8715_v55 = vand.u32 4294901760, %v7559_v30 }
 0x4f9   :  { %5424 = vmatpush1.bf16.msra.mxu0 %v8695_v61  ;;  %v4457_v39 = vsub.f32 %v8062_v41, %v8708_v43 }
 0x4fa   :  { %5426 = vmatprep.subr.bf16.mxu0 %v8698_v53  ;;  %v5433_v49 = vpack.c.bf16 %v8710_v8, %v8709_v25 }
 0x4fb   :  { %5476 = vmatpush1.bf16.msra.mxu1 %v8064_v54  ;;  %v8090_v54 = vand.u32 4294901760, %v2888_v10  ;;  %v4458_v8 = vand.u32 4294901760, %v4457_v39  ;;  %v8722_v39 = vand.u32 4294901760, %v8096_v32 }
 0x4fc   :  { %5478 = vmatprep.subr.bf16.mxu1 %v8701_v31  ;;  %v8706_v31 = vld [vmem:[#allocation65_spill] sm:$0xff] }
 0x4fd   :  { %5428 = vmatpush1.bf16.msra.mxu0 %v8700_v63  ;;  %8705 = vst [vmem:[#allocation55_spill] sm:$0xff] %v8090_v54  ;;  %v8124_v43 = vsub.f32 %v2888_v10, %v8090_v54  ;;  %v8720_v10 = vand.u32 4294901760, %v8666_v2  ;;  %v8724_v2 = vand.u32 4294901760, %v8669_v35 }
 0x4fe   :  { %5430 = vmatprep.subr.bf16.mxu0 %v8703_v27 }
 0x4ff   :  { %5480 = vmatpush1.bf16.msra.mxu1 %v8081_v38  ;;  %v8711_v38 = vand.u32 4294901760, %v8072_v20 }
 0x500   :  { %4333 = vmatprep.subr.mxu1 %v8090_v54 }
 0x501   :  { %5432 = vmatpush1.bf16.msra.mxu0 %v8706_v31  ;;  %v4445_v33 = vsub.f32 %v8072_v20, %v8711_v38  ;;  %v8716_v38 = vand.u32 4294901760, %v7528_v50 }
 0x502   :  { %4025 = vmatprep.subr.mxu0 %v8707_v5  ;;  %v4463_v5 = vsub.f32 %v8076_v13, %v8712_v56  ;;  %v4486_v56 = vand.u32 4294901760, %v8106_v45 }
 0x503   :  { %4335 = vmatpush1.msra.mxu1 %v8100_v16  ;;  %v5435_v25 = vpack.c.bf16 %v8716_v38, %v8715_v55  ;;  %v4446_v50 = vand.u32 4294901760, %v4445_v33  ;;  %v8146_v55 = vsub.f32 %v2883_v37, %v8100_v16  ;;  %v8726_v37 = vand.u32 4294901760, %v7812_v1 }
 0x504   :  { %5482 = vmatprep.subr.bf16.mxu1 %v8713_v42  ;;  %4388 = vmatmul.mubr.f32.vlgmr.msra.gmra.mrb[4].mxu1 %v8714_v17  ;;  %v8719_v42 = vand.u32 4294901760, %v7790_v47  ;;  %v4464_v30 = vand.u32 4294901760, %v4463_v5  ;;  %v8723_v47 = vand.u32 4294901760, %v8668_v60  ;;  %v4487_v33 = vsub.f32 %v8106_v45, %v4486_v56 }
 0x505   :  { %4027 = vmatpush1.msra.mxu0 %v7872_v36  ;;  %5484 = vmatpush1.bf16.msra.mxu1 %v8717_v51  ;;  %v4475_v51 = vsub.f32 %v8096_v32, %v8722_v39  ;;  %v8729_v1 = vand.u32 4294901760, %v7851_v46  ;;  %v8733_v46 = vand.u32 4294901760, %v7912_v62  ;;  %v8745_v62 = vld [vmem:[#allocation57_spill] sm:$0xff] }
 0x506   :  { %5434 = vmatprep.subr.bf16.mxu0 %v5433_v49  ;;  %4078 = vmatmul.mubr.f32.vlgmr.msra.gmra.mrb[8].mxu0 %v8718_v6  ;;  %v5437_v54 = vpack.c.bf16 %v8720_v10, %v8719_v42  ;;  %v8721_v49 = vand.u32 4294901760, %v8085_v29  ;;  %v5439_v38 = vpack.c.bf16 %v8724_v2, %v8723_v47  ;;  %v8727_v10 = vand.u32 4294901760, %v8673_v15 }
 0x507   :  { %5436 = vmatpush1.bf16.msra.mxu0 %v5435_v25  ;;  %5486 = vmatprep.subr.bf16.mxu1 %v7939_v26  ;;  %v5489_v25 = vpack.c.bf16 %v4458_v8, %v4446_v50  ;;  %v4492_v26 = vand.u32 4294901760, %v8124_v43  ;;  %v4476_v35 = vand.u32 4294901760, %v4475_v51  ;;  %v4498_v8 = vand.u32 4294901760, %v8146_v55 }
 0x508   :  { %v4451_v17 = vsub.f32 %v8085_v29, %v8721_v49  ;;  %5438 = vmatprep.subr.bf16.mxu0 %v5437_v54  ;;  %4548 = vmatprep.mubr.f32.mxu1 %v8484_v18  ;;  %v8725_v54 = vand.u32 4294901760, %v8671_v28  ;;  %v8728_v49 = vand.u32 4294901760, %v7715_v44  ;;  %v4488_v28 = vand.u32 4294901760, %v4487_v33  ;;  %v8756_v33 = vld [vmem:[#allocation35_spill] sm:$0xff] }
 0x509   :  { %4202 = vmatprep.mubr.f32.mxu0 %v8484_v18  ;;  %5488 = vmatpush1.bf16.msra.mxu1 %v7922_v22  ;;  %v4493_v22 = vsub.f32 %v8124_v43, %v4492_v26  ;;  %v4499_v15 = vsub.f32 %v8146_v55, %v4498_v8  ;;  %v8732_v51 = vand.u32 4294901760, %v7868_v52  ;;  %v8736_v52 = vpack.c.bf16 %v7577_v11, %v7569_v21 }
 0x50a   :  { %v5441_v5 = vpack.c.bf16 %v8726_v37, %v8725_v54  ;;  %v4452_v60 = vand.u32 4294901760, %v4451_v17  ;;  %5490 = vmatprep.subr.bf16.mxu1 %v5489_v25  ;;  %v5443_v50 = vpack.c.bf16 %v8728_v49, %v8727_v10  ;;  %v8730_v17 = vand.u32 4294901760, %v7831_v14 }
 0x50b   :  { %5440 = vmatpush1.bf16.msra.mxu0 %v5439_v38  ;;  %v5495_v44 = vpack.c.bf16 %v4488_v28, %v4476_v35  ;;  %v4494_v2 = vand.u32 4294901760, %v4493_v22  ;;  %v4500_v14 = vand.u32 4294901760, %v4499_v15  ;;  %v8735_v38 = vpack.c.bf16 %v7732_v7, %v7632_v58  ;;  %v8765_v15 = vld [vmem:[#allocation12_spill] sm:$0xff] }
 0x50c   :  { %5442 = vmatprep.subr.bf16.mxu0 %v5441_v5  ;;  %v5491_v42 = vpack.c.bf16 %v4464_v30, %v4452_v60  ;;  %v5445_v39 = vpack.c.bf16 %v8730_v17, %v8729_v1  ;;  %v8731_v30 = vand.u32 4294901760, %v7890_v34  ;;  %v8737_v34 = vpack.c.bf16 %v7841_v59, %v7713_v40  ;;  %v8744_v59 = vld [vmem:[#allocation56_spill] sm:$0xff] }
 0x50d   :  { %v5505_v58 = vpack.c.bf16 %v8062_v41, %v8072_v20  ;;  %v8738_v21 = vpack.c.bf16 %v7700_v23, %v7691_v9  ;;  %v5507_v11 = vpack.c.bf16 %v8076_v13, %v8085_v29  ;;  %v8739_v40 = vpack.c.bf16 %v7875_v24, %v7880_v4  ;;  %v8740_v9 = vld [vmem:[#allocation29_spill] sm:$0xff]  ;;  %v8741_v23 = vld [vmem:[#allocation52_spill] sm:$0xff] }
 0x50e   :  { %5492 = vmatpush1.bf16.msra.mxu1 %v5491_v42  ;;  %v5447_v47 = vpack.c.bf16 %v8732_v51, %v8731_v30  ;;  %v5511_v7 = vpack.c.bf16 %v8106_v45, %v8096_v32  ;;  %v8742_v24 = vld [vmem:[#allocation36_spill] sm:$0xff]  ;;  %v8743_v4 = vld [vmem:[#allocation49_spill] sm:$0xff]  ;;  %v8757_v54 = vand.u32 4294901760, %v8085_v29  ;;  %v8758_v37 = vand.u32 4294901760, %v8076_v13  ;;  %v8763_v42 = vld [vmem:[#allocation10_spill] sm:$0xff] }
 0x50f   :  { %5444 = vmatpush1.bf16.msra.mxu0 %v5443_v50  ;;  %5494 = vmatprep.subr.bf16.mxu1 %v7977_v0  ;;  %v8734_v0 = vand.u32 4294901760, %v7930_v19  ;;  %v8746_v19 = vld [vmem:[#allocation62_spill] sm:$0xff]  ;;  %v8760_v60 = vand.u32 4294901760, %v8096_v32  ;;  %v8764_v50 = vld [vmem:[#allocation11_spill] sm:$0xff] }
 0x510   :  { %5446 = vmatprep.subr.bf16.mxu0 %v5445_v39  ;;  %v5539_v5 = vpack.c.bf16 %v8758_v37, %v8757_v54 }
 0x511   :  { %v5543_v35 = vpack.c.bf16 %v4486_v56, %v8760_v60  ;;  %v8761_v56 = vld [vmem:[#allocation18_spill] sm:$0xff] }
 0x512   :  { %5496 = vmatpush1.bf16.msra.mxu1 %v5495_v44 }
 0x513   :  { %5448 = vmatpush1.bf16.msra.mxu0 %v5447_v47  ;;  %4495 = vmatprep.subr.mxu1 %v4494_v2  ;;  %v8766_v47 = vld [vmem:[#allocation13_spill] sm:$0xff] }
 0x514   :  { %4151 = vmatprep.subr.mxu0 %v8733_v46 }
 0x516   :  { %4501 = vmatpush1.msra.mxu1 %v4500_v14 }
 0x517   :  { %4155 = vmatpush1.msra.mxu0 %v8734_v0  ;;  %5498 = vmatprep.subr.bf16.mxu1 %v8735_v38 }
 0x518   :  { %5450 = vmatprep.subr.bf16.mxu0 %v8682_v57  ;;  %4550 = vmatmul.mubr.f32.vlgmr.msra.gmra.mrb[4].mxu1 %v7380_v48  ;;  %v8750_v57 = vld [vmem:[#allocation55_spill] sm:$0xff] }
 0x519   :  { %5500 = vmatpush1.bf16.msra.mxu1 %v8736_v52  ;;  %4204 = vmatmul.mubr.f32.vlgmr.msra.gmra.mrb[8].mxu0 %v7380_v48 }
 0x51a   :  { %5452 = vmatpush1.bf16.msra.mxu0 %v8685_v3  ;;  %5502 = vmatprep.subr.bf16.mxu1 %v8737_v34  ;;  %v8752_v3 = vld [vmem:[#allocation28_spill] sm:$0xff] }
 0x51b   :  { %5454 = vmatprep.subr.bf16.mxu0 %v8689_v12  ;;  %4292 = vmatprep.mubr.f32.mxu0 %v8484_v18  ;;  %v8753_v12 = vld [vmem:[#allocation32_spill] sm:$0xff] }
 0x51c   :  { %4656 = vmatprep.mubr.f32.mxu1 %v8484_v18 }
 0x51d   :  { %5504 = vmatpush1.bf16.msra.mxu1 %v8738_v21 }
 0x51e   :  { %5456 = vmatpush1.bf16.msra.mxu0 %v8695_v61  ;;  %5506 = vmatprep.subr.bf16.mxu1 %v5505_v58  ;;  %v8747_v61 = vld [vmem:[#allocation30_spill] sm:$0xff] }
 0x51f   :  { %5458 = vmatprep.subr.bf16.mxu0 %v8698_v53  ;;  %v8748_v53 = vld [vmem:[#allocation68_spill] sm:$0xff] }
 0x521   :  { %5508 = vmatpush1.bf16.msra.mxu1 %v5507_v11 }
 0x522   :  { %5460 = vmatpush1.bf16.msra.mxu0 %v8700_v63  ;;  %5510 = vmatprep.subr.bf16.mxu1 %v8739_v40  ;;  %v8754_v63 = vand.u32 4294901760, %v8072_v20 }
 0x523   :  { %5462 = vmatprep.subr.bf16.mxu0 %v8703_v27  ;;  %v8751_v27 = vld [vmem:[#allocation26_spill] sm:$0xff] }
 0x525   :  { %5512 = vmatpush1.bf16.msra.mxu1 %v5511_v7 }
 0x526   :  { %5464 = vmatpush1.bf16.msra.mxu0 %v8706_v31  ;;  %4606 = vmatprep.subr.mxu1 %v8124_v43  ;;  %v8755_v31 = vand.u32 4294901760, %v8062_v41 }
 0x527   :  { %4243 = vmatprep.subr.mxu0 %v8740_v9 }
 0x528   :  { %v5537_v25 = vpack.c.bf16 %v8755_v31, %v8754_v63  ;;  %v8772_v63 = vld [vmem:[#allocation22_spill] sm:$0xff] }
 0x529   :  { %4609 = vmatpush1.msra.mxu1 %v8146_v55 }
 0x52a   :  { %4245 = vmatpush1.msra.mxu0 %v7872_v36  ;;  %5514 = vmatprep.subr.bf16.mxu1 %v8741_v23  ;;  %v8749_v36 = vld [vmem:[#allocation50_spill] sm:$0xff] }
 0x52b   :  { %4294 = vmatmul.mubr.f32.vlgmr.msra.gmra.mrb[8].mxu0 %v7380_v48  ;;  %4659 = vmatmul.mubr.f32.vlgmr.msra.gmra.mrb[4].mxu1 %v8742_v24 }
 0x52c   :  { %5516 = vmatpush1.bf16.msra.mxu1 %v8743_v4  ;;  %4747 = vmatprep.mubr.f32.mxu1 %v8484_v18 }
 0x52d   :  { %5518 = vmatprep.subr.bf16.mxu1 %v8744_v59 }
 0x530   :  { %5520 = vmatpush1.bf16.msra.mxu1 %v8745_v62 }
 0x531   :  { %5522 = vmatprep.subr.bf16.mxu1 %v8746_v19 }
 0x534   :  { %5524 = vmatpush1.bf16.msra.mxu1 %v8747_v61 }
 0x535   :  { %5526 = vmatprep.subr.bf16.mxu1 %v8748_v53 }
 0x538   :  { %5528 = vmatpush1.bf16.msra.mxu1 %v8749_v36 }
 0x539   :  { %4698 = vmatprep.subr.mxu1 %v8750_v57 }
 0x53c   :  { %4700 = vmatpush1.msra.mxu1 %v8100_v16 }
 0x53d   :  { %5530 = vmatprep.subr.bf16.mxu1 %v8751_v27  ;;  %4751 = vmatmul.mubr.f32.vlgmr.msra.gmra.mrb[4].mxu1 %v8718_v6  ;;  %v8759_v6 = vld [vmem:[#allocation27_spill] sm:$0xff] }
 0x53e   :  { %5532 = vmatpush1.bf16.msra.mxu1 %v8752_v3  ;;  %4875 = vmatprep.mubr.f32.mxu1 %v8484_v18 }
 0x53f   :  { %5534 = vmatprep.subr.bf16.mxu1 %v8753_v12 }
 0x542   :  { %5536 = vmatpush1.bf16.msra.mxu1 %v8756_v33 }
 0x543   :  { %5538 = vmatprep.subr.bf16.mxu1 %v5537_v25 }
 0x546   :  { %5540 = vmatpush1.bf16.msra.mxu1 %v5539_v5 }
 0x547   :  { %5542 = vmatprep.subr.bf16.mxu1 %v8759_v6 }
 0x54a   :  { %5544 = vmatpush1.bf16.msra.mxu1 %v5543_v35 }
 0x54b   :  { %4824 = vmatprep.subr.mxu1 %v4492_v26  ;;  %v8762_v26 = vld [vmem:[#allocation17_spill] sm:$0xff] }
 0x54e   :  { %4828 = vmatpush1.msra.mxu1 %v4498_v8 }
 0x54f   :  { %5546 = vmatprep.subr.bf16.mxu1 %v8741_v23  ;;  %4877 = vmatmul.mubr.f32.vlgmr.msra.gmra.mrb[4].mxu1 %v7380_v48  ;;  %v8767_v23 = vld [vmem:[#allocation14_spill] sm:$0xff] }
 0x550   :  { %5548 = vmatpush1.bf16.msra.mxu1 %v8743_v4  ;;  %4965 = vmatprep.mubr.f32.mxu1 %v8484_v18  ;;  %v8768_v4 = vld [vmem:[#allocation16_spill] sm:$0xff] }
 0x551   :  { %5550 = vmatprep.subr.bf16.mxu1 %v8744_v59 }
 0x554   :  { %5552 = vmatpush1.bf16.msra.mxu1 %v8745_v62  ;;  %v8769_v62 = vld [vmem:[#allocation19_spill] sm:$0xff] }
 0x555   :  { %5554 = vmatprep.subr.bf16.mxu1 %v8746_v19 }
 0x558   :  { %5556 = vmatpush1.bf16.msra.mxu1 %v8747_v61  ;;  %v8770_v61 = vld [vmem:[#allocation20_spill] sm:$0xff] }
 0x559   :  { %5558 = vmatprep.subr.bf16.mxu1 %v8748_v53 }
 0x55c   :  { %5560 = vmatpush1.bf16.msra.mxu1 %v8749_v36  ;;  %v8771_v36 = vld [vmem:[#allocation21_spill] sm:$0xff] }
 0x55d   :  { %4916 = vmatprep.subr.mxu1 %v8750_v57 }
 0x560   :  { %4918 = vmatpush1.msra.mxu1 %v8100_v16 }
 0x561   :  { %4967 = vmatmul.mubr.f32.vlgmr.msra.gmra.mrb[4].mxu1 %v7380_v48 }
 0x56f   :  { %v3043_v41 = vpop.f32.mrb[6].mxu0 }
 0x570   :  { %v3045_v18 = vpop.f32.mrb[7].mxu0 }
 0x5c5   :  { %v3622_v32 = vpop.f32.mrb[2].mxu1 }
 0x5c6   :  { %v5563_v20 = vadd.f32 %v3622_v32, %v3043_v41  ;;  %v3624_v13 = vpop.f32.mrb[3].mxu1 }
 0x5c7   :  { %v5564_v29 = vadd.f32 %v3624_v13, %v3045_v18 }
 0x5c8   :  { %v4973_v55 = vmul.f32 %v5563_v20, %v8761_v56 }
 0x5c9   :  { %v4974_v8 = vmul.f32 %v5564_v29, %v8762_v26 }
 0x5ca   :  { %v4979_v49 = vsel %vm803_vm9, %v4973_v55, 0.0 }
 0x5cb   :  { %v4980_v16 = vsel %vm803_vm9, %v4974_v8, 0.0 }
 0x5cc   :  { %v4981_v28 = vadd.f32 %v4980_v16, %v4979_v49 }
 0x5fe   :  { %v4295_v45 = vpop.f32.mrb[8].mxu0 }
 0x5ff   :  { %v4297_v43 = vpop.f32.mrb[9].mxu0  ;;  %v4975_v10 = vmul.f32 %v4295_v45, %v8763_v42  ;;  %v5025_v45 = vld [vmem:[%s8319_s6] sm:$0xf]  ;;  %v8773_v42 = vmov 1   ;;  %s5743_s6 = smov [#allocation7]  }
 0x600   :  { %v4976_v22 = vmul.f32 %v4297_v43, %v8764_v50  ;;  %s5108_s11 = sshll.u32 %s5743_s6, 4  ;;  %s5109_s11 = int_to_ptr.vmem [resolvable:$true] %s5108_s11 }
 0x601   :  { %v4982_v48 = vsel %vm803_vm9, %v4975_v10, 0.0  ;;  %s5699_s12 = scalar_lea.vmem %s5109_s11, 384  ;;  %p5704_p9 = scmp.lt.s32.totalorder %s5109_s11, %s5109_s11 }
 0x602   :  { %v4983_v1 = vadd.f32 %v4982_v48, %v4981_v28  ;;  %v4984_v17 = vsel %vm803_vm9, %v4976_v22, 0.0  ;;  %p5700_p8 = scmp.ne.s32.totalorder %s5109_s11, %s5699_s12  ;;  %p5705_p10 = scmp.lt.s32.totalorder %s5699_s12, %s5699_s12 }
 0x604   :  { %v4985_v51 = vadd.f32 %v4984_v17, %v4983_v1  ;;  %p5706_p11 = por %p5705_p10, %p5704_p9 }
 0x606   :  { %p5707_p12 = pnand %p5706_p11, %p5700_p8 }
 0x634   :  { %v4968_v39 = vpop.f32.mrb[4].mxu1 }
 0x635   :  { %v4977_v44 = vmul.f32 %v4968_v39, %v8765_v15  ;;  %v4970_v30 = vpop.f32.mrb[5].mxu1 }
 0x636   :  { %v4978_v2 = vmul.f32 %v4970_v30, %v8766_v47 }
 0x637   :  { %v4986_v46 = vsel %vm803_vm9, %v4977_v44, 0.0 }
 0x638   :  { %v4987_v14 = vadd.f32 %v4986_v46, %v4985_v51  ;;  %v4988_v0 = vsel %vm803_vm9, %v4978_v2, 0.0 }
 0x63a   :  { %v4989_v38 = vadd.f32 %v4988_v0, %v4987_v14 }
 0x63c   :  { %4990 = vadd.xlane.f32.xlu0 %v4989_v38 }
 0x6c9   :  { %v4991_v52 = vpop.xlane.xlu0 %4990 }
 0x6ca   :  { %v4992_v34 = vmul.f32 0.001953125, %v4991_v52 }
 0x6cc   :  { %v4993_v58 = vsub.f32 %v4973_v55, %v4992_v34  ;;  %v4994_v21 = vsub.f32 %v4974_v8, %v4992_v34  ;;  %v4995_v11 = vsub.f32 %v4975_v10, %v4992_v34  ;;  %v4996_v40 = vsub.f32 %v4976_v22, %v4992_v34 }
 0x6cd   :  { %v4997_v7 = vsub.f32 %v4977_v44, %v4992_v34  ;;  %v4998_v9 = vsub.f32 %v4978_v2, %v4992_v34 }
 0x6ce   :  { %v4999_v24 = vmul.f32 %v4993_v58, %v8767_v23  ;;  %v5000_v59 = vmul.f32 %v4994_v21, %v8768_v4  ;;  %v5001_v19 = vmul.f32 %v4995_v11, %v8769_v62  ;;  %v5002_v53 = vmul.f32 %v4996_v40, %v8770_v61 }
 0x6cf   :  { %v5003_v57 = vmul.f32 %v4997_v7, %v8771_v36  ;;  %v5004_v31 = vmul.f32 %v4998_v9, %v8772_v63 }
 0x6d0   :  { %v5005_v27 = vmul.f32 %v4999_v24, %v4999_v24  ;;  %v5006_v3 = vmul.f32 %v5000_v59, %v5000_v59  ;;  %v5007_v12 = vmul.f32 %v5001_v19, %v5001_v19  ;;  %v5008_v25 = vmul.f32 %v5002_v53, %v5002_v53 }
 0x6d1   :  { %v5009_v5 = vmul.f32 %v5003_v57, %v5003_v57  ;;  %v5010_v35 = vmul.f32 %v5004_v31, %v5004_v31 }
 0x6d2   :  { %v5011_v33 = vsel %vm803_vm9, %v5005_v27, 0.0  ;;  %v5012_v54 = vsel %vm803_vm9, %v5006_v3, 0.0  ;;  %v5014_v6 = vsel %vm803_vm9, %v5007_v12, 0.0  ;;  %v5016_v41 = vsel %vm803_vm9, %v5008_v25, 0.0 }
 0x6d3   :  { %v5013_v37 = vadd.f32 %v5012_v54, %v5011_v33  ;;  %v5018_v32 = vsel %vm803_vm9, %v5009_v5, 0.0  ;;  %v5020_v13 = vsel %vm803_vm9, %v5010_v35, 0.0 }
 0x6d5   :  { %v5015_v60 = vadd.f32 %v5014_v6, %v5013_v37 }
 0x6d7   :  { %v5017_v18 = vadd.f32 %v5016_v41, %v5015_v60 }
 0x6d9   :  { %v5019_v20 = vadd.f32 %v5018_v32, %v5017_v18 }
 0x6db   :  { %v5021_v29 = vadd.f32 %v5020_v13, %v5019_v20 }
 0x6dd   :  { %5022 = vadd.xlane.f32.xlu1 %v5021_v29 }
 0x6ee   :  { %5042 = vperm.xlu1 %5641, %v5025_v45  }
 0x76a   :  { %v5023_v43 = vpop.xlane.xlu1 %5022 }
 0x76b   :  { %v5024_v56 = vmul.f32 0.001953125, %v5023_v43 }
 0x76d   :  { %v5026_v55 = vadd.f32 1e-05, %v5024_v56 }
 0x76e   :  { %v5043_v22 = vpop.permute.xlu1 %5042 }
 0x76f   :  { %5662 = vrsqrt.f32 %v5026_v55 }
 0x779   :  { %v5663_v26 = vpop.eup %5662 }
 0x77a   :  { %v5028_v8 = vmul.f32 %v5663_v26, %v5025_v45 }
 0x77c   :  { %5031 = vperm.xlu0 %5640, %v5028_v8  }
 0x780   :  { %5642 = vset.pattern.permute.xlu0 %v8773_v42 }
 0x7fb   :  { %v5032_v10 = vpop.permute.xlu0 %5031 }
 0x7fc   :  { %v5034_v49 = vmul.f32 %v5032_v10, %v4999_v24  ;;  %v5035_v16 = vmul.f32 %v5032_v10, %v5000_v59  ;;  %v5036_v48 = vmul.f32 %v5032_v10, %v5001_v19  ;;  %v5037_v50 = vmul.f32 %v5032_v10, %v5002_v53 }
 0x7fd   :  { %v5038_v28 = vmul.f32 %v5032_v10, %v5003_v57  ;;  %v5039_v1 = vmul.f32 %v5032_v10, %v5004_v31 }
 0x7fe   :  { %v5045_v17 = vadd.f32 %v5043_v22, %v5034_v49  ;;  %v5046_v39 = vadd.f32 %v5043_v22, %v5035_v16  ;;  %v5047_v15 = vadd.f32 %v5043_v22, %v5036_v48  ;;  %v5048_v44 = vadd.f32 %v5043_v22, %v5037_v50 }
 0x7ff   :  { %v5049_v30 = vadd.f32 %v5043_v22, %v5038_v28  ;;  %v5050_v51 = vadd.f32 %v5043_v22, %v5039_v1 }
 0x800   :  { %v5057_v47 = vmin.f32 %v5045_v17, 0.0  ;;  %v5058_v2 = vmin.f32 %v5046_v39, 0.0  ;;  %v5059_v46 = vmin.f32 %v5047_v15, 0.0  ;;  %v5060_v14 = vmin.f32 %v5048_v44, 0.0 }
 0x801   :  { %v5061_v0 = vmin.f32 %v5049_v30, 0.0  ;;  %v5062_v38 = vmin.f32 %v5050_v51, 0.0  ;;  %vm5051_vm0 = vcmp.gt.f32.partialorder %v5045_v17, 0.0  ;;  %vm5052_vm1 = vcmp.gt.f32.partialorder %v5046_v39, 0.0 }
 0x802   :  { %v5063_v52 = vmul.f32 1.442695, %v5057_v47  ;;  %v5065_v34 = vmul.f32 1.442695, %v5058_v2  ;;  %v5067_v58 = vmul.f32 1.442695, %v5059_v46 }
 0x803   :  { %v5069_v21 = vmul.f32 1.442695, %v5060_v14  ;;  %v5071_v11 = vmul.f32 1.442695, %v5061_v0  ;;  %v5073_v40 = vmul.f32 1.442695, %v5062_v38 }
 0x804   :  { %5664 = vpow2.f32 %v5063_v52  ;;  %vm5053_vm6 = vcmp.gt.f32.partialorder %v5047_v15, 0.0  ;;  %vm5054_vm9 = vcmp.gt.f32.partialorder %v5048_v44, 0.0  ;;  %vm5055_vm10 = vcmp.gt.f32.partialorder %v5049_v30, 0.0 }
 0x805   :  { %5666 = vpow2.f32 %v5065_v34  ;;  %vm5056_vm11 = vcmp.gt.f32.partialorder %v5050_v51, 0.0 }
 0x806   :  { %5668 = vpow2.f32 %v5067_v58 }
 0x807   :  { %5670 = vpow2.f32 %v5069_v21 }
 0x808   :  { %5672 = vpow2.f32 %v5071_v11 }
 0x809   :  { %5674 = vpow2.f32 %v5073_v40 }
 0x80e   :  { %v5665_v7 = vpop.eup %5664 }
 0x80f   :  { %v5667_v9 = vpop.eup %5666  ;;  %v5123_v23 = vadd.f32 -1.0, %v5665_v7 }
 0x810   :  { %v5669_v24 = vpop.eup %5668  ;;  %v5124_v4 = vadd.f32 -1.0, %v5667_v9 }
 0x811   :  { %v5671_v59 = vpop.eup %5670  ;;  %v5125_v62 = vadd.f32 -1.0, %v5669_v24  ;;  %v5081_v19 = vsel %vm5051_vm0, %v5045_v17, %v5123_v23 }
 0x812   :  { %v5673_v61 = vpop.eup %5672  ;;  %v5126_v53 = vadd.f32 -1.0, %v5671_v59  ;;  %v5082_v36 = vsel %vm5052_vm1, %v5046_v39, %v5124_v4 }
 0x813   :  { %v5675_v57 = vpop.eup %5674  ;;  %v5127_v27 = vadd.f32 -1.0, %v5673_v61  ;;  %v5083_v3 = vsel %vm5053_vm6, %v5047_v15, %v5125_v62  ;;  %v5093_v12 = vcombine.low %v5081_v19, %v5082_v36 }
 0x814   :  { %v5128_v63 = vadd.f32 -1.0, %v5675_v57  ;;  %v5084_v31 = vsel %vm5054_vm9, %v5048_v44, %v5126_v53 }
 0x815   :  { %v5085_v25 = vsel %vm5055_vm10, %v5049_v30, %v5127_v27  ;;  %v5094_v33 = vcombine.low %v5083_v3, %v5084_v31  ;;  %5099 = vst [vmem:[#allocation7] sm:$0xff] %v5093_v12 }
 0x816   :  { %v5086_v54 = vsel %vm5056_vm11, %v5050_v51, %v5128_v63 }
 0x817   :  { %v5095_v37 = vcombine.low %v5085_v25, %v5086_v54  ;;  %5100 = vst [vmem:[#allocation7 + $0x8] sm:$0xff] %v5094_v33 }
 0x819   :  { %5101 = vst [vmem:[#allocation7 + $0x10] sm:$0xff] %v5095_v37 }
 0x81a   :  { %5710 = shalt.err (!%p5707_p12)
}
 0x81b   :  { %s5711_s0 = scalar_lea.hbm %s8320_s7, 384 }
 0x81c   :  { %p5712_p13 = scmp.ne.s32.totalorder %s8320_s7, %s5711_s0  ;;  %p5715_p0 = scmp.lt.u32.totalorder %s5711_s0, %s8320_s7 }
 0x81e   :  { %p5717_p1 = pnand %p5715_p0, %p5712_p13 }
 0x820   :  { %5720 = shalt.err (!%p5717_p1)
}
 0x821   :  { %5111 = dma.vmem_to_hbm [thread:$0]  %s5109_s11, 384, %s8320_s7, [#allocation6]  }
 0x822   :  { %5723 = dma.done.wait [#allocation6], 384  }
 0x823   :  { %5724 = vsyncadd [#allocation6], 4294966912 }
 0x824   :  { %5115 = vsyncpa [#allocation5], 1 }
 0x825   :  { %5116 = vsyncpa [#allocation6], 1 }

</bundles_post_ra>
